<compile_context>
chip_gen: v5e
topology: v5e:2x2
jax: 0.10.0
libtpu: 0.0.40
codegen_flags: <defaults>
</compile_context>

<pallas_src>
import jax
import jax.numpy as jnp
from jax import lax
from jax.experimental import pallas as pl
from jax.experimental.pallas import tpu as pltpu


def _round_up(x, m):
    return ((x + m - 1) // m) * m


# ----------------------------------------------------------------------------------
# Kernel 1: bidirectional masked LSTM, grid = (direction, time-chunk).
# ----------------------------------------------------------------------------------
def _bidir_lstm_kernel(x_ref, len_ref, wih_ref, whh_ref, b_ref, hout_ref,
                       xw_ref, h_sc, c_sc):
    TT, Bp, Dp = x_ref.shape
    Hp = h_sc.shape[1]

    # Reset the recurrent carry at the first time-chunk of each direction.
    @pl.when(pl.program_id(1) == 0)
    def _():
        h_sc[...] = jnp.zeros_like(h_sc)
        c_sc[...] = jnp.zeros_like(c_sc)

    # Hoisted input projection: one chunk-wide MXU matmul (bf16 in, f32 accumulate).
    x2d = x_ref[...].reshape(TT * Bp, Dp)                       # bf16, layout-preserving
    xw = jnp.dot(x2d, wih_ref[...], preferred_element_type=jnp.float32) + b_ref[...]
    xw_ref[...] = xw.reshape(TT, Bp, 4 * Hp)

    whh_bf = whh_ref[...]                                        # bf16, loaded once
    len_v = len_ref[...]                                         # (Bp, 1) int32 lengths
    t_base = pl.program_id(1) * TT

    def step(t, carry):
        h_prev, c_prev = carry                                   # (h, c) stay in vregs
        # Only the recurrent (Bp,Hp)x(Hp,4Hp) matmul remains on the serial path.
        gates = xw_ref[t] + jnp.dot(h_prev.astype(jnp.bfloat16), whh_bf,
                                    preferred_element_type=jnp.float32)
        sig = jax.nn.sigmoid(gates[:, :3 * Hp])                  # gate layout: i, f, o, g
        g_g = jnp.tanh(gates[:, 3 * Hp:])
        i_g = sig[:, :Hp]
        f_g = sig[:, Hp:2 * Hp]
        o_g = sig[:, 2 * Hp:]
        c_new = f_g * c_prev + i_g * g_g
        h_new = o_g * jnp.tanh(c_new)
        keep = (t_base + t) < len_v                              # (Bp, 1): t < length(b)
        h_upd = jnp.where(keep, h_new, h_prev)
        c_upd = jnp.where(keep, c_new, c_prev)
        hout_ref[t] = h_upd.astype(hout_ref.dtype)               # bf16 lane-dense store
        return (h_upd, c_upd)

    # Fully unrolled: EUP / VPU / MXU work from adjacent steps can interleave.
    h_fin, c_fin = lax.fori_loop(0, TT, step, (h_sc[...], c_sc[...]), unroll=True)
    h_sc[...] = h_fin                                            # carry to next chunk
    c_sc[...] = c_fin


def run_bidir_lstm(x_dir, lens, w_ih, w_hh, b, time_tile):
    _, Tp, Bp, Dp = x_dir.shape
    Hp4 = w_ih.shape[2]
    Hp = Hp4 // 4
    kt = Tp // time_tile
    # TODO(synk): on v7x verify the direction axis shards across both TensorCores with
    # plain "parallel"; if not, switch to pltpu.CORE_PARALLEL / pl.core_map.
    return pl.pallas_call(
        _bidir_lstm_kernel,
        out_shape=jax.ShapeDtypeStruct((2, Tp, Bp, Hp), jnp.bfloat16),
        grid=(2, kt),
        in_specs=[
            pl.BlockSpec((None, time_tile, Bp, Dp), lambda d, k: (d, k, 0, 0)),
            pl.BlockSpec((Bp, 1), lambda d, k: (0, 0)),
            pl.BlockSpec((None, Dp, Hp4), lambda d, k: (d, 0, 0)),
            pl.BlockSpec((None, Hp, Hp4), lambda d, k: (d, 0, 0)),
            pl.BlockSpec((None, 1, Hp4), lambda d, k: (d, 0, 0)),
        ],
        out_specs=pl.BlockSpec((None, time_tile, Bp, Hp), lambda d, k: (d, k, 0, 0)),
        scratch_shapes=[
            pltpu.VMEM((time_tile, Bp, Hp4), jnp.float32),   # hoisted x@W_ih + b
            pltpu.VMEM((Bp, Hp), jnp.float32),               # h carry (chunk boundary)
            pltpu.VMEM((Bp, Hp), jnp.float32),               # c carry (chunk boundary)
        ],
        compiler_params=pltpu.CompilerParams(
            dimension_semantics=("parallel", "arbitrary")),
    )(x_dir, lens, w_ih, w_hh, b)


# ----------------------------------------------------------------------------------
# Kernel 2: sentence attention + document pooling, gridded over batch sublane blocks.
#   u_i = tanh(h_f @ Ws_f + h_b @ Ws_b + bs);  u_w = sum(u_i * w_c) + bc
#   att = exp(u_w - max_over_valid_t(u_w)) masked; sw = att / sum_t att
#   docs = [sum_t h_f * sw, sum_t h_b * sw]
# ----------------------------------------------------------------------------------
def _attention_kernel(hf_ref, hb_ref, len_ref, wsf_ref, wsb_ref, bs_ref, wc_ref, bc_ref,
                      docs_ref, sw_ref):
    Tp, bb, Hp = hf_ref.shape
    Ap = wsf_ref.shape[1]
    hf = hf_ref[...]                                             # bf16
    hb = hb_ref[...]
    hf2 = hf.reshape(Tp * bb, Hp)
    hb2 = hb.reshape(Tp * bb, Hp)

    pre = (jnp.dot(hf2, wsf_ref[...], preferred_element_type=jnp.float32)
           + jnp.dot(hb2, wsb_ref[...], preferred_element_type=jnp.float32)
           + bs_ref[...])                                        # (Tp*bb, Ap) f32
    u_i = jnp.tanh(pre).reshape(Tp, bb, Ap)
    u_w = jnp.sum(u_i * wc_ref[...], axis=-1, keepdims=True) + bc_ref[...]  # (Tp,bb,1)

    len_v = len_ref[...]                                         # (bb, 1) int32
    t_iota = lax.broadcasted_iota(jnp.int32, (Tp, bb, 1), 0)
    valid = t_iota < len_v[None, :, :]                           # (Tp, bb, 1)

    u_msk = jnp.where(valid, u_w, jnp.float32(-1e30))
    m_max = jnp.max(u_msk, axis=0, keepdims=True)                # per-document max
    # exp of the masked value: stays finite even for fully-padded batch columns.
    att = jnp.where(valid, jnp.exp(u_msk - m_max), jnp.float32(0.0))
    denom = jnp.maximum(jnp.sum(att, axis=0, keepdims=True), jnp.float32(1e-30))
    sw = att / denom                                             # (Tp, bb, 1)

    docs_f = jnp.sum(hf * sw, axis=0)                            # (bb, Hp) f32
    docs_b = jnp.sum(hb * sw, axis=0)
    docs_ref[...] = jnp.concatenate([docs_f, docs_b], axis=-1)   # (bb, 2*Hp) lane-dense
    sw_ref[...] = jnp.transpose(sw[:, :, 0])                     # (bb, Tp) lane-dense


def run_attention(h_f_tm, h_b_tm, lens, w_s_f, w_s_b, b_s, w_c, b_c, bb=16):
    Tp, Bp, Hp = h_f_tm.shape
    Ap = w_s_f.shape[1]
    nb = Bp // bb
    return pl.pallas_call(
        _attention_kernel,
        out_shape=(jax.ShapeDtypeStruct((Bp, 2 * Hp), jnp.float32),
                   jax.ShapeDtypeStruct((Bp, Tp), jnp.float32)),
        grid=(nb,),
        in_specs=[
            pl.BlockSpec((Tp, bb, Hp), lambda i: (0, i, 0)),
            pl.BlockSpec((Tp, bb, Hp), lambda i: (0, i, 0)),
            pl.BlockSpec((bb, 1), lambda i: (i, 0)),
            pl.BlockSpec((Hp, Ap), lambda i: (0, 0)),
            pl.BlockSpec((Hp, Ap), lambda i: (0, 0)),
            pl.BlockSpec((1, Ap), lambda i: (0, 0)),
            pl.BlockSpec((1, 1, Ap), lambda i: (0, 0, 0)),
            pl.BlockSpec((1, 1, 1), lambda i: (0, 0, 0)),
        ],
        out_specs=(pl.BlockSpec((bb, 2 * Hp), lambda i: (i, 0)),
                   pl.BlockSpec((bb, Tp), lambda i: (i, 0))),
        compiler_params=pltpu.CompilerParams(dimension_semantics=("parallel",)),
    )(h_f_tm, h_b_tm, lens, w_s_f, w_s_b, b_s, w_c, b_c)


# ----------------------------------------------------------------------------------
# Parameters: logical init + padded / gate-reordered kernel layout (bf16 weights).
# ----------------------------------------------------------------------------------
def init_params(key, D, R, A):
    """Random parameters in logical layout; LSTM gate order i, f, g, o (PyTorch)."""
    H = R // 2
    ks = jax.random.split(key, 12)
    s = 0.1
    n = lambda k, shape: s * jax.random.normal(k, shape, dtype=jnp.float32)
    return dict(
        w_ih_f=n(ks[0], (D, 4 * H)),
        w_hh_f=n(ks[1], (H, 4 * H)),
        b_f=n(ks[2], (4 * H,)) + n(ks[3], (4 * H,)),     # b_ih + b_hh
        w_ih_b=n(ks[4], (D, 4 * H)),
        w_hh_b=n(ks[5], (H, 4 * H)),
        b_b=n(ks[6], (4 * H,)) + n(ks[7], (4 * H,)),
        w_s=n(ks[8], (R, A)),                            # sentence_weight (x @ W)
        b_s=n(ks[9], (A,)),
        w_c=n(ks[10], (A, 1)),                           # sentence_context_weight
        b_c=n(ks[11], (1,)),
    )


def prepare_params(raw, D, R, A):
    """Zero-pad to lane-aligned layout, reorder LSTM gates to (i,f,o,g), bf16 weights."""
    H = R // 2
    Hp = _round_up(H, 128)
    Dp = _round_up(D, 128)
    Ap = _round_up(A, 128)

    def pack_gates(w, rows_pad):
        i_g, f_g, g_g, o_g = jnp.split(w, 4, axis=1)     # PyTorch order i, f, g, o
        out = jnp.zeros((rows_pad, 4 * Hp), jnp.float32)
        for k, blk in enumerate((i_g, f_g, o_g, g_g)):   # kernel order i, f, o, g
            out = out.at[:w.shape[0], k * Hp:k * Hp + H].set(blk)
        return out

    def pack_bias(bvec):
        i_g, f_g, g_g, o_g = jnp.split(bvec, 4)
        out = jnp.zeros((1, 4 * Hp), jnp.float32)
        for k, blk in enumerate((i_g, f_g, o_g, g_g)):
            out = out.at[0, k * Hp:k * Hp + H].set(blk)
        return out

    w_ih = jnp.stack([pack_gates(raw['w_ih_f'], Dp),
                      pack_gates(raw['w_ih_b'], Dp)]).astype(jnp.bfloat16)
    w_hh = jnp.stack([pack_gates(raw['w_hh_f'], Hp),
                      pack_gates(raw['w_hh_b'], Hp)]).astype(jnp.bfloat16)
    b = jnp.stack([pack_bias(raw['b_f']), pack_bias(raw['b_b'])])   # f32 bias

    w_s_f = jnp.zeros((Hp, Ap), jnp.float32).at[:H, :A].set(
        raw['w_s'][:H]).astype(jnp.bfloat16)
    w_s_b = jnp.zeros((Hp, Ap), jnp.float32).at[:H, :A].set(
        raw['w_s'][H:]).astype(jnp.bfloat16)
    b_s = jnp.zeros((1, Ap), jnp.float32).at[0, :A].set(raw['b_s'])
    w_c = jnp.zeros((1, 1, Ap), jnp.float32).at[0, 0, :A].set(raw['w_c'][:, 0])
    b_c = jnp.reshape(raw['b_c'], (1, 1, 1))

    return dict(w_ih=w_ih, w_hh=w_hh, b=b,
                w_s_f=w_s_f, w_s_b=w_s_b, b_s=b_s, w_c=w_c, b_c=b_c,
                H=H, Hp=Hp, D=D, Dp=Dp, A=A, Ap=Ap)


# ----------------------------------------------------------------------------------
# Glue: PackedSequence unpack, padding/layout, reversal gather, final un-permutation.
# ----------------------------------------------------------------------------------
def sentence_attention_forward(params, sent_embeddings, doc_perm_idx, doc_valid_bsz,
                               word_att_weights, batch_size, time_tile=16):
    B = batch_size
    T = int(doc_valid_bsz.shape[0])
    D = int(sent_embeddings.shape[1])
    H, Hp, Dp = params['H'], params['Hp'], params['Dp']

    # packed -> padded (equivalent of pad_packed_sequence, batch_first=True)
    bsz = doc_valid_bsz.astype(jnp.int32)                          # (T,)
    offsets = jnp.concatenate([jnp.zeros((1,), jnp.int32), jnp.cumsum(bsz)[:-1]])
    b_idx = jnp.arange(B, dtype=jnp.int32)[:, None]
    mask = b_idx < bsz[None, :]                                    # (B, T)
    gather_idx = jnp.where(mask, offsets[None, :] + b_idx, 0)

    x_pad = jnp.where(mask[..., None], sent_embeddings[gather_idx], 0.0)       # (B,T,D)
    w_att_pad = jnp.where(mask[..., None], word_att_weights[gather_idx], 0.0)  # (B,T,S)

    lengths = jnp.sum(mask.astype(jnp.int32), axis=1)              # (B,)
    t_idx = jnp.arange(T, dtype=jnp.int32)[None, :]
    rev_t = jnp.where(mask, lengths[:, None] - 1 - t_idx, 0)       # (B, T)
    x_rev = jnp.where(mask[..., None],
                      jnp.take_along_axis(x_pad, rev_t[..., None], axis=1), 0.0)

    # pad to TPU-friendly shapes: lanes -> 128, batch sublanes -> 16 (full bf16 tiles),
    # time -> time_tile (time_tile capped so tiny problems stay a single chunk).
    Bp = _round_up(B, 16)
    time_tile = min(time_tile, _round_up(T, 8))
    Tp = _round_up(T, time_tile)

    x_f_tm = jnp.zeros((Tp, Bp, Dp), jnp.bfloat16).at[:T, :B, :D].set(
        jnp.transpose(x_pad, (1, 0, 2)).astype(jnp.bfloat16))
    x_r_tm = jnp.zeros((Tp, Bp, Dp), jnp.bfloat16).at[:T, :B, :D].set(
        jnp.transpose(x_rev, (1, 0, 2)).astype(jnp.bfloat16))
    x_dir = jnp.stack([x_f_tm, x_r_tm], axis=0)                    # (2, Tp, Bp, Dp) bf16
    lens_p = jnp.zeros((Bp, 1), jnp.int32).at[:B, 0].set(lengths)  # per-doc lengths

    # bidirectional masked LSTM (one kernel; direction axis "parallel")
    hout = run_bidir_lstm(x_dir, lens_p, params['w_ih'], params['w_hh'], params['b'],
                          time_tile)                               # (2,Tp,Bp,Hp) bf16
    h_f_tm = hout[0]
    # undo the per-sequence time reversal of the backward direction (gather glue);
    # padded time/batch positions need no zeroing: the attention kernel gives them sw=0.
    rev_tm = jnp.zeros((Tp, Bp), jnp.int32).at[:T, :B].set(rev_t.T)
    h_b_tm = jnp.take_along_axis(hout[1], rev_tm[..., None], axis=0)

    # sentence attention + document pooling
    docs_p, sw = run_attention(h_f_tm, h_b_tm, lens_p,
                               params['w_s_f'], params['w_s_b'], params['b_s'],
                               params['w_c'], params['b_c'])
    docs = jnp.concatenate([docs_p[:B, :H], docs_p[:B, Hp:Hp + H]], axis=-1)   # (B, R)
    sent_att = sw[:B, :T]                                                      # (B, T)

    # undo the document sort permutation (docs[doc_unperm_idx] in PyTorch)
    unperm = jnp.argsort(doc_perm_idx)
    return docs[unperm], w_att_pad[unperm], sent_att[unperm]


if __name__ == "__main__":
    D = 16   # word_recurrent_size
    R = 32   # recurrent_size (bidirectional output size)
    A = 8    # attention_dim
    S = 12   # max sentence length (width of word attention weights)

    doc_lengths = [5, 3, 2]          # documents sorted by length (PackedSequence order)
    B = len(doc_lengths)
    T = max(doc_lengths)
    doc_valid_bsz = jnp.array(
        [sum(1 for L in doc_lengths if L > t) for t in range(T)], dtype=jnp.int32)
    N = int(sum(doc_lengths))        # total packed sentences

    key = jax.random.PRNGKey(0)
    k_par, k_x, k_w = jax.random.split(key, 3)
    raw = init_params(k_par, D, R, A)
    params = prepare_params(raw, D, R, A)
    sent_embeddings = jax.random.normal(k_x, (N, D), dtype=jnp.float32)
    word_att_weights = jax.nn.softmax(
        jax.random.normal(k_w, (N, S), dtype=jnp.float32), axis=-1)
    doc_perm_idx = jnp.array([2, 0, 1], dtype=jnp.int32)

    docs, word_att, sent_att = sentence_attention_forward(
        params, sent_embeddings, doc_perm_idx, doc_valid_bsz, word_att_weights,
        batch_size=B)
    jax.block_until_ready((docs, word_att, sent_att))

    assert docs.shape == (B, R)
    assert word_att.shape == (B, T, S)
    assert sent_att.shape == (B, T)
    assert bool(jnp.all(jnp.isfinite(docs)))
    # sentence attention weights must normalize to 1 over each document
    assert bool(jnp.allclose(jnp.sum(sent_att, axis=1), 1.0, atol=1e-4))
    print("KERNEL_OK")
</pallas_src>

<mosaic_0001>
module attributes {stable_mosaic.version = 11 : i64} {
  func.func @_bidir_lstm_kernel(%arg0: i32, %arg1: i32, %arg2: memref<1x8x16x128xbf16, #tpu.memory_space<vmem>>, %arg3: memref<16x1xi32, #tpu.memory_space<vmem>>, %arg4: memref<1x128x512xbf16, #tpu.memory_space<vmem>>, %arg5: memref<1x128x512xbf16, #tpu.memory_space<vmem>>, %arg6: memref<1x1x512xf32, #tpu.memory_space<vmem>>, %arg7: memref<1x8x16x128xbf16, #tpu.memory_space<vmem>>, %arg8: memref<8x16x512xf32, #tpu.memory_space<vmem>>, %arg9: memref<16x128xf32, #tpu.memory_space<vmem>>, %arg10: memref<16x128xf32, #tpu.memory_space<vmem>>) attributes {dimension_semantics = [#tpu.dimension_semantics<parallel>, #tpu.dimension_semantics<arbitrary>], iteration_bounds = array<i64: 2, 1>, scalar_prefetch = 0 : i64, scratch_operands = 3 : i64, tpu.core_type = #tpu.core_type<tc>, window_params = [{transform_indices = @transform_0, window_bounds = array<i64: 1, 8, 16, 128>}, {pipeline_mode = #tpu.pipeline_mode<synchronous>, transform_indices = @transform_1, window_bounds = array<i64: 16, 1>}, {transform_indices = @transform_2, window_bounds = array<i64: 1, 128, 512>}, {transform_indices = @transform_3, window_bounds = array<i64: 1, 128, 512>}, {transform_indices = @transform_4, window_bounds = array<i64: 1, 1, 512>}, {transform_indices = @transform_5, window_bounds = array<i64: 1, 8, 16, 128>}]} {
    %c0_i32 = arith.constant 0 : i32
    %0 = arith.cmpi eq, %arg1, %c0_i32 : i32
    %1 = arith.extui %0 : i1 to i32
    %c0_i32_0 = arith.constant 0 : i32
    %2 = arith.cmpi ne, %1, %c0_i32_0 : i32
    scf.if %2 {
      %cst_84 = arith.constant 0.000000e+00 : f32
      %311 = vector.broadcast %cst_84 : f32 to vector<16x128xf32>
      %c0_85 = arith.constant 0 : index
      %c0_86 = arith.constant 0 : index
      %312 = vector.load %arg9[%c0_85, %c0_86] : memref<16x128xf32, #tpu.memory_space<vmem>>, vector<16x128xf32>
      tpu.vector_store %arg9[%c0_85, %c0_86], %311 {strides = array<i32>} : memref<16x128xf32, #tpu.memory_space<vmem>>, vector<16x128xf32>,
      %cst_87 = arith.constant 0.000000e+00 : f32
      %313 = vector.broadcast %cst_87 : f32 to vector<16x128xf32>
      %c0_88 = arith.constant 0 : index
      %c0_89 = arith.constant 0 : index
      %314 = vector.load %arg10[%c0_88, %c0_89] : memref<16x128xf32, #tpu.memory_space<vmem>>, vector<16x128xf32>
      tpu.vector_store %arg10[%c0_88, %c0_89], %313 {strides = array<i32>} : memref<16x128xf32, #tpu.memory_space<vmem>>, vector<16x128xf32>,
    } else {
    }
    %c0 = arith.constant 0 : index
    %c0_1 = arith.constant 0 : index
    %c0_2 = arith.constant 0 : index
    %c0_3 = arith.constant 0 : index
    %3 = vector.load %arg2[%c0, %c0_1, %c0_2, %c0_3] : memref<1x8x16x128xbf16, #tpu.memory_space<vmem>>, vector<1x8x16x128xbf16>
    %4 = vector.shape_cast %3 : vector<1x8x16x128xbf16> to vector<8x16x128xbf16>
    %5 = vector.shape_cast %4 : vector<8x16x128xbf16> to vector<128x128xbf16>
    %c0_4 = arith.constant 0 : index
    %c0_5 = arith.constant 0 : index
    %c0_6 = arith.constant 0 : index
    %6 = vector.load %arg4[%c0_4, %c0_5, %c0_6] : memref<1x128x512xbf16, #tpu.memory_space<vmem>>, vector<1x128x512xbf16>
    %7 = vector.shape_cast %6 : vector<1x128x512xbf16> to vector<128x512xbf16>
    %cst = arith.constant dense<0.000000e+00> : vector<128x512xf32>
    %8 = tpu.matmul %5, %7, %cst {dimension_numbers = #tpu.dot_dimension_numbers<[1], [0], [0], [1], [0, 0, 1, 1], [], []>} : vector<128x128xbf16>, vector<128x512xbf16>, vector<128x512xf32> -> vector<128x512xf32>
    %c0_7 = arith.constant 0 : index
    %c0_8 = arith.constant 0 : index
    %c0_9 = arith.constant 0 : index
    %9 = vector.load %arg6[%c0_7, %c0_8, %c0_9] : memref<1x1x512xf32, #tpu.memory_space<vmem>>, vector<1x1x512xf32>
    %10 = vector.shape_cast %9 : vector<1x1x512xf32> to vector<1x512xf32>
    %11 = vector.broadcast %10 : vector<1x512xf32> to vector<128x512xf32>
    %12 = arith.addf %8, %11 : vector<128x512xf32>
    %13 = vector.shape_cast %12 : vector<128x512xf32> to vector<8x16x512xf32>
    %c0_10 = arith.constant 0 : index
    %c0_11 = arith.constant 0 : index
    %c0_12 = arith.constant 0 : index
    %14 = vector.load %arg8[%c0_10, %c0_11, %c0_12] : memref<8x16x512xf32, #tpu.memory_space<vmem>>, vector<8x16x512xf32>
    tpu.vector_store %arg8[%c0_10, %c0_11, %c0_12], %13 {strides = array<i32>} : memref<8x16x512xf32, #tpu.memory_space<vmem>>, vector<8x16x512xf32>,
    %c0_13 = arith.constant 0 : index
    %c0_14 = arith.constant 0 : index
    %c0_15 = arith.constant 0 : index
    %15 = vector.load %arg5[%c0_13, %c0_14, %c0_15] : memref<1x128x512xbf16, #tpu.memory_space<vmem>>, vector<1x128x512xbf16>
    %16 = vector.shape_cast %15 : vector<1x128x512xbf16> to vector<128x512xbf16>
    %c0_16 = arith.constant 0 : index
    %c0_17 = arith.constant 0 : index
    %17 = vector.load %arg3[%c0_16, %c0_17] : memref<16x1xi32, #tpu.memory_space<vmem>>, vector<16x1xi32>
    %c8_i32 = arith.constant 8 : i32
    %18 = arith.muli %arg1, %c8_i32 : i32
    %c0_18 = arith.constant 0 : index
    %c0_19 = arith.constant 0 : index
    %19 = vector.load %arg9[%c0_18, %c0_19] : memref<16x128xf32, #tpu.memory_space<vmem>>, vector<16x128xf32>
    %c0_20 = arith.constant 0 : index
    %c0_21 = arith.constant 0 : index
    %20 = vector.load %arg10[%c0_20, %c0_21] : memref<16x128xf32, #tpu.memory_space<vmem>>, vector<16x128xf32>
    %c0_i32_22 = arith.constant 0 : i32
    %21 = arith.index_cast %c0_i32_22 : i32 to index
    %c0_23 = arith.constant 0 : index
    %c0_24 = arith.constant 0 : index
    %22 = vector.load %arg8[%21, %c0_23, %c0_24] : memref<8x16x512xf32, #tpu.memory_space<vmem>>, vector<1x16x512xf32>
    %23 = vector.shape_cast %22 : vector<1x16x512xf32> to vector<16x512xf32>
    %24 = arith.truncf %19 : vector<16x128xf32> to vector<16x128xbf16>
    %cst_25 = arith.constant dense<0.000000e+00> : vector<16x512xf32>
    %25 = tpu.matmul %24, %16, %cst_25 {dimension_numbers = #tpu.dot_dimension_numbers<[1], [0], [0], [1], [0, 0, 1, 1], [], []>} : vector<16x128xbf16>, vector<128x512xbf16>, vector<16x512xf32> -> vector<16x512xf32>
    %26 = arith.addf %23, %25 : vector<16x512xf32>
    %27 = vector.extract_strided_slice %26 {offsets = [0, 0], sizes = [16, 384], strides = [1, 1]} : vector<16x512xf32> to vector<16x384xf32>
    %28 = arith.negf %27 : vector<16x384xf32>
    %29 = math.exp %28 : vector<16x384xf32>
    %cst_26 = arith.constant 1.000000e+00 : f32
    %30 = vector.broadcast %cst_26 : f32 to vector<16x384xf32>
    %31 = arith.addf %30, %29 : vector<16x384xf32>
    %32 = arith.divf %30, %31 : vector<16x384xf32>
    %33 = vector.extract_strided_slice %26 {offsets = [0, 384], sizes = [16, 128], strides = [1, 1]} : vector<16x512xf32> to vector<16x128xf32>
    %34 = math.tanh %33 : vector<16x128xf32>
    %35 = vector.extract_strided_slice %32 {offsets = [0, 0], sizes = [16, 128], strides = [1, 1]} : vector<16x384xf32> to vector<16x128xf32>
    %36 = vector.extract_strided_slice %32 {offsets = [0, 128], sizes = [16, 128], strides = [1, 1]} : vector<16x384xf32> to vector<16x128xf32>
    %37 = vector.extract_strided_slice %32 {offsets = [0, 256], sizes = [16, 128], strides = [1, 1]} : vector<16x384xf32> to vector<16x128xf32>
    %38 = arith.mulf %36, %20 : vector<16x128xf32>
    %39 = arith.mulf %35, %34 : vector<16x128xf32>
    %40 = arith.addf %38, %39 : vector<16x128xf32>
    %41 = math.tanh %40 : vector<16x128xf32>
    %42 = arith.mulf %37, %41 : vector<16x128xf32>
    %43 = arith.addi %18, %c0_i32_22 : i32
    %44 = vector.broadcast %43 : i32 to vector<16x1xi32>
    %45 = arith.cmpi slt, %44, %17 : vector<16x1xi32>
    %46 = vector.shape_cast %45 : vector<16x1xi1> to vector<16x1xi1>
    %47 = vector.broadcast %46 : vector<16x1xi1> to vector<16x128xi1>
    %48 = arith.select %47, %42, %19 : vector<16x128xi1>, vector<16x128xf32>
    %49 = vector.shape_cast %45 : vector<16x1xi1> to vector<16x1xi1>
    %50 = vector.broadcast %49 : vector<16x1xi1> to vector<16x128xi1>
    %51 = arith.select %50, %40, %20 : vector<16x128xi1>, vector<16x128xf32>
    %52 = arith.truncf %48 : vector<16x128xf32> to vector<16x128xbf16>
    %c0_27 = arith.constant 0 : index
    %53 = arith.index_cast %c0_i32_22 : i32 to index
    %c0_28 = arith.constant 0 : index
    %c0_29 = arith.constant 0 : index
    %54 = vector.load %arg7[%c0_27, %53, %c0_28, %c0_29] : memref<1x8x16x128xbf16, #tpu.memory_space<vmem>>, vector<1x1x16x128xbf16>
    %55 = vector.shape_cast %54 : vector<1x1x16x128xbf16> to vector<16x128xbf16>
    %56 = vector.shape_cast %52 : vector<16x128xbf16> to vector<1x1x16x128xbf16>
    tpu.vector_store %arg7[%c0_27, %53, %c0_28, %c0_29], %56 {strides = array<i32>} : memref<1x8x16x128xbf16, #tpu.memory_space<vmem>>, vector<1x1x16x128xbf16>,
    %c1_i32 = arith.constant 1 : i32
    %57 = arith.index_cast %c1_i32 : i32 to index
    %c0_30 = arith.constant 0 : index
    %c0_31 = arith.constant 0 : index
    %58 = vector.load %arg8[%57, %c0_30, %c0_31] : memref<8x16x512xf32, #tpu.memory_space<vmem>>, vector<1x16x512xf32>
    %59 = vector.shape_cast %58 : vector<1x16x512xf32> to vector<16x512xf32>
    %60 = arith.truncf %48 : vector<16x128xf32> to vector<16x128xbf16>
    %cst_32 = arith.constant dense<0.000000e+00> : vector<16x512xf32>
    %61 = tpu.matmul %60, %16, %cst_32 {dimension_numbers = #tpu.dot_dimension_numbers<[1], [0], [0], [1], [0, 0, 1, 1], [], []>} : vector<16x128xbf16>, vector<128x512xbf16>, vector<16x512xf32> -> vector<16x512xf32>
    %62 = arith.addf %59, %61 : vector<16x512xf32>
    %63 = vector.extract_strided_slice %62 {offsets = [0, 0], sizes = [16, 384], strides = [1, 1]} : vector<16x512xf32> to vector<16x384xf32>
    %64 = arith.negf %63 : vector<16x384xf32>
    %65 = math.exp %64 : vector<16x384xf32>
    %cst_33 = arith.constant 1.000000e+00 : f32
    %66 = vector.broadcast %cst_33 : f32 to vector<16x384xf32>
    %67 = arith.addf %66, %65 : vector<16x384xf32>
    %68 = arith.divf %66, %67 : vector<16x384xf32>
    %69 = vector.extract_strided_slice %62 {offsets = [0, 384], sizes = [16, 128], strides = [1, 1]} : vector<16x512xf32> to vector<16x128xf32>
    %70 = math.tanh %69 : vector<16x128xf32>
    %71 = vector.extract_strided_slice %68 {offsets = [0, 0], sizes = [16, 128], strides = [1, 1]} : vector<16x384xf32> to vector<16x128xf32>
    %72 = vector.extract_strided_slice %68 {offsets = [0, 128], sizes = [16, 128], strides = [1, 1]} : vector<16x384xf32> to vector<16x128xf32>
    %73 = vector.extract_strided_slice %68 {offsets = [0, 256], sizes = [16, 128], strides = [1, 1]} : vector<16x384xf32> to vector<16x128xf32>
    %74 = arith.mulf %72, %51 : vector<16x128xf32>
    %75 = arith.mulf %71, %70 : vector<16x128xf32>
    %76 = arith.addf %74, %75 : vector<16x128xf32>
    %77 = math.tanh %76 : vector<16x128xf32>
    %78 = arith.mulf %73, %77 : vector<16x128xf32>
    %79 = arith.addi %18, %c1_i32 : i32
    %80 = vector.broadcast %79 : i32 to vector<16x1xi32>
    %81 = arith.cmpi slt, %80, %17 : vector<16x1xi32>
    %82 = vector.shape_cast %81 : vector<16x1xi1> to vector<16x1xi1>
    %83 = vector.broadcast %82 : vector<16x1xi1> to vector<16x128xi1>
    %84 = arith.select %83, %78, %48 : vector<16x128xi1>, vector<16x128xf32>
    %85 = vector.shape_cast %81 : vector<16x1xi1> to vector<16x1xi1>
    %86 = vector.broadcast %85 : vector<16x1xi1> to vector<16x128xi1>
    %87 = arith.select %86, %76, %51 : vector<16x128xi1>, vector<16x128xf32>
    %88 = arith.truncf %84 : vector<16x128xf32> to vector<16x128xbf16>
    %c0_34 = arith.constant 0 : index
    %89 = arith.index_cast %c1_i32 : i32 to index
    %c0_35 = arith.constant 0 : index
    %c0_36 = arith.constant 0 : index
    %90 = vector.load %arg7[%c0_34, %89, %c0_35, %c0_36] : memref<1x8x16x128xbf16, #tpu.memory_space<vmem>>, vector<1x1x16x128xbf16>
    %91 = vector.shape_cast %90 : vector<1x1x16x128xbf16> to vector<16x128xbf16>
    %92 = vector.shape_cast %88 : vector<16x128xbf16> to vector<1x1x16x128xbf16>
    tpu.vector_store %arg7[%c0_34, %89, %c0_35, %c0_36], %92 {strides = array<i32>} : memref<1x8x16x128xbf16, #tpu.memory_space<vmem>>, vector<1x1x16x128xbf16>,
    %c2_i32 = arith.constant 2 : i32
    %93 = arith.index_cast %c2_i32 : i32 to index
    %c0_37 = arith.constant 0 : index
    %c0_38 = arith.constant 0 : index
    %94 = vector.load %arg8[%93, %c0_37, %c0_38] : memref<8x16x512xf32, #tpu.memory_space<vmem>>, vector<1x16x512xf32>
    %95 = vector.shape_cast %94 : vector<1x16x512xf32> to vector<16x512xf32>
    %96 = arith.truncf %84 : vector<16x128xf32> to vector<16x128xbf16>
    %cst_39 = arith.constant dense<0.000000e+00> : vector<16x512xf32>
    %97 = tpu.matmul %96, %16, %cst_39 {dimension_numbers = #tpu.dot_dimension_numbers<[1], [0], [0], [1], [0, 0, 1, 1], [], []>} : vector<16x128xbf16>, vector<128x512xbf16>, vector<16x512xf32> -> vector<16x512xf32>
    %98 = arith.addf %95, %97 : vector<16x512xf32>
    %99 = vector.extract_strided_slice %98 {offsets = [0, 0], sizes = [16, 384], strides = [1, 1]} : vector<16x512xf32> to vector<16x384xf32>
    %100 = arith.negf %99 : vector<16x384xf32>
    %101 = math.exp %100 : vector<16x384xf32>
    %cst_40 = arith.constant 1.000000e+00 : f32
    %102 = vector.broadcast %cst_40 : f32 to vector<16x384xf32>
    %103 = arith.addf %102, %101 : vector<16x384xf32>
    %104 = arith.divf %102, %103 : vector<16x384xf32>
    %105 = vector.extract_strided_slice %98 {offsets = [0, 384], sizes = [16, 128], strides = [1, 1]} : vector<16x512xf32> to vector<16x128xf32>
    %106 = math.tanh %105 : vector<16x128xf32>
    %107 = vector.extract_strided_slice %104 {offsets = [0, 0], sizes = [16, 128], strides = [1, 1]} : vector<16x384xf32> to vector<16x128xf32>
    %108 = vector.extract_strided_slice %104 {offsets = [0, 128], sizes = [16, 128], strides = [1, 1]} : vector<16x384xf32> to vector<16x128xf32>
    %109 = vector.extract_strided_slice %104 {offsets = [0, 256], sizes = [16, 128], strides = [1, 1]} : vector<16x384xf32> to vector<16x128xf32>
    %110 = arith.mulf %108, %87 : vector<16x128xf32>
    %111 = arith.mulf %107, %106 : vector<16x128xf32>
    %112 = arith.addf %110, %111 : vector<16x128xf32>
    %113 = math.tanh %112 : vector<16x128xf32>
    %114 = arith.mulf %109, %113 : vector<16x128xf32>
    %115 = arith.addi %18, %c2_i32 : i32
    %116 = vector.broadcast %115 : i32 to vector<16x1xi32>
    %117 = arith.cmpi slt, %116, %17 : vector<16x1xi32>
    %118 = vector.shape_cast %117 : vector<16x1xi1> to vector<16x1xi1>
    %119 = vector.broadcast %118 : vector<16x1xi1> to vector<16x128xi1>
    %120 = arith.select %119, %114, %84 : vector<16x128xi1>, vector<16x128xf32>
    %121 = vector.shape_cast %117 : vector<16x1xi1> to vector<16x1xi1>
    %122 = vector.broadcast %121 : vector<16x1xi1> to vector<16x128xi1>
    %123 = arith.select %122, %112, %87 : vector<16x128xi1>, vector<16x128xf32>
    %124 = arith.truncf %120 : vector<16x128xf32> to vector<16x128xbf16>
    %c0_41 = arith.constant 0 : index
    %125 = arith.index_cast %c2_i32 : i32 to index
    %c0_42 = arith.constant 0 : index
    %c0_43 = arith.constant 0 : index
    %126 = vector.load %arg7[%c0_41, %125, %c0_42, %c0_43] : memref<1x8x16x128xbf16, #tpu.memory_space<vmem>>, vector<1x1x16x128xbf16>
    %127 = vector.shape_cast %126 : vector<1x1x16x128xbf16> to vector<16x128xbf16>
    %128 = vector.shape_cast %124 : vector<16x128xbf16> to vector<1x1x16x128xbf16>
    tpu.vector_store %arg7[%c0_41, %125, %c0_42, %c0_43], %128 {strides = array<i32>} : memref<1x8x16x128xbf16, #tpu.memory_space<vmem>>, vector<1x1x16x128xbf16>,
    %c3_i32 = arith.constant 3 : i32
    %129 = arith.index_cast %c3_i32 : i32 to index
    %c0_44 = arith.constant 0 : index
    %c0_45 = arith.constant 0 : index
    %130 = vector.load %arg8[%129, %c0_44, %c0_45] : memref<8x16x512xf32, #tpu.memory_space<vmem>>, vector<1x16x512xf32>
    %131 = vector.shape_cast %130 : vector<1x16x512xf32> to vector<16x512xf32>
    %132 = arith.truncf %120 : vector<16x128xf32> to vector<16x128xbf16>
    %cst_46 = arith.constant dense<0.000000e+00> : vector<16x512xf32>
    %133 = tpu.matmul %132, %16, %cst_46 {dimension_numbers = #tpu.dot_dimension_numbers<[1], [0], [0], [1], [0, 0, 1, 1], [], []>} : vector<16x128xbf16>, vector<128x512xbf16>, vector<16x512xf32> -> vector<16x512xf32>
    %134 = arith.addf %131, %133 : vector<16x512xf32>
    %135 = vector.extract_strided_slice %134 {offsets = [0, 0], sizes = [16, 384], strides = [1, 1]} : vector<16x512xf32> to vector<16x384xf32>
    %136 = arith.negf %135 : vector<16x384xf32>
    %137 = math.exp %136 : vector<16x384xf32>
    %cst_47 = arith.constant 1.000000e+00 : f32
    %138 = vector.broadcast %cst_47 : f32 to vector<16x384xf32>
    %139 = arith.addf %138, %137 : vector<16x384xf32>
    %140 = arith.divf %138, %139 : vector<16x384xf32>
    %141 = vector.extract_strided_slice %134 {offsets = [0, 384], sizes = [16, 128], strides = [1, 1]} : vector<16x512xf32> to vector<16x128xf32>
    %142 = math.tanh %141 : vector<16x128xf32>
    %143 = vector.extract_strided_slice %140 {offsets = [0, 0], sizes = [16, 128], strides = [1, 1]} : vector<16x384xf32> to vector<16x128xf32>
    %144 = vector.extract_strided_slice %140 {offsets = [0, 128], sizes = [16, 128], strides = [1, 1]} : vector<16x384xf32> to vector<16x128xf32>
    %145 = vector.extract_strided_slice %140 {offsets = [0, 256], sizes = [16, 128], strides = [1, 1]} : vector<16x384xf32> to vector<16x128xf32>
    %146 = arith.mulf %144, %123 : vector<16x128xf32>
    %147 = arith.mulf %143, %142 : vector<16x128xf32>
    %148 = arith.addf %146, %147 : vector<16x128xf32>
    %149 = math.tanh %148 : vector<16x128xf32>
    %150 = arith.mulf %145, %149 : vector<16x128xf32>
    %151 = arith.addi %18, %c3_i32 : i32
    %152 = vector.broadcast %151 : i32 to vector<16x1xi32>
    %153 = arith.cmpi slt, %152, %17 : vector<16x1xi32>
    %154 = vector.shape_cast %153 : vector<16x1xi1> to vector<16x1xi1>
    %155 = vector.broadcast %154 : vector<16x1xi1> to vector<16x128xi1>
    %156 = arith.select %155, %150, %120 : vector<16x128xi1>, vector<16x128xf32>
    %157 = vector.shape_cast %153 : vector<16x1xi1> to vector<16x1xi1>
    %158 = vector.broadcast %157 : vector<16x1xi1> to vector<16x128xi1>
    %159 = arith.select %158, %148, %123 : vector<16x128xi1>, vector<16x128xf32>
    %160 = arith.truncf %156 : vector<16x128xf32> to vector<16x128xbf16>
    %c0_48 = arith.constant 0 : index
    %161 = arith.index_cast %c3_i32 : i32 to index
    %c0_49 = arith.constant 0 : index
    %c0_50 = arith.constant 0 : index
    %162 = vector.load %arg7[%c0_48, %161, %c0_49, %c0_50] : memref<1x8x16x128xbf16, #tpu.memory_space<vmem>>, vector<1x1x16x128xbf16>
    %163 = vector.shape_cast %162 : vector<1x1x16x128xbf16> to vector<16x128xbf16>
    %164 = vector.shape_cast %160 : vector<16x128xbf16> to vector<1x1x16x128xbf16>
    tpu.vector_store %arg7[%c0_48, %161, %c0_49, %c0_50], %164 {strides = array<i32>} : memref<1x8x16x128xbf16, #tpu.memory_space<vmem>>, vector<1x1x16x128xbf16>,
    %c4_i32 = arith.constant 4 : i32
    %165 = arith.index_cast %c4_i32 : i32 to index
    %c0_51 = arith.constant 0 : index
    %c0_52 = arith.constant 0 : index
    %166 = vector.load %arg8[%165, %c0_51, %c0_52] : memref<8x16x512xf32, #tpu.memory_space<vmem>>, vector<1x16x512xf32>
    %167 = vector.shape_cast %166 : vector<1x16x512xf32> to vector<16x512xf32>
    %168 = arith.truncf %156 : vector<16x128xf32> to vector<16x128xbf16>
    %cst_53 = arith.constant dense<0.000000e+00> : vector<16x512xf32>
    %169 = tpu.matmul %168, %16, %cst_53 {dimension_numbers = #tpu.dot_dimension_numbers<[1], [0], [0], [1], [0, 0, 1, 1], [], []>} : vector<16x128xbf16>, vector<128x512xbf16>, vector<16x512xf32> -> vector<16x512xf32>
    %170 = arith.addf %167, %169 : vector<16x512xf32>
    %171 = vector.extract_strided_slice %170 {offsets = [0, 0], sizes = [16, 384], strides = [1, 1]} : vector<16x512xf32> to vector<16x384xf32>
    %172 = arith.negf %171 : vector<16x384xf32>
    %173 = math.exp %172 : vector<16x384xf32>
    %cst_54 = arith.constant 1.000000e+00 : f32
    %174 = vector.broadcast %cst_54 : f32 to vector<16x384xf32>
    %175 = arith.addf %174, %173 : vector<16x384xf32>
    %176 = arith.divf %174, %175 : vector<16x384xf32>
    %177 = vector.extract_strided_slice %170 {offsets = [0, 384], sizes = [16, 128], strides = [1, 1]} : vector<16x512xf32> to vector<16x128xf32>
    %178 = math.tanh %177 : vector<16x128xf32>
    %179 = vector.extract_strided_slice %176 {offsets = [0, 0], sizes = [16, 128], strides = [1, 1]} : vector<16x384xf32> to vector<16x128xf32>
    %180 = vector.extract_strided_slice %176 {offsets = [0, 128], sizes = [16, 128], strides = [1, 1]} : vector<16x384xf32> to vector<16x128xf32>
    %181 = vector.extract_strided_slice %176 {offsets = [0, 256], sizes = [16, 128], strides = [1, 1]} : vector<16x384xf32> to vector<16x128xf32>
    %182 = arith.mulf %180, %159 : vector<16x128xf32>
    %183 = arith.mulf %179, %178 : vector<16x128xf32>
    %184 = arith.addf %182, %183 : vector<16x128xf32>
    %185 = math.tanh %184 : vector<16x128xf32>
    %186 = arith.mulf %181, %185 : vector<16x128xf32>
    %187 = arith.addi %18, %c4_i32 : i32
    %188 = vector.broadcast %187 : i32 to vector<16x1xi32>
    %189 = arith.cmpi slt, %188, %17 : vector<16x1xi32>
    %190 = vector.shape_cast %189 : vector<16x1xi1> to vector<16x1xi1>
    %191 = vector.broadcast %190 : vector<16x1xi1> to vector<16x128xi1>
    %192 = arith.select %191, %186, %156 : vector<16x128xi1>, vector<16x128xf32>
    %193 = vector.shape_cast %189 : vector<16x1xi1> to vector<16x1xi1>
    %194 = vector.broadcast %193 : vector<16x1xi1> to vector<16x128xi1>
    %195 = arith.select %194, %184, %159 : vector<16x128xi1>, vector<16x128xf32>
    %196 = arith.truncf %192 : vector<16x128xf32> to vector<16x128xbf16>
    %c0_55 = arith.constant 0 : index
    %197 = arith.index_cast %c4_i32 : i32 to index
    %c0_56 = arith.constant 0 : index
    %c0_57 = arith.constant 0 : index
    %198 = vector.load %arg7[%c0_55, %197, %c0_56, %c0_57] : memref<1x8x16x128xbf16, #tpu.memory_space<vmem>>, vector<1x1x16x128xbf16>
    %199 = vector.shape_cast %198 : vector<1x1x16x128xbf16> to vector<16x128xbf16>
    %200 = vector.shape_cast %196 : vector<16x128xbf16> to vector<1x1x16x128xbf16>
    tpu.vector_store %arg7[%c0_55, %197, %c0_56, %c0_57], %200 {strides = array<i32>} : memref<1x8x16x128xbf16, #tpu.memory_space<vmem>>, vector<1x1x16x128xbf16>,
    %c5_i32 = arith.constant 5 : i32
    %201 = arith.index_cast %c5_i32 : i32 to index
    %c0_58 = arith.constant 0 : index
    %c0_59 = arith.constant 0 : index
    %202 = vector.load %arg8[%201, %c0_58, %c0_59] : memref<8x16x512xf32, #tpu.memory_space<vmem>>, vector<1x16x512xf32>
    %203 = vector.shape_cast %202 : vector<1x16x512xf32> to vector<16x512xf32>
    %204 = arith.truncf %192 : vector<16x128xf32> to vector<16x128xbf16>
    %cst_60 = arith.constant dense<0.000000e+00> : vector<16x512xf32>
    %205 = tpu.matmul %204, %16, %cst_60 {dimension_numbers = #tpu.dot_dimension_numbers<[1], [0], [0], [1], [0, 0, 1, 1], [], []>} : vector<16x128xbf16>, vector<128x512xbf16>, vector<16x512xf32> -> vector<16x512xf32>
    %206 = arith.addf %203, %205 : vector<16x512xf32>
    %207 = vector.extract_strided_slice %206 {offsets = [0, 0], sizes = [16, 384], strides = [1, 1]} : vector<16x512xf32> to vector<16x384xf32>
    %208 = arith.negf %207 : vector<16x384xf32>
    %209 = math.exp %208 : vector<16x384xf32>
    %cst_61 = arith.constant 1.000000e+00 : f32
    %210 = vector.broadcast %cst_61 : f32 to vector<16x384xf32>
    %211 = arith.addf %210, %209 : vector<16x384xf32>
    %212 = arith.divf %210, %211 : vector<16x384xf32>
    %213 = vector.extract_strided_slice %206 {offsets = [0, 384], sizes = [16, 128], strides = [1, 1]} : vector<16x512xf32> to vector<16x128xf32>
    %214 = math.tanh %213 : vector<16x128xf32>
    %215 = vector.extract_strided_slice %212 {offsets = [0, 0], sizes = [16, 128], strides = [1, 1]} : vector<16x384xf32> to vector<16x128xf32>
    %216 = vector.extract_strided_slice %212 {offsets = [0, 128], sizes = [16, 128], strides = [1, 1]} : vector<16x384xf32> to vector<16x128xf32>
    %217 = vector.extract_strided_slice %212 {offsets = [0, 256], sizes = [16, 128], strides = [1, 1]} : vector<16x384xf32> to vector<16x128xf32>
    %218 = arith.mulf %216, %195 : vector<16x128xf32>
    %219 = arith.mulf %215, %214 : vector<16x128xf32>
    %220 = arith.addf %218, %219 : vector<16x128xf32>
    %221 = math.tanh %220 : vector<16x128xf32>
    %222 = arith.mulf %217, %221 : vector<16x128xf32>
    %223 = arith.addi %18, %c5_i32 : i32
    %224 = vector.broadcast %223 : i32 to vector<16x1xi32>
    %225 = arith.cmpi slt, %224, %17 : vector<16x1xi32>
    %226 = vector.shape_cast %225 : vector<16x1xi1> to vector<16x1xi1>
    %227 = vector.broadcast %226 : vector<16x1xi1> to vector<16x128xi1>
    %228 = arith.select %227, %222, %192 : vector<16x128xi1>, vector<16x128xf32>
    %229 = vector.shape_cast %225 : vector<16x1xi1> to vector<16x1xi1>
    %230 = vector.broadcast %229 : vector<16x1xi1> to vector<16x128xi1>
    %231 = arith.select %230, %220, %195 : vector<16x128xi1>, vector<16x128xf32>
    %232 = arith.truncf %228 : vector<16x128xf32> to vector<16x128xbf16>
    %c0_62 = arith.constant 0 : index
    %233 = arith.index_cast %c5_i32 : i32 to index
    %c0_63 = arith.constant 0 : index
    %c0_64 = arith.constant 0 : index
    %234 = vector.load %arg7[%c0_62, %233, %c0_63, %c0_64] : memref<1x8x16x128xbf16, #tpu.memory_space<vmem>>, vector<1x1x16x128xbf16>
    %235 = vector.shape_cast %234 : vector<1x1x16x128xbf16> to vector<16x128xbf16>
    %236 = vector.shape_cast %232 : vector<16x128xbf16> to vector<1x1x16x128xbf16>
    tpu.vector_store %arg7[%c0_62, %233, %c0_63, %c0_64], %236 {strides = array<i32>} : memref<1x8x16x128xbf16, #tpu.memory_space<vmem>>, vector<1x1x16x128xbf16>,
    %c6_i32 = arith.constant 6 : i32
    %237 = arith.index_cast %c6_i32 : i32 to index
    %c0_65 = arith.constant 0 : index
    %c0_66 = arith.constant 0 : index
    %238 = vector.load %arg8[%237, %c0_65, %c0_66] : memref<8x16x512xf32, #tpu.memory_space<vmem>>, vector<1x16x512xf32>
    %239 = vector.shape_cast %238 : vector<1x16x512xf32> to vector<16x512xf32>
    %240 = arith.truncf %228 : vector<16x128xf32> to vector<16x128xbf16>
    %cst_67 = arith.constant dense<0.000000e+00> : vector<16x512xf32>
    %241 = tpu.matmul %240, %16, %cst_67 {dimension_numbers = #tpu.dot_dimension_numbers<[1], [0], [0], [1], [0, 0, 1, 1], [], []>} : vector<16x128xbf16>, vector<128x512xbf16>, vector<16x512xf32> -> vector<16x512xf32>
    %242 = arith.addf %239, %241 : vector<16x512xf32>
    %243 = vector.extract_strided_slice %242 {offsets = [0, 0], sizes = [16, 384], strides = [1, 1]} : vector<16x512xf32> to vector<16x384xf32>
    %244 = arith.negf %243 : vector<16x384xf32>
    %245 = math.exp %244 : vector<16x384xf32>
    %cst_68 = arith.constant 1.000000e+00 : f32
    %246 = vector.broadcast %cst_68 : f32 to vector<16x384xf32>
    %247 = arith.addf %246, %245 : vector<16x384xf32>
    %248 = arith.divf %246, %247 : vector<16x384xf32>
    %249 = vector.extract_strided_slice %242 {offsets = [0, 384], sizes = [16, 128], strides = [1, 1]} : vector<16x512xf32> to vector<16x128xf32>
    %250 = math.tanh %249 : vector<16x128xf32>
    %251 = vector.extract_strided_slice %248 {offsets = [0, 0], sizes = [16, 128], strides = [1, 1]} : vector<16x384xf32> to vector<16x128xf32>
    %252 = vector.extract_strided_slice %248 {offsets = [0, 128], sizes = [16, 128], strides = [1, 1]} : vector<16x384xf32> to vector<16x128xf32>
    %253 = vector.extract_strided_slice %248 {offsets = [0, 256], sizes = [16, 128], strides = [1, 1]} : vector<16x384xf32> to vector<16x128xf32>
    %254 = arith.mulf %252, %231 : vector<16x128xf32>
    %255 = arith.mulf %251, %250 : vector<16x128xf32>
    %256 = arith.addf %254, %255 : vector<16x128xf32>
    %257 = math.tanh %256 : vector<16x128xf32>
    %258 = arith.mulf %253, %257 : vector<16x128xf32>
    %259 = arith.addi %18, %c6_i32 : i32
    %260 = vector.broadcast %259 : i32 to vector<16x1xi32>
    %261 = arith.cmpi slt, %260, %17 : vector<16x1xi32>
    %262 = vector.shape_cast %261 : vector<16x1xi1> to vector<16x1xi1>
    %263 = vector.broadcast %262 : vector<16x1xi1> to vector<16x128xi1>
    %264 = arith.select %263, %258, %228 : vector<16x128xi1>, vector<16x128xf32>
    %265 = vector.shape_cast %261 : vector<16x1xi1> to vector<16x1xi1>
    %266 = vector.broadcast %265 : vector<16x1xi1> to vector<16x128xi1>
    %267 = arith.select %266, %256, %231 : vector<16x128xi1>, vector<16x128xf32>
    %268 = arith.truncf %264 : vector<16x128xf32> to vector<16x128xbf16>
    %c0_69 = arith.constant 0 : index
    %269 = arith.index_cast %c6_i32 : i32 to index
    %c0_70 = arith.constant 0 : index
    %c0_71 = arith.constant 0 : index
    %270 = vector.load %arg7[%c0_69, %269, %c0_70, %c0_71] : memref<1x8x16x128xbf16, #tpu.memory_space<vmem>>, vector<1x1x16x128xbf16>
    %271 = vector.shape_cast %270 : vector<1x1x16x128xbf16> to vector<16x128xbf16>
    %272 = vector.shape_cast %268 : vector<16x128xbf16> to vector<1x1x16x128xbf16>
    tpu.vector_store %arg7[%c0_69, %269, %c0_70, %c0_71], %272 {strides = array<i32>} : memref<1x8x16x128xbf16, #tpu.memory_space<vmem>>, vector<1x1x16x128xbf16>,
    %c7_i32 = arith.constant 7 : i32
    %273 = arith.index_cast %c7_i32 : i32 to index
    %c0_72 = arith.constant 0 : index
    %c0_73 = arith.constant 0 : index
    %274 = vector.load %arg8[%273, %c0_72, %c0_73] : memref<8x16x512xf32, #tpu.memory_space<vmem>>, vector<1x16x512xf32>
    %275 = vector.shape_cast %274 : vector<1x16x512xf32> to vector<16x512xf32>
    %276 = arith.truncf %264 : vector<16x128xf32> to vector<16x128xbf16>
    %cst_74 = arith.constant dense<0.000000e+00> : vector<16x512xf32>
    %277 = tpu.matmul %276, %16, %cst_74 {dimension_numbers = #tpu.dot_dimension_numbers<[1], [0], [0], [1], [0, 0, 1, 1], [], []>} : vector<16x128xbf16>, vector<128x512xbf16>, vector<16x512xf32> -> vector<16x512xf32>
    %278 = arith.addf %275, %277 : vector<16x512xf32>
    %279 = vector.extract_strided_slice %278 {offsets = [0, 0], sizes = [16, 384], strides = [1, 1]} : vector<16x512xf32> to vector<16x384xf32>
    %280 = arith.negf %279 : vector<16x384xf32>
    %281 = math.exp %280 : vector<16x384xf32>
    %cst_75 = arith.constant 1.000000e+00 : f32
    %282 = vector.broadcast %cst_75 : f32 to vector<16x384xf32>
    %283 = arith.addf %282, %281 : vector<16x384xf32>
    %284 = arith.divf %282, %283 : vector<16x384xf32>
    %285 = vector.extract_strided_slice %278 {offsets = [0, 384], sizes = [16, 128], strides = [1, 1]} : vector<16x512xf32> to vector<16x128xf32>
    %286 = math.tanh %285 : vector<16x128xf32>
    %287 = vector.extract_strided_slice %284 {offsets = [0, 0], sizes = [16, 128], strides = [1, 1]} : vector<16x384xf32> to vector<16x128xf32>
    %288 = vector.extract_strided_slice %284 {offsets = [0, 128], sizes = [16, 128], strides = [1, 1]} : vector<16x384xf32> to vector<16x128xf32>
    %289 = vector.extract_strided_slice %284 {offsets = [0, 256], sizes = [16, 128], strides = [1, 1]} : vector<16x384xf32> to vector<16x128xf32>
    %290 = arith.mulf %288, %267 : vector<16x128xf32>
    %291 = arith.mulf %287, %286 : vector<16x128xf32>
    %292 = arith.addf %290, %291 : vector<16x128xf32>
    %293 = math.tanh %292 : vector<16x128xf32>
    %294 = arith.mulf %289, %293 : vector<16x128xf32>
    %295 = arith.addi %18, %c7_i32 : i32
    %296 = vector.broadcast %295 : i32 to vector<16x1xi32>
    %297 = arith.cmpi slt, %296, %17 : vector<16x1xi32>
    %298 = vector.shape_cast %297 : vector<16x1xi1> to vector<16x1xi1>
    %299 = vector.broadcast %298 : vector<16x1xi1> to vector<16x128xi1>
    %300 = arith.select %299, %294, %264 : vector<16x128xi1>, vector<16x128xf32>
    %301 = vector.shape_cast %297 : vector<16x1xi1> to vector<16x1xi1>
    %302 = vector.broadcast %301 : vector<16x1xi1> to vector<16x128xi1>
    %303 = arith.select %302, %292, %267 : vector<16x128xi1>, vector<16x128xf32>
    %304 = arith.truncf %300 : vector<16x128xf32> to vector<16x128xbf16>
    %c0_76 = arith.constant 0 : index
    %305 = arith.index_cast %c7_i32 : i32 to index
    %c0_77 = arith.constant 0 : index
    %c0_78 = arith.constant 0 : index
    %306 = vector.load %arg7[%c0_76, %305, %c0_77, %c0_78] : memref<1x8x16x128xbf16, #tpu.memory_space<vmem>>, vector<1x1x16x128xbf16>
    %307 = vector.shape_cast %306 : vector<1x1x16x128xbf16> to vector<16x128xbf16>
    %308 = vector.shape_cast %304 : vector<16x128xbf16> to vector<1x1x16x128xbf16>
    tpu.vector_store %arg7[%c0_76, %305, %c0_77, %c0_78], %308 {strides = array<i32>} : memref<1x8x16x128xbf16, #tpu.memory_space<vmem>>, vector<1x1x16x128xbf16>,
    %c8_i32_79 = arith.constant 8 : i32
    %c0_80 = arith.constant 0 : index
    %c0_81 = arith.constant 0 : index
    %309 = vector.load %arg9[%c0_80, %c0_81] : memref<16x128xf32, #tpu.memory_space<vmem>>, vector<16x128xf32>
    tpu.vector_store %arg9[%c0_80, %c0_81], %300 {strides = array<i32>} : memref<16x128xf32, #tpu.memory_space<vmem>>, vector<16x128xf32>,
    %c0_82 = arith.constant 0 : index
    %c0_83 = arith.constant 0 : index
    %310 = vector.load %arg10[%c0_82, %c0_83] : memref<16x128xf32, #tpu.memory_space<vmem>>, vector<16x128xf32>
    tpu.vector_store %arg10[%c0_82, %c0_83], %303 {strides = array<i32>} : memref<16x128xf32, #tpu.memory_space<vmem>>, vector<16x128xf32>,
    return
  }
  func.func @transform_0(%arg0: i32, %arg1: i32) -> (i32, i32, i32, i32) {
    %c0_i32 = arith.constant 0 : i32
    %c0_i32_0 = arith.constant 0 : i32
    %c0_i32_1 = arith.constant 0 : i32
    return %arg0, %arg1, %c0_i32, %c0_i32_0 : i32, i32, i32, i32
  }
  func.func @transform_1(%arg0: i32, %arg1: i32) -> (i32, i32) {
    %c0_i32 = arith.constant 0 : i32
    %c0_i32_0 = arith.constant 0 : i32
    %c0_i32_1 = arith.constant 0 : i32
    return %c0_i32, %c0_i32_0 : i32, i32
  }
  func.func @transform_2(%arg0: i32, %arg1: i32) -> (i32, i32, i32) {
    %c0_i32 = arith.constant 0 : i32
    %c0_i32_0 = arith.constant 0 : i32
    %c0_i32_1 = arith.constant 0 : i32
    return %arg0, %c0_i32, %c0_i32_0 : i32, i32, i32
  }
  func.func @transform_3(%arg0: i32, %arg1: i32) -> (i32, i32, i32) {
    %c0_i32 = arith.constant 0 : i32
    %c0_i32_0 = arith.constant 0 : i32
    %c0_i32_1 = arith.constant 0 : i32
    return %arg0, %c0_i32, %c0_i32_0 : i32, i32, i32
  }
  func.func @transform_4(%arg0: i32, %arg1: i32) -> (i32, i32, i32) {
    %c0_i32 = arith.constant 0 : i32
    %c0_i32_0 = arith.constant 0 : i32
    %c0_i32_1 = arith.constant 0 : i32
    return %arg0, %c0_i32, %c0_i32_0 : i32, i32, i32
  }
  func.func @transform_5(%arg0: i32, %arg1: i32) -> (i32, i32, i32, i32) {
    %c0_i32 = arith.constant 0 : i32
    %c0_i32_0 = arith.constant 0 : i32
    %c0_i32_1 = arith.constant 0 : i32
    return %arg0, %arg1, %c0_i32, %c0_i32_0 : i32, i32, i32, i32
  }
}

</mosaic_0001>

<bundles_post_ra>
// kernel: tpu_custom_call.1
= control target key start
LH: loop header
LB: loop body
LE: loop exit
PB: predicated region body
PF: predicated region fallthrough
CT: control target
= control target key end

     0   :  { %s5698_s0 = inlined_call_operand.hbm [shape: bf16[2,8,16,128], index: 0, kind: input, shape index: {}]   ;;  %s5699_s1 = inlined_call_operand.vmem [shape: s32[16,1], index: 1, kind: input, shape index: {}]   ;;  %s5700_s2 = inlined_call_operand.hbm [shape: bf16[2,128,512], index: 2, kind: input, shape index: {}]   ;;  %s5701_s3 = inlined_call_operand.hbm [shape: bf16[2,128,512], index: 3, kind: input, shape index: {}]   ;;  %s5702_s4 = inlined_call_operand.vmem [shape: f32[2,1,512], index: 4, kind: input, shape index: {}]   ;;  %s5703_s5 = inlined_call_operand.hbm [shape: bf16[2,8,16,128], index: 5, kind: output, shape index: {}]  }
   0x1   :  { %5750 = sst [smem:[#allocation85_spill]] %s5700_s2 }
   0x2   :  { %5751 = sst [smem:[#allocation86_spill]] %s5701_s3 }
   0x3   :  { %10 = vsyncpa [#allocation6], 0 }
   0x4   :  { %12 = vsyncpa [#allocation6 + $0x1], 0 }
   0x5   :  { %13 = vsyncpa [#allocation9], 0 }
   0x6   :  { %15 = vsyncpa [#allocation9 + $0x1], 0 }
   0x7   :  { %16 = vsyncpa [#allocation7], 0 }
   0x8   :  { %18 = vsyncpa [#allocation7 + $0x1], 0  ;;  %s4148_s18 = smov 0   ;;  %s4150_s19 = smov 0  }
   0x9   :  { %s4152_s20 = smov 0   ;;  %s4154_s21 = smov 0  }
   0xa   :  { %s4156_s22 = smov 0   ;;  %s4158_s23 = smov 0  }
   0xb LB: > { %5752 = sst [smem:[#allocation15_spill]] %s4096_s20  ;;  %s4179_s24 = sadd.s32 4294967295, %s4108_s23   ;;  %s4108_s23 = sphi %s4158_s23, %s24_s23   ;;  %s4104_s22 = sphi %s4156_s22, %s5954_s22   ;;  %s4100_s21 = sphi %s4154_s21, %s5953_s21   ;;  %s4096_s20 = sphi %s4152_s20, %s5952_s20   ;;  %s4092_s19 = sphi %s4150_s19, %s5956_s19   ;;  %s4088_s18 = sphi %s4148_s18, %s5955_s18  }
   0xc   : > { %5753 = sst [smem:[#allocation16_spill]] %s4104_s22  ;;  %s3079_s25 = sadd.s32 4294967294, %s4108_s23  }
   0xd   : > { %s36_s26 = sadd.s32 1, %s4104_s22  ;;  %s45_s27 = sadd.s32 1, %s4096_s20 }
   0xe   : > { %p38_p0 = scmp.ge.s32.totalorder %s36_s26, 2  ;;  %p52_p1 = scmp.ne.s32.totalorder %s4096_s20, %s4092_s19 }
   0xf   : > { %p53_p2 = scmp.eq.s32.totalorder %s4108_s23, 0  ;;  %p58_p3 = scmp.ne.s32.totalorder %s4092_s19, %s4088_s18 }
  0x10   : > { %s5958_s26 = smov (%p38_p0, %s36_s26), 0  ;;  %p59_p5 = scmp.eq.s32.totalorder %s4179_s24, 0 }
  0x11   : > { %5754 = sst [smem:[#allocation17_spill]] %s5958_s26  ;;  %p4191_p4 = por %p53_p2, %p52_p1 }
  0x12   : > { %s40_s29 = ssub.s32 %s4104_s22, %s5958_s26  ;;  %p183_p6 = scmp.eq.s32.totalorder %s4179_s24, 1 }
  0x13   : > { %p43_p7 = scmp.eq.s32.totalorder %s40_s29, 0  ;;  %p4199_p8 = por %p59_p5, %p58_p3 }
  0x14   : > { %p4203_p9 = por %p183_p6, %p52_p1  ;;  %p189_p10 = scmp.eq.s32.totalorder %s3079_s25, 1 }
  0x15   : > { %s4208_s7 = scalar_select %p43_p7, %s4096_s20, %s45_s27  }
  0x16   : > { %p4210_p11 = por %p189_p10, %p58_p3  ;;  %p3081_p12 = scmp.ge.s32.totalorder %s4108_s23, 2 }
  0x17   : > { %5758 = sst [smem:[#allocation18_spill]] %s4208_s7  ;;  %p3613_p13 = scmp.lt.s32.totalorder %s4108_s23, 2 }
  0x18   : > { %s5759_s8 = scalar_select %p4210_p11, 1, 0 }
  0x19   : > { %s4217_s9 = sand.u32 1, %s4096_s20   ;;  %s237_s10 = sand.u32 1, %s4108_s23  }
  0x1a   : > { %5760 = sst [smem:[#allocation19_spill]] %s5759_s8  ;;  %s3085_s11 = sshll.u32 %s4217_s9, 8 }
  0x1b   : > { %p4223_p0 = pnand %p3613_p13, %p4191_p4  ;;  %s3469_s13 = sshll.u32 %s4104_s22, 8 }
  0x1c   : > { %s5762_s2 = sld [smem:[#allocation85_spill]]  ;;  %s241_s25 = scalar_lea.vmem [#allocation8], %s3085_s11 }
  0x1d   : > { %s249_s27 = sshll.u32 %s241_s25, 4  ;;  %s4231_s28 = scalar_lea.sflag [#allocation9], %s237_s10  ;;  %s250_s27 = int_to_ptr.vmem [resolvable:$true] %s249_s27 }
  0x1e   : > { %s4110_s29 = smov 256   ;;  %s4111_s26 = smov 16  }
  0x1f   : > { %s5763_s3 = sld [smem:[#allocation86_spill]]  ;;  %p3091_p1 = scmp.ge.s32.totalorder %s4108_s23, 1 }
  0x20   : > { %p286_p2 = scmp.lt.s32.totalorder %s4108_s23, 3  ;;  %s3468_s25 = sshll.u32 %s4104_s22, 6 }
  0x21   : > { %s224_s7 = scalar_lea.hbm %s5698_s0, %s3468_s25  ;;  %s4113_s8 = smov 4  }
  0x22   : > { %s246_s16 = scalar_lea.hbm %s5762_s2, %s3469_s13  ;;  %p4241_p3 = pnand %p3091_p1, %p286_p2 }
  0x23   : > { %s247_s17 = sshll.u32 %s246_s16, 4  ;;  %s263_s16 = scalar_lea.vmem [#allocation10], %s3085_s11  ;;  %s248_s17 = int_to_ptr.hbm [resolvable:$true] %s247_s17 }
  0x24   : > { %3605 = dma.hbm_to_vmem [thread:$0]  (!%p4223_p0), %s248_s17, 4096, %s250_s27, %s4231_s28, %s4110_s29, %s4110_s29, %s4111_s26  }
  0x25   : > { %s268_s14 = scalar_lea.hbm %s5763_s3, %s3469_s13  ;;  %s271_s2 = sshll.u32 %s263_s16, 4  ;;  %s272_s2 = int_to_ptr.vmem [resolvable:$true] %s271_s2 }
  0x26   : > { %s269_s15 = sshll.u32 %s268_s14, 4  ;;  %s3082_s17 = sshll.u32 %s4217_s9, 6  ;;  %s270_s15 = int_to_ptr.hbm [resolvable:$true] %s269_s15 }
  0x27   : > { %s225_s13 = sshll.u32 %s224_s7, 4  ;;  %s216_s11 = scalar_lea.vmem [#allocation5], %s3082_s17  ;;  %s226_s13 = int_to_ptr.hbm [resolvable:$true] %s225_s13 }
  0x28   : > { %s227_s14 = sshll.u32 %s216_s11, 4  ;;  %s213_s16 = scalar_lea.sflag [#allocation6], %s4217_s9  ;;  %s228_s14 = int_to_ptr.vmem [resolvable:$true] %s227_s14 }
  0x29   : > { %s4112_s3 = smov 64   ;;  %290 = sbr.rel (%p4241_p3) target bundleno = 1712 (0x6b0), region = 40 }
  0x2a   : > { %3602 = dma.hbm_to_vmem [thread:$0]  (!%p4223_p0), %s226_s13, 1024, %s228_s14, %s213_s16, %s4112_s3, %s4112_s3, %s4113_s8  }
  0x2b   : > { %3608 = dma.hbm_to_vmem [thread:$0]  (!%p4223_p0), %s270_s15, 4096, %s272_s2, %s4231_s28, %s4110_s29, %s4110_s29, %s4111_s26  }
  0x2e   : > { %s4259_s22 = sand.u32 1, %s4092_s19  }
  0x2f   : > { %s3092_s17 = sshll.u32 %s4259_s22, 6  ;;  %s293_s25 = scalar_lea.sflag [#allocation6], %s4259_s22 }
  0x30   : > { %s4265_s9 = scalar_lea.vmem [#allocation5], %s3092_s17 }
  0x31   : > { %4075 = dma.done.wait (%p4199_p8), %s293_s25, 1024  }
  0x32   : > { %4077 = vsyncadd (%p4199_p8), %s293_s25, 4294966272  ;;  %s302_s2 = sand.u32 1, %s4179_s24   ;;  %s3093_s3 = sshll.u32 %s4259_s22, 8 }
  0x33   : > { %s303_s26 = scalar_lea.sflag [#allocation9], %s302_s2  ;;  %s4275_s8 = scalar_lea.vmem [#allocation8], %s3093_s3 }
  0x34   : > { %4079 = dma.done.wait (%p4199_p8), %s303_s26, 8192  }
  0x35   : > { %4081 = vsyncadd (%p4199_p8), %s303_s26, 4294959104  ;;  %v3243_v0 = vld [vmem:[%s4275_s8 + $0xe0] sm:$0xf]  ;;  %v3509_v1 = vld [vmem:[%s4275_s8 + $0xec] sm:$0xf0]  ;;  %s4347_s24 = scalar_lea.vmem [#allocation10], %s3093_s3 }
  0x36   : > { %v3507_v2 = vld [vmem:[%s4275_s8 + $0xe4] sm:$0xf]  ;;  %v3244_v3 = vor.u32 %v3509_v1, %v3243_v0  ;;  %v3245_v4 = vld [vmem:[%s4275_s8 + $0xf0] sm:$0xf0]  ;;  %v3251_v5 = vld [vmem:[%s4275_s8 + $0xe8] sm:$0xf] }
  0x37   : > { %v3510_v6 = vld [vmem:[%s4275_s8 + $0xf4] sm:$0xf0]  ;;  %v3248_v7 = vor.u32 %v3507_v2, %v3245_v4  ;;  %v3508_v9 = vld [vmem:[%s4275_s8 + $0xec] sm:$0xf]  ;;  %v3253_v10 = vld [vmem:[%s4275_s8 + $0xf8] sm:$0xf0] }
  0x38   : > { %v3252_v8 = vor.u32 %v3510_v6, %v3251_v5  ;;  %v3227_v11 = vld [vmem:[%s4275_s8 + $0xc0] sm:$0xf]  ;;  %638 = vmatpush.bf16.msra.mxu0 %v3244_v3  ;;  %v3256_v12 = vor.u32 %v3508_v9, %v3253_v10  ;;  %v3505_v13 = vld [vmem:[%s4275_s8 + $0xcc] sm:$0xf0]  ;;  %v3503_v14 = vld [vmem:[%s4275_s8 + $0xc4] sm:$0xf] }
  0x39   : > { %v3229_v15 = vld [vmem:[%s4275_s8 + $0xd0] sm:$0xf0]  ;;  %687 = vmatpush.bf16.msra.mxu1 %v3248_v7  ;;  %v3228_v16 = vor.u32 %v3505_v13, %v3227_v11  ;;  %v3235_v18 = vld [vmem:[%s4275_s8 + $0xc8] sm:$0xf]  ;;  %v3506_v19 = vld [vmem:[%s4275_s8 + $0xd4] sm:$0xf0] }
  0x3a   : > { %736 = vmatpush.bf16.msra.mxu2 %v3252_v8  ;;  %v3232_v17 = vor.u32 %v3503_v14, %v3229_v15  ;;  %v3504_v20 = vld [vmem:[%s4275_s8 + $0xcc] sm:$0xf]  ;;  %785 = vmatpush.bf16.msra.mxu3 %v3256_v12  ;;  %v3236_v21 = vor.u32 %v3506_v19, %v3235_v18  ;;  %v3237_v22 = vld [vmem:[%s4275_s8 + $0xd8] sm:$0xf0]  ;;  %v3211_v23 = vld [vmem:[%s4275_s8 + $0xa0] sm:$0xf] }
  0x3b   : > { %v3501_v24 = vld [vmem:[%s4275_s8 + $0xac] sm:$0xf0]  ;;  %v3240_v25 = vor.u32 %v3504_v20, %v3237_v22  ;;  %v3499_v26 = vld [vmem:[%s4275_s8 + $0xa4] sm:$0xf]  ;;  %v3213_v27 = vld [vmem:[%s4275_s8 + $0xb0] sm:$0xf0] }
  0x3c   : > { %v3219_v28 = vld [vmem:[%s4275_s8 + $0xa8] sm:$0xf]  ;;  %639 = vmatpush.bf16.msra.mxu0 %v3228_v16  ;;  %v3212_v29 = vor.u32 %v3501_v24, %v3211_v23  ;;  %v3502_v30 = vld [vmem:[%s4275_s8 + $0xb4] sm:$0xf0]  ;;  %v3500_v31 = vld [vmem:[%s4275_s8 + $0xac] sm:$0xf]  ;;  %v3216_v33 = vor.u32 %v3499_v26, %v3213_v27 }
  0x3d   : > { %v3221_v32 = vld [vmem:[%s4275_s8 + $0xb8] sm:$0xf0]  ;;  %688 = vmatpush.bf16.msra.mxu1 %v3232_v17  ;;  %v3220_v34 = vor.u32 %v3502_v30, %v3219_v28  ;;  %v3195_v35 = vld [vmem:[%s4275_s8 + $0x80] sm:$0xf]  ;;  %v3497_v36 = vld [vmem:[%s4275_s8 + $0x8c] sm:$0xf0] }
  0x3e   : > { %737 = vmatpush.bf16.msra.mxu2 %v3236_v21  ;;  %v3495_v37 = vld [vmem:[%s4275_s8 + $0x84] sm:$0xf]  ;;  %786 = vmatpush.bf16.msra.mxu3 %v3240_v25  ;;  %v3224_v38 = vor.u32 %v3500_v31, %v3221_v32  ;;  %v3197_v39 = vld [vmem:[%s4275_s8 + $0x90] sm:$0xf0]  ;;  %v3203_v40 = vld [vmem:[%s4275_s8 + $0x88] sm:$0xf]  ;;  %v3196_v44 = vor.u32 %v3497_v36, %v3195_v35 }
  0x3f   : > { %v3498_v41 = vld [vmem:[%s4275_s8 + $0x94] sm:$0xf0]  ;;  %v3496_v42 = vld [vmem:[%s4275_s8 + $0x8c] sm:$0xf]  ;;  %v3205_v43 = vld [vmem:[%s4275_s8 + $0x98] sm:$0xf0]  ;;  %v3200_v45 = vor.u32 %v3495_v37, %v3197_v39 }
  0x40   : > { %640 = vmatpush.bf16.msra.mxu0 %v3212_v29  ;;  %v3204_v46 = vor.u32 %v3498_v41, %v3203_v40  ;;  %v3179_v47 = vld [vmem:[%s4275_s8 + $0x60] sm:$0xf]  ;;  %v3493_v48 = vld [vmem:[%s4275_s8 + $0x6c] sm:$0xf0]  ;;  %v3491_v49 = vld [vmem:[%s4275_s8 + $0x64] sm:$0xf]  ;;  %v3208_v50 = vor.u32 %v3496_v42, %v3205_v43 }
  0x41   : > { %689 = vmatpush.bf16.msra.mxu1 %v3216_v33  ;;  %v3181_v51 = vld [vmem:[%s4275_s8 + $0x70] sm:$0xf0]  ;;  %v3187_v52 = vld [vmem:[%s4275_s8 + $0x68] sm:$0xf]  ;;  %v3494_v53 = vld [vmem:[%s4275_s8 + $0x74] sm:$0xf0]  ;;  %v3180_v56 = vor.u32 %v3493_v48, %v3179_v47 }
  0x42   : > { %738 = vmatpush.bf16.msra.mxu2 %v3220_v34  ;;  %787 = vmatpush.bf16.msra.mxu3 %v3224_v38  ;;  %v3492_v54 = vld [vmem:[%s4275_s8 + $0x6c] sm:$0xf]  ;;  %v3189_v55 = vld [vmem:[%s4275_s8 + $0x78] sm:$0xf0]  ;;  %v3184_v57 = vor.u32 %v3491_v49, %v3181_v51  ;;  %v3188_v58 = vor.u32 %v3494_v53, %v3187_v52  ;;  %v3163_v59 = vld [vmem:[%s4275_s8 + $0x40] sm:$0xf] }
  0x43   : > { %v3489_v60 = vld [vmem:[%s4275_s8 + $0x4c] sm:$0xf0]  ;;  %v3487_v61 = vld [vmem:[%s4275_s8 + $0x44] sm:$0xf]  ;;  %v3192_v62 = vor.u32 %v3492_v54, %v3189_v55  ;;  %v3165_v63 = vld [vmem:[%s4275_s8 + $0x50] sm:$0xf0] }
  0x44   : > { %641 = vmatpush.bf16.msra.mxu0 %v3196_v44  ;;  %v3171_v0 = vld [vmem:[%s4275_s8 + $0x48] sm:$0xf]  ;;  %v3490_v1 = vld [vmem:[%s4275_s8 + $0x54] sm:$0xf0]  ;;  %v3488_v2 = vld [vmem:[%s4275_s8 + $0x4c] sm:$0xf]  ;;  %v3164_v4 = vor.u32 %v3489_v60, %v3163_v59  ;;  %v3168_v5 = vor.u32 %v3487_v61, %v3165_v63 }
  0x45   : > { %690 = vmatpush.bf16.msra.mxu1 %v3200_v45  ;;  %v3173_v3 = vld [vmem:[%s4275_s8 + $0x58] sm:$0xf0]  ;;  %v3172_v6 = vor.u32 %v3490_v1, %v3171_v0  ;;  %v3147_v7 = vld [vmem:[%s4275_s8 + $0x20] sm:$0xf]  ;;  %v3485_v8 = vld [vmem:[%s4275_s8 + $0x2c] sm:$0xf0] }
  0x46   : > { %739 = vmatpush.bf16.msra.mxu2 %v3204_v46  ;;  %788 = vmatpush.bf16.msra.mxu3 %v3208_v50  ;;  %v3483_v9 = vld [vmem:[%s4275_s8 + $0x24] sm:$0xf]  ;;  %v3176_v10 = vor.u32 %v3488_v2, %v3173_v3  ;;  %v3149_v11 = vld [vmem:[%s4275_s8 + $0x30] sm:$0xf0]  ;;  %v3155_v12 = vld [vmem:[%s4275_s8 + $0x28] sm:$0xf]  ;;  %v3148_v16 = vor.u32 %v3485_v8, %v3147_v7 }
  0x47   : > { %v3486_v13 = vld [vmem:[%s4275_s8 + $0x34] sm:$0xf0]  ;;  %v3484_v14 = vld [vmem:[%s4275_s8 + $0x2c] sm:$0xf]  ;;  %v3157_v15 = vld [vmem:[%s4275_s8 + $0x38] sm:$0xf0]  ;;  %v3152_v18 = vor.u32 %v3483_v9, %v3149_v11 }
  0x48   : > { %642 = vmatpush.bf16.msra.mxu0 %v3180_v56  ;;  %v3131_v17 = vld [vmem:[%s4275_s8] sm:$0xf]  ;;  %v3156_v19 = vor.u32 %v3486_v13, %v3155_v12  ;;  %v3481_v20 = vld [vmem:[%s4275_s8 + $0xc] sm:$0xf0]  ;;  %v3479_v21 = vld [vmem:[%s4275_s8 + $0x4] sm:$0xf]  ;;  %v3160_v23 = vor.u32 %v3484_v14, %v3157_v15 }
  0x49   : > { %691 = vmatpush.bf16.msra.mxu1 %v3184_v57  ;;  %v3133_v22 = vld [vmem:[%s4275_s8 + $0x10] sm:$0xf0]  ;;  %v3139_v24 = vld [vmem:[%s4275_s8 + $0x8] sm:$0xf]  ;;  %v3482_v25 = vld [vmem:[%s4275_s8 + $0x14] sm:$0xf0]  ;;  %v3132_v30 = vor.u32 %v3481_v20, %v3131_v17 }
  0x4a   : > { %740 = vmatpush.bf16.msra.mxu2 %v3188_v58  ;;  %789 = vmatpush.bf16.msra.mxu3 %v3192_v62  ;;  %v3480_v26 = vld [vmem:[%s4275_s8 + $0xc] sm:$0xf]  ;;  %v3141_v27 = vld [vmem:[%s4275_s8 + $0x18] sm:$0xf0]  ;;  %v3371_v28 = vld [vmem:[%s4347_s24 + $0xe0] sm:$0xf]  ;;  %v3136_v33 = vor.u32 %v3479_v21, %v3133_v22  ;;  %v3140_v34 = vor.u32 %v3482_v25, %v3139_v24 }
  0x4b   : > { %v3541_v29 = vld [vmem:[%s4347_s24 + $0xec] sm:$0xf0]  ;;  %v3539_v31 = vld [vmem:[%s4347_s24 + $0xe4] sm:$0xf]  ;;  %v3373_v32 = vld [vmem:[%s4347_s24 + $0xf0] sm:$0xf0]  ;;  %v3144_v36 = vor.u32 %v3480_v26, %v3141_v27 }
  0x4c   : > { %643 = vmatpush.bf16.msra.mxu0 %v3164_v4  ;;  %v3471_v35 = vld [vmem:[%s4265_s9] sm:$0xff]  ;;  %v4354_v37 = vor.u32 %v3541_v29, %v3371_v28  ;;  %v3379_v38 = vld [vmem:[%s4347_s24 + $0xe8] sm:$0xf]  ;;  %v3542_v39 = vld [vmem:[%s4347_s24 + $0xf4] sm:$0xf0]  ;;  %v4359_v41 = vor.u32 %v3539_v31, %v3373_v32  ;;  %p359_p4 = scmp.lt.s32.totalorder %s4100_s21, 1 }
  0x4d   : > { %692 = vmatpush.bf16.msra.mxu1 %v3168_v5  ;;  %v3540_v40 = vld [vmem:[%s4347_s24 + $0xec] sm:$0xf]  ;;  %v3381_v42 = vld [vmem:[%s4347_s24 + $0xf8] sm:$0xf0]  ;;  %v3355_v43 = vld [vmem:[%s4347_s24 + $0xc0] sm:$0xf]  ;;  %v4366_v47 = vor.u32 %v3542_v39, %v3379_v38 }
  0x4e   : > { %741 = vmatpush.bf16.msra.mxu2 %v3172_v6  ;;  %790 = vmatpush.bf16.msra.mxu3 %v3176_v10  ;;  %v3537_v44 = vld [vmem:[%s4347_s24 + $0xcc] sm:$0xf0]  ;;  %v3535_v45 = vld [vmem:[%s4347_s24 + $0xc4] sm:$0xf]  ;;  %v3357_v46 = vld [vmem:[%s4347_s24 + $0xd0] sm:$0xf0]  ;;  %v4369_v48 = vor.u32 %v3540_v40, %v3381_v42 }
  0x4f   : > { %v4371_v49 = vor.u32 %v3537_v44, %v3355_v43  ;;  %v3363_v50 = vld [vmem:[%s4347_s24 + $0xc8] sm:$0xf]  ;;  %v3538_v51 = vld [vmem:[%s4347_s24 + $0xd4] sm:$0xf0]  ;;  %v4376_v52 = vor.u32 %v3535_v45, %v3357_v46  ;;  %v3536_v53 = vld [vmem:[%s4347_s24 + $0xcc] sm:$0xf] }
  0x50   : > { %644 = vmatpush.bf16.msra.mxu0 %v3148_v16  ;;  %v3365_v54 = vld [vmem:[%s4347_s24 + $0xd8] sm:$0xf0]  ;;  %v4381_v55 = vor.u32 %v3538_v51, %v3363_v50  ;;  %v3339_v56 = vld [vmem:[%s4347_s24 + $0xa0] sm:$0xf]  ;;  %v3533_v57 = vld [vmem:[%s4347_s24 + $0xac] sm:$0xf0] }
  0x51   : > { %693 = vmatpush.bf16.msra.mxu1 %v3152_v18  ;;  %v3531_v58 = vld [vmem:[%s4347_s24 + $0xa4] sm:$0xf]  ;;  %v4388_v59 = vor.u32 %v3536_v53, %v3365_v54  ;;  %v4390_v60 = vor.u32 %v3533_v57, %v3339_v56  ;;  %v3341_v61 = vld [vmem:[%s4347_s24 + $0xb0] sm:$0xf0]  ;;  %v3347_v62 = vld [vmem:[%s4347_s24 + $0xa8] sm:$0xf] }
  0x52   : > { %742 = vmatpush.bf16.msra.mxu2 %v3156_v19  ;;  %791 = vmatpush.bf16.msra.mxu3 %v3160_v23  ;;  %v3534_v63 = vld [vmem:[%s4347_s24 + $0xb4] sm:$0xf0]  ;;  %v4396_v0 = vor.u32 %v3531_v58, %v3341_v61  ;;  %v3532_v1 = vld [vmem:[%s4347_s24 + $0xac] sm:$0xf]  ;;  %v3349_v2 = vld [vmem:[%s4347_s24 + $0xb8] sm:$0xf0] }
  0x53   : > { %v4401_v3 = vor.u32 %v3534_v63, %v3347_v62  ;;  %v4405_v4 = vor.u32 %v3532_v1, %v3349_v2  ;;  %v3472_v5 = vld [vmem:[%s4265_s9 + $0x8] sm:$0xff]  ;;  %v3323_v6 = vld [vmem:[%s4347_s24 + $0x80] sm:$0xf]  ;;  %v3529_v7 = vld [vmem:[%s4347_s24 + $0x8c] sm:$0xf0]  ;;  %s360_s15 = scalar_select %p359_p4, %s4100_s21, 1 }
  0x54   : > { %645 = vmatpush.bf16.msra.mxu0 %v3132_v30  ;;  %v3527_v8 = vld [vmem:[%s4347_s24 + $0x84] sm:$0xf]  ;;  %v4414_v9 = vor.u32 %v3529_v7, %v3323_v6  ;;  %v3325_v10 = vld [vmem:[%s4347_s24 + $0x90] sm:$0xf0]  ;;  %v3331_v11 = vld [vmem:[%s4347_s24 + $0x88] sm:$0xf] }
  0x55   : > { %694 = vmatpush.bf16.msra.mxu1 %v3136_v33  ;;  %v3530_v12 = vld [vmem:[%s4347_s24 + $0x94] sm:$0xf0]  ;;  %v4419_v13 = vor.u32 %v3527_v8, %v3325_v10  ;;  %v3528_v15 = vld [vmem:[%s4347_s24 + $0x8c] sm:$0xf]  ;;  %v3333_v16 = vld [vmem:[%s4347_s24 + $0x98] sm:$0xf0] }
  0x56   : > { %743 = vmatpush.bf16.msra.mxu2 %v3140_v34  ;;  %792 = vmatpush.bf16.msra.mxu3 %v3144_v36  ;;  %v4421_v14 = vor.u32 %v3530_v12, %v3331_v11  ;;  %v4426_v17 = vor.u32 %v3528_v15, %v3333_v16  ;;  %v3473_v18 = vld [vmem:[%s4265_s9 + $0x10] sm:$0xff]  ;;  %v3307_v19 = vld [vmem:[%s4347_s24 + $0x60] sm:$0xf]  ;;  %v3523_v21 = vld [vmem:[%s4347_s24 + $0x64] sm:$0xf]  ;;  %s3096_s10 = sshll.u32 %s360_s15, 2 }
  0x57   : > { %646 = vmatmul.bf16.vlgmr.msra.gmra.mxu0 %v3471_v35  ;;  %v3525_v20 = vld [vmem:[%s4347_s24 + $0x6c] sm:$0xf0]  ;;  %v3309_v23 = vld [vmem:[%s4347_s24 + $0x70] sm:$0xf0]  ;;  %v3315_v24 = vld [vmem:[%s4347_s24 + $0x68] sm:$0xf]  ;;  %s362_s7 = scalar_lea.vmem %s5702_s4, %s3096_s10 }
  0x58   : > { %1106 = vmatpush.bf16.msrb.mxu0 %v4354_v37  ;;  %695 = vmatmul.bf16.vlgmr.msra.gmra.mxu1 %v3471_v35  ;;  %v4435_v22 = vor.u32 %v3525_v20, %v3307_v19  ;;  %v3526_v25 = vld [vmem:[%s4347_s24 + $0x74] sm:$0xf0]  ;;  %v4440_v26 = vor.u32 %v3523_v21, %v3309_v23  ;;  %v3524_v28 = vld [vmem:[%s4347_s24 + $0x6c] sm:$0xf]  ;;  %v3317_v29 = vld [vmem:[%s4347_s24 + $0x78] sm:$0xf0] }
  0x59   : > { %1120 = vmatpush.bf16.msrb.mxu1 %v4359_v41  ;;  %744 = vmatmul.bf16.vlgmr.msra.gmra.mxu2 %v3471_v35  ;;  %v4442_v27 = vor.u32 %v3526_v25, %v3315_v24  ;;  %v4447_v30 = vor.u32 %v3524_v28, %v3317_v29  ;;  %v3474_v31 = vld [vmem:[%s4265_s9 + $0x18] sm:$0xff]  ;;  %v3291_v32 = vld [vmem:[%s4347_s24 + $0x40] sm:$0xf]  ;;  %v3521_v33 = vld [vmem:[%s4347_s24 + $0x4c] sm:$0xf0]  ;;  %v5708_v28 = vmov 0  }
  0x5a   : > { %793 = vmatmul.bf16.vlgmr.msra.gmra.mxu3 %v3471_v35  ;;  %1134 = vmatpush.bf16.msrb.mxu2 %v4366_v47  ;;  %v3519_v34 = vld [vmem:[%s4347_s24 + $0x44] sm:$0xf]  ;;  %v4456_v35 = vor.u32 %v3521_v33, %v3291_v32  ;;  %v3293_v36 = vld [vmem:[%s4347_s24 + $0x50] sm:$0xf0]  ;;  %v3299_v38 = vld [vmem:[%s4347_s24 + $0x48] sm:$0xf] }
  0x5b   : > { %1148 = vmatpush.bf16.msrb.mxu3 %v4369_v48  ;;  %v3522_v39 = vld [vmem:[%s4347_s24 + $0x54] sm:$0xf0]  ;;  %v4461_v40 = vor.u32 %v3519_v34, %v3293_v36  ;;  %v3520_v43 = vld [vmem:[%s4347_s24 + $0x4c] sm:$0xf]  ;;  %v3301_v44 = vld [vmem:[%s4347_s24 + $0x58] sm:$0xf0]  ;;  %3671 = vset.pattern.permute.xlu0 %v5708_v28 }
  0x5c   : > { %1107 = vmatpush.bf16.msrb.mxu0 %v4371_v49  ;;  %v4463_v42 = vor.u32 %v3522_v39, %v3299_v38  ;;  %v4468_v45 = vor.u32 %v3520_v43, %v3301_v44  ;;  %v3475_v46 = vld [vmem:[%s4265_s9 + $0x20] sm:$0xff]  ;;  %v3517_v51 = vld [vmem:[%s4347_s24 + $0x2c] sm:$0xf0]  ;;  %v3277_v56 = vld [vmem:[%s4347_s24 + $0x30] sm:$0xf0]  ;;  %3672 = vset.pattern.permute.xlu1 %v5708_v28  ;;  %v4115_v38 = vmov 0.0|0.0  }
  0x5d   : > { %1121 = vmatpush.bf16.msrb.mxu1 %v4376_v52  ;;  %v3275_v50 = vld [vmem:[%s4347_s24 + $0x20] sm:$0xf]  ;;  %v3515_v53 = vld [vmem:[%s4347_s24 + $0x24] sm:$0xf]  ;;  %v3283_v57 = vld [vmem:[%s4347_s24 + $0x28] sm:$0xf]  ;;  %3673 = vset.pattern.permute.xlu2 %v5708_v28 }
  0x5e   : > { %1135 = vmatpush.bf16.msrb.mxu2 %v4381_v55  ;;  %v4477_v54 = vor.u32 %v3517_v51, %v3275_v50  ;;  %v3518_v58 = vld [vmem:[%s4347_s24 + $0x34] sm:$0xf0]  ;;  %v4482_v61 = vor.u32 %v3515_v53, %v3277_v56  ;;  %v3516_v63 = vld [vmem:[%s4347_s24 + $0x2c] sm:$0xf]  ;;  %v3285_v1 = vld [vmem:[%s4347_s24 + $0x38] sm:$0xf0] }
  0x5f   : > { %1149 = vmatpush.bf16.msrb.mxu3 %v4388_v59  ;;  %v4484_v62 = vor.u32 %v3518_v58, %v3283_v57  ;;  %v4489_v2 = vor.u32 %v3516_v63, %v3285_v1  ;;  %v3259_v6 = vld [vmem:[%s4347_s24] sm:$0xf]  ;;  %v3513_v7 = vld [vmem:[%s4347_s24 + $0xc] sm:$0xf0]  ;;  %v3511_v8 = vld [vmem:[%s4347_s24 + $0x4] sm:$0xf] }
  0x60   : > { %1108 = vmatpush.bf16.msrb.mxu0 %v4390_v60  ;;  %v4498_v10 = vor.u32 %v3513_v7, %v3259_v6  ;;  %v3261_v11 = vld [vmem:[%s4347_s24 + $0x10] sm:$0xf0]  ;;  %v3267_v12 = vld [vmem:[%s4347_s24 + $0x8] sm:$0xf]  ;;  %v3514_v15 = vld [vmem:[%s4347_s24 + $0x14] sm:$0xf0] }
  0x61   : > { %1122 = vmatpush.bf16.msrb.mxu1 %v4396_v0  ;;  %5765 = vst [vmem:[#allocation20_spill] sm:$0xff] %v4489_v2  ;;  %v4503_v16 = vor.u32 %v3511_v8, %v3261_v11  ;;  %v3477_v19 = vld [vmem:[%s4265_s9 + $0x30] sm:$0xff]  ;;  %v3512_v20 = vld [vmem:[%s4347_s24 + $0xc] sm:$0xf]  ;;  %v3269_v21 = vld [vmem:[%s4347_s24 + $0x18] sm:$0xf0] }
  0x62   : > { %1136 = vmatpush.bf16.msrb.mxu2 %v4401_v3  ;;  %5766 = vst [vmem:[#allocation21_spill] sm:$0xff] %v4498_v10  ;;  %v4519_v23 = vor.u32 %v3512_v20, %v3269_v21  ;;  %v3478_v24 = vld [vmem:[%s4265_s9 + $0x38] sm:$0xff]  ;;  %v4539_v25 = vld [vmem:[%s5699_s1] sm:$0xff]  ;;  %s4846_s13 = scalar_lea.vmem [#allocation11], %s3092_s17  ;;  %s3543_s25 = sshll.u32 %s4100_s21, 6 }
  0x63   : > { %1150 = vmatpush.bf16.msrb.mxu3 %v4405_v4  ;;  %5767 = vst [vmem:[#allocation22_spill] sm:$0xff] %v4503_v16  ;;  %vm3391_vm0 = vcmp.gt.s32.totalorder %v4539_v25, 0  ;;  %vm3419_vm2 = vcmp.gt.s32.totalorder %v4539_v25, 3  ;;  %vm3449_vm4 = vcmp.gt.s32.totalorder %v4539_v25, 6  ;;  %s2932_s3 = scalar_lea.hbm %s5703_s5, %s3543_s25  ;;  %s2933_s26 = sshll.u32 %s4846_s13, 4  ;;  %s2934_s26 = int_to_ptr.vmem [resolvable:$true] %s2933_s26 }
  0x64   : > { %1109 = vmatpush.bf16.msrb.mxu0 %v4414_v9  ;;  %5769 = vst [vmem:[#allocation24_spill] sm:$0xff] %v4519_v23  ;;  %v1299_v29 = vsel %vm3391_vm0, 1, %v5708_v28  ;;  %v1982_v36 = vsel %vm3419_vm2, 1, %v5708_v28  ;;  %v2666_v58 = vsel %vm3449_vm4, 1, %v5708_v28  ;;  %vm3399_vm2 = vcmp.gt.s32.totalorder %v4539_v25, 1  ;;  %s2935_s21 = sshll.u32 %s2932_s3, 4  ;;  %s2936_s21 = int_to_ptr.hbm [resolvable:$true] %s2935_s21 }
  0x65   : > { %1123 = vmatpush.bf16.msrb.mxu1 %v4419_v13  ;;  %1302 = vperm.xlu0 %3671, %v1299_v29   ;;  %s2918_s8 = scalar_lea.sflag [#allocation7], %s4259_s22  ;;  %s4036_s24 = sshra.s32 %s2936_s21, 4  ;;  %s4037_s24 = int_to_ptr.hbm [resolvable:$true] %s4036_s24 }
  0x66   : > { %1137 = vmatpush.bf16.msrb.mxu2 %v4421_v14  ;;  %s4038_s30 = scalar_lea.hbm %s4037_s24, 64  ;;  %s4042_s29 = scalar_lea.hbm %s5703_s5, 128 }
  0x67   : > { %651 = vmatmul.bf16.gmra.mxu0 %v3472_v5  ;;  %1151 = vmatpush.bf16.msrb.mxu3 %v4426_v17  ;;  %p4039_p5 = scmp.ne.s32.totalorder %s4037_s24, %s4038_s30  ;;  %p4043_p8 = scmp.lt.s32.totalorder %s4037_s24, %s5703_s5 }
  0x68   : > { %700 = vmatmul.bf16.gmra.mxu1 %v3472_v5  ;;  %1110 = vmatpush.bf16.msrb.mxu0 %v4435_v22  ;;  %p4044_p10 = scmp.lt.s32.totalorder %s4042_s29, %s4038_s30 }
  0x69   : > { %749 = vmatmul.bf16.gmra.mxu2 %v3472_v5  ;;  %1124 = vmatpush.bf16.msrb.mxu1 %v4440_v26  ;;  %p4040_p6 = pnand %p4039_p5, %p4203_p9 }
  0x6a   : > { %798 = vmatmul.bf16.gmra.mxu3 %v3472_v5  ;;  %1138 = vmatpush.bf16.msrb.mxu2 %v4442_v27  ;;  %v3476_v5 = vld [vmem:[%s4265_s9 + $0x28] sm:$0xff]  ;;  %p4045_p13 = por %p4044_p10, %p4043_p8 }
  0x6b   : > { %1152 = vmatpush.bf16.msrb.mxu3 %v4447_v30  ;;  %p4041_p7 = pneg %p4040_p6 }
  0x6c   : > { %1111 = vmatpush.bf16.msrb.mxu0 %v4456_v35 }
  0x6d   : > { %1125 = vmatpush.bf16.msrb.mxu1 %v4461_v40  ;;  %p4046_p0 = pnand %p4045_p13, %p4041_p7 }
  0x6e   : > { %1139 = vmatpush.bf16.msrb.mxu2 %v4463_v42 }
  0x6f   : > { %1153 = vmatpush.bf16.msrb.mxu3 %v4468_v45 }
  0x70   : > { %1112 = vmatpush.bf16.msrb.mxu0 %v4477_v54 }
  0x71   : > { %1126 = vmatpush.bf16.msrb.mxu1 %v4482_v61 }
  0x72   : > { %1140 = vmatpush.bf16.msrb.mxu2 %v4484_v62 }
  0x73   : > { %1154 = vmatpush.bf16.msrb.mxu3 %v4489_v2 }
  0x74   : > { %1113 = vmatpush.bf16.msrb.mxu0 %v4498_v10 }
  0x75   : > { %1127 = vmatpush.bf16.msrb.mxu1 %v4503_v16 }
  0x77   : > { %656 = vmatmul.bf16.gmra.mxu0 %v3473_v18  ;;  %1155 = vmatpush.bf16.msrb.mxu3 %v4519_v23 }
  0x78   : > { %705 = vmatmul.bf16.gmra.mxu1 %v3473_v18  ;;  %1332 = vmatpush.bf16.msra.mxu0 %v4354_v37 }
  0x79   : > { %754 = vmatmul.bf16.gmra.mxu2 %v3473_v18  ;;  %1346 = vmatpush.bf16.msra.mxu1 %v4359_v41 }
  0x7a   : > { %803 = vmatmul.bf16.gmra.mxu3 %v3473_v18  ;;  %v4505_v18 = vor.u32 %v3514_v15, %v3267_v12 }
  0x7b   : > { %1374 = vmatpush.bf16.msra.mxu3 %v4369_v48 }
  0x7c   : > { %5768 = vst [vmem:[#allocation23_spill] sm:$0xff] %v4505_v18  ;;  %1141 = vmatpush.bf16.msrb.mxu2 %v4505_v18  ;;  %1333 = vmatpush.bf16.msra.mxu0 %v4371_v49 }
  0x7d   : > { %1347 = vmatpush.bf16.msra.mxu1 %v4376_v52 }
  0x7f   : > { %1375 = vmatpush.bf16.msra.mxu3 %v4388_v59 }
  0x80   : > { %1360 = vmatpush.bf16.msra.mxu2 %v4366_v47  ;;  %1334 = vmatpush.bf16.msra.mxu0 %v4390_v60 }
  0x81   : > { %1348 = vmatpush.bf16.msra.mxu1 %v4396_v0 }
  0x83   : > { %1376 = vmatpush.bf16.msra.mxu3 %v4405_v4 }
  0x84   : > { %1361 = vmatpush.bf16.msra.mxu2 %v4381_v55  ;;  %1335 = vmatpush.bf16.msra.mxu0 %v4414_v9 }
  0x85   : > { %1349 = vmatpush.bf16.msra.mxu1 %v4419_v13 }
  0x87   : > { %661 = vmatmul.bf16.gmra.mxu0 %v3474_v31  ;;  %1377 = vmatpush.bf16.msra.mxu3 %v4426_v17 }
  0x88   : > { %710 = vmatmul.bf16.gmra.mxu1 %v3474_v31  ;;  %1362 = vmatpush.bf16.msra.mxu2 %v4401_v3 }
  0x89   : > { %759 = vmatmul.bf16.gmra.mxu2 %v3474_v31  ;;  %1336 = vmatpush.bf16.msra.mxu0 %v4435_v22 }
  0x8a   : > { %808 = vmatmul.bf16.gmra.mxu3 %v3474_v31  ;;  %1350 = vmatpush.bf16.msra.mxu1 %v4440_v26  ;;  %v4554_v31 = vld [vmem:[%s5699_s1 + $0x8] sm:$0xff] }
  0x8b   : > { %1378 = vmatpush.bf16.msra.mxu3 %v4447_v30  ;;  %vm3392_vm1 = vcmp.gt.s32.totalorder %v4554_v31, 0  ;;  %vm3430_vm3 = vcmp.gt.s32.totalorder %v4554_v31, 4  ;;  %vm3460_vm5 = vcmp.gt.s32.totalorder %v4554_v31, 7 }
  0x8c   : > { %1363 = vmatpush.bf16.msra.mxu2 %v4421_v14  ;;  %v1300_v32 = vsel %vm3392_vm1, 1, %v5708_v28  ;;  %v2211_v50 = vsel %vm3430_vm3, 1, %v5708_v28  ;;  %v2895_v7 = vsel %vm3460_vm5, 1, %v5708_v28 }
  0x8d   : > { %1337 = vmatpush.bf16.msra.mxu0 %v4456_v35  ;;  %1305 = vperm.xlu0 %3671, %v1300_v32  }
  0x8e   : > { %1351 = vmatpush.bf16.msra.mxu1 %v4461_v40 }
  0x8f   : > { %1379 = vmatpush.bf16.msra.mxu3 %v4468_v45 }
  0x90   : > { %1364 = vmatpush.bf16.msra.mxu2 %v4442_v27 }
  0x91   : > { %1338 = vmatpush.bf16.msra.mxu0 %v4477_v54 }
  0x92   : > { %1352 = vmatpush.bf16.msra.mxu1 %v4482_v61 }
  0x93   : > { %1380 = vmatpush.bf16.msra.mxu3 %v4489_v2 }
  0x94   : > { %1365 = vmatpush.bf16.msra.mxu2 %v4463_v42 }
  0x95   : > { %1339 = vmatpush.bf16.msra.mxu0 %v4498_v10  ;;  %1985 = vperm.xlu0 %3671, %v1982_v36  }
  0x96   : > { %1353 = vmatpush.bf16.msra.mxu1 %v4503_v16 }
  0x97   : > { %666 = vmatmul.bf16.gmra.mxu0 %v3475_v46  ;;  %1381 = vmatpush.bf16.msra.mxu3 %v4519_v23 }
  0x98   : > { %715 = vmatmul.bf16.gmra.mxu1 %v3475_v46  ;;  %1366 = vmatpush.bf16.msra.mxu2 %v4484_v62 }
  0x99   : > { %764 = vmatmul.bf16.gmra.mxu2 %v3475_v46 }
  0x9a   : > { %813 = vmatmul.bf16.gmra.mxu3 %v3475_v46 }
  0x9c   : > { %1367 = vmatpush.bf16.msra.mxu2 %v4505_v18 }
  0x9d   : > { %2216 = vperm.xlu0 %3671, %v2211_v50  }
  0xa5   : > { %2669 = vperm.xlu0 %3671, %v2666_v58  }
  0xa7   : > { %671 = vmatmul.bf16.gmra.mxu0 %v3476_v5 }
  0xa8   : > { %720 = vmatmul.bf16.gmra.mxu1 %v3476_v5 }
  0xa9   : > { %769 = vmatmul.bf16.gmra.mxu2 %v3476_v5 }
  0xaa   : > { %818 = vmatmul.bf16.gmra.mxu3 %v3476_v5 }
  0xad   : > { %2900 = vperm.xlu0 %3671, %v2895_v7  }
  0xb7   : > { %676 = vmatmul.bf16.gmra.mxu0 %v3477_v19 }
  0xb8   : > { %725 = vmatmul.bf16.gmra.mxu1 %v3477_v19 }
  0xb9   : > { %774 = vmatmul.bf16.gmra.mxu2 %v3477_v19 }
  0xba   : > { %823 = vmatmul.bf16.gmra.mxu3 %v3477_v19 }
  0xc7   : > { %681 = vmatmul.bf16.gmra.mxu0 %v3478_v24 }
  0xc8   : > { %730 = vmatmul.bf16.gmra.mxu1 %v3478_v24 }
  0xc9   : > { %779 = vmatmul.bf16.gmra.mxu2 %v3478_v24 }
  0xca   : > { %828 = vmatmul.bf16.gmra.mxu3 %v3478_v24 }
  0xd4   : > { %v4566_v33 = vpop.f32.mrf.mxu0 }
  0xd5   : > { %v4569_v34 = vpop.f32.mrf.mxu1 }
  0xd7   : > { %1114 = vmatmul.bf16.vlgmr.msrb.gmra.mxu0 %v4115_v38 }
  0xd8   : > { %1128 = vmatmul.bf16.vlgmr.msrb.gmra.mxu1 %v4115_v38  ;;  %1560 = vmatpush.bf16.msrb.mxu0 %v4354_v37 }
  0xd9   : > { %1142 = vmatmul.bf16.vlgmr.msrb.gmra.mxu2 %v4115_v38  ;;  %1574 = vmatpush.bf16.msrb.mxu1 %v4359_v41 }
  0xda   : > { %1156 = vmatmul.bf16.vlgmr.msrb.gmra.mxu3 %v4115_v38  ;;  %1588 = vmatpush.bf16.msrb.mxu2 %v4366_v47 }
  0xdb   : > { %1602 = vmatpush.bf16.msrb.mxu3 %v4369_v48 }
  0xdc   : > { %v4575_v39 = vpop.f32.mrf.mxu2  ;;  %v4580_v44 = vpop.f32.mrf.mxu0  ;;  %1561 = vmatpush.bf16.msrb.mxu0 %v4371_v49 }
  0xdd   : > { %v4578_v43 = vpop.f32.mrf.mxu3  ;;  %v4583_v46 = vpop.f32.mrf.mxu1  ;;  %1575 = vmatpush.bf16.msrb.mxu1 %v4376_v52 }
  0xde   : > { %1589 = vmatpush.bf16.msrb.mxu2 %v4381_v55 }
  0xdf   : > { %1603 = vmatpush.bf16.msrb.mxu3 %v4388_v59 }
  0xe0   : > { %1562 = vmatpush.bf16.msrb.mxu0 %v4390_v60 }
  0xe1   : > { %1576 = vmatpush.bf16.msrb.mxu1 %v4396_v0 }
  0xe2   : > { %1590 = vmatpush.bf16.msrb.mxu2 %v4401_v3 }
  0xe3   : > { %1604 = vmatpush.bf16.msrb.mxu3 %v4405_v4 }
  0xe4   : > { %v4592_v51 = vpop.f32.mrf.mxu2  ;;  %v4598_v56 = vpop.f32.mrf.mxu0  ;;  %1563 = vmatpush.bf16.msrb.mxu0 %v4414_v9 }
  0xe5   : > { %v4596_v53 = vpop.f32.mrf.mxu3  ;;  %5770 = vst [vmem:[#allocation25_spill] sm:$0xff] %v4598_v56  ;;  %v4601_v57 = vpop.f32.mrf.mxu1  ;;  %1577 = vmatpush.bf16.msrb.mxu1 %v4419_v13 }
  0xe6   : > { %5771 = vst [vmem:[#allocation26_spill] sm:$0xff] %v4601_v57  ;;  %1591 = vmatpush.bf16.msrb.mxu2 %v4421_v14 }
  0xe7   : > { %1605 = vmatpush.bf16.msrb.mxu3 %v4426_v17 }
  0xe8   : > { %1564 = vmatpush.bf16.msrb.mxu0 %v4435_v22 }
  0xe9   : > { %1578 = vmatpush.bf16.msrb.mxu1 %v4440_v26 }
  0xea   : > { %1592 = vmatpush.bf16.msrb.mxu2 %v4442_v27 }
  0xeb   : > { %1606 = vmatpush.bf16.msrb.mxu3 %v4447_v30 }
  0xec   : > { %v4610_v63 = vpop.f32.mrf.mxu2  ;;  %v4616_v5 = vpop.f32.mrf.mxu0  ;;  %1565 = vmatpush.bf16.msrb.mxu0 %v4456_v35 }
  0xed   : > { %5772 = vst [vmem:[#allocation27_spill] sm:$0xff] %v4610_v63  ;;  %v4614_v1 = vpop.f32.mrf.mxu3  ;;  %v4619_v6 = vpop.f32.mrf.mxu1  ;;  %1579 = vmatpush.bf16.msrb.mxu1 %v4461_v40 }
  0xee   : > { %5773 = vst [vmem:[#allocation28_spill] sm:$0xff] %v4614_v1  ;;  %1593 = vmatpush.bf16.msrb.mxu2 %v4463_v42 }
  0xef   : > { %5774 = vst [vmem:[#allocation29_spill] sm:$0xff] %v4616_v5  ;;  %1607 = vmatpush.bf16.msrb.mxu3 %v4468_v45 }
  0xf0   : > { %5775 = vst [vmem:[#allocation30_spill] sm:$0xff] %v4619_v6  ;;  %1566 = vmatpush.bf16.msrb.mxu0 %v4477_v54 }
  0xf1   : > { %1580 = vmatpush.bf16.msrb.mxu1 %v4482_v61 }
  0xf2   : > { %1594 = vmatpush.bf16.msrb.mxu2 %v4484_v62 }
  0xf3   : > { %1608 = vmatpush.bf16.msrb.mxu3 %v4489_v2 }
  0xf4   : > { %v4628_v8 = vpop.f32.mrf.mxu2  ;;  %v4634_v12 = vpop.f32.mrf.mxu0  ;;  %1567 = vmatpush.bf16.msrb.mxu0 %v4498_v10 }
  0xf5   : > { %5776 = vst [vmem:[#allocation31_spill] sm:$0xff] %v4628_v8  ;;  %v4632_v11 = vpop.f32.mrf.mxu3  ;;  %v4636_v15 = vpop.f32.mrf.mxu1  ;;  %1581 = vmatpush.bf16.msrb.mxu1 %v4503_v16 }
  0xf6   : > { %5777 = vst [vmem:[#allocation32_spill] sm:$0xff] %v4632_v11  ;;  %1595 = vmatpush.bf16.msrb.mxu2 %v4505_v18 }
  0xf7   : > { %5778 = vst [vmem:[#allocation33_spill] sm:$0xff] %v4634_v12  ;;  %1609 = vmatpush.bf16.msrb.mxu3 %v4519_v23 }
  0xf8   : > { %5779 = vst [vmem:[#allocation34_spill] sm:$0xff] %v4636_v15 }
  0xfc   : > { %v4642_v19 = vpop.f32.mrf.mxu2  ;;  %v4646_v21 = vpop.f32.mrf.mxu0 }
  0xfd   : > { %5780 = vst [vmem:[#allocation35_spill] sm:$0xff] %v4642_v19  ;;  %v4644_v20 = vpop.f32.mrf.mxu3  ;;  %v4648_v24 = vpop.f32.mrf.mxu1 }
  0xfe   : > { %5781 = vst [vmem:[#allocation36_spill] sm:$0xff] %v4644_v20 }
  0xff   : > { %5782 = vst [vmem:[#allocation37_spill] sm:$0xff] %v4646_v21 }
 0x100   : > { %5783 = vst [vmem:[#allocation38_spill] sm:$0xff] %v4648_v24 }
 0x104   : > { %v4650_v29 = vpop.f32.mrf.mxu2  ;;  %v4654_v36 = vpop.f32.mrf.mxu0 }
 0x105   : > { %5784 = vst [vmem:[#allocation39_spill] sm:$0xff] %v4650_v29  ;;  %v4652_v32 = vpop.f32.mrf.mxu3  ;;  %v4656_v38 = vpop.f32.mrf.mxu1 }
 0x106   : > { %5785 = vst [vmem:[#allocation40_spill] sm:$0xff] %v4652_v32 }
 0x107   : > { %5786 = vst [vmem:[#allocation41_spill] sm:$0xff] %v4654_v36 }
 0x108   : > { %5787 = vst [vmem:[#allocation42_spill] sm:$0xff] %v4656_v38 }
 0x10c   : > { %v4658_v50 = vpop.f32.mrf.mxu2  ;;  %v4662_v7 = vpop.f32.mrf.mxu0 }
 0x10d   : > { %5788 = vst [vmem:[#allocation43_spill] sm:$0xff] %v4658_v50  ;;  %v4660_v58 = vpop.f32.mrf.mxu3  ;;  %v4664_v28 = vpop.f32.mrf.mxu1 }
 0x10e   : > { %5789 = vst [vmem:[#allocation44_spill] sm:$0xff] %v4660_v58 }
 0x10f   : > { %5790 = vst [vmem:[#allocation45_spill] sm:$0xff] %v4662_v7 }
 0x110   : > { %5791 = vst [vmem:[#allocation46_spill] sm:$0xff] %v4664_v28 }
 0x114   : > { %v4666_v20 = vpop.f32.mrf.mxu2  ;;  %v4670_v24 = vpop.f32.mrf.mxu0 }
 0x115   : > { %5792 = vst [vmem:[#allocation47_spill] sm:$0xff] %v4666_v20  ;;  %v4668_v21 = vpop.f32.mrf.mxu3  ;;  %v4672_v29 = vpop.f32.mrf.mxu1 }
 0x116   : > { %5793 = vst [vmem:[#allocation48_spill] sm:$0xff] %v4668_v21 }
 0x117   : > { %5794 = vst [vmem:[#allocation49_spill] sm:$0xff] %v4670_v24 }
 0x118   : > { %5795 = vst [vmem:[#allocation50_spill] sm:$0xff] %v4672_v29 }
 0x11c   : > { %v4674_v32 = vpop.f32.mrf.mxu2  ;;  %v4678_v38 = vpop.f32.mrf.mxu0 }
 0x11d   : > { %5796 = vst [vmem:[#allocation51_spill] sm:$0xff] %v4674_v32  ;;  %v4676_v36 = vpop.f32.mrf.mxu3  ;;  %v4680_v50 = vpop.f32.mrf.mxu1 }
 0x11e   : > { %5797 = vst [vmem:[#allocation52_spill] sm:$0xff] %v4676_v36 }
 0x11f   : > { %5798 = vst [vmem:[#allocation53_spill] sm:$0xff] %v4678_v38 }
 0x120   : > { %5799 = vst [vmem:[#allocation54_spill] sm:$0xff] %v4680_v50 }
 0x124   : > { %v4682_v58 = vpop.f32.mrf.mxu2  ;;  %v4686_v20 = vpop.f32.mrf.mxu0 }
 0x125   : > { %5800 = vst [vmem:[#allocation55_spill] sm:$0xff] %v4682_v58  ;;  %v4684_v28 = vpop.f32.mrf.mxu3  ;;  %v4688_v21 = vpop.f32.mrf.mxu1 }
 0x126   : > { %5801 = vst [vmem:[#allocation56_spill] sm:$0xff] %v4684_v28 }
 0x127   : > { %5802 = vst [vmem:[#allocation57_spill] sm:$0xff] %v4686_v20 }
 0x128   : > { %5803 = vst [vmem:[#allocation58_spill] sm:$0xff] %v4688_v21 }
 0x12c   : > { %v4690_v24 = vpop.f32.mrf.mxu2  ;;  %v4694_v32 = vpop.f32.mrf.mxu0 }
 0x12d   : > { %5804 = vst [vmem:[#allocation59_spill] sm:$0xff] %v4690_v24  ;;  %v4692_v29 = vpop.f32.mrf.mxu3  ;;  %v4696_v36 = vpop.f32.mrf.mxu1 }
 0x12e   : > { %5805 = vst [vmem:[#allocation60_spill] sm:$0xff] %v4692_v29 }
 0x12f   : > { %5806 = vst [vmem:[#allocation61_spill] sm:$0xff] %v4694_v32 }
 0x130   : > { %5807 = vst [vmem:[#allocation62_spill] sm:$0xff] %v4696_v36 }
 0x134   : > { %v4698_v38 = vpop.f32.mrf.mxu2  ;;  %v4702_v58 = vpop.f32.mrf.mxu0 }
 0x135   : > { %5808 = vst [vmem:[#allocation63_spill] sm:$0xff] %v4698_v38  ;;  %v4700_v50 = vpop.f32.mrf.mxu3  ;;  %v4704_v28 = vpop.f32.mrf.mxu1 }
 0x136   : > { %5809 = vst [vmem:[#allocation64_spill] sm:$0xff] %v4700_v50 }
 0x137   : > { %5810 = vst [vmem:[#allocation65_spill] sm:$0xff] %v4702_v58 }
 0x138   : > { %5811 = vst [vmem:[#allocation66_spill] sm:$0xff] %v4704_v28 }
 0x13c   : > { %v4706_v7 = vpop.f32.mrf.mxu2  ;;  %v4710_v21 = vpop.f32.mrf.mxu0 }
 0x13d   : > { %5812 = vst [vmem:[#allocation67_spill] sm:$0xff] %v4706_v7  ;;  %v4708_v20 = vpop.f32.mrf.mxu3  ;;  %v4712_v24 = vpop.f32.mrf.mxu1 }
 0x13e   : > { %5813 = vst [vmem:[#allocation68_spill] sm:$0xff] %v4708_v20 }
 0x13f   : > { %5814 = vst [vmem:[#allocation69_spill] sm:$0xff] %v4710_v21  ;;  %v420_v21 = vld [vmem:[%s362_s7] sm:$0xf] }
 0x140   : > { %5815 = vst [vmem:[#allocation70_spill] sm:$0xff] %v4712_v24 }
 0x144   : > { %v4716_v29 = vpop.f32.mrf.mxu2  ;;  %v4720_v38 = vpop.f32.mrf.mxu0 }
 0x145   : > { %5816 = vst [vmem:[#allocation71_spill] sm:$0xff] %v4716_v29  ;;  %v4718_v36 = vpop.f32.mrf.mxu3  ;;  %v4722_v50 = vpop.f32.mrf.mxu1  ;;  %v4735_v29 = vperm.slane %v420_v21, 0 }
 0x146   : > { %5817 = vst [vmem:[#allocation72_spill] sm:$0xff] %v4718_v36  ;;  %v4737_v36 = vperm.slane %v420_v21, 1 }
 0x147   : > { %5818 = vst [vmem:[#allocation73_spill] sm:$0xff] %v4720_v38 }
 0x148   : > { %5819 = vst [vmem:[#allocation74_spill] sm:$0xff] %v4722_v50  ;;  %v648_v50 = vadd.f32 %v4566_v33, %v4735_v29  ;;  %v697_v58 = vadd.f32 %v4569_v34, %v4737_v36  ;;  %v650_v33 = vadd.f32 %v4580_v44, %v4735_v29  ;;  %v699_v34 = vadd.f32 %v4583_v46, %v4737_v36 }
 0x149   : > { %5824 = vst [vmem:[#allocation79_spill] sm:$0xff] %v4735_v29  ;;  %v4755_v44 = vperm.slane %v420_v21, 3 }
 0x14a   : > { %5825 = vst [vmem:[#allocation80_spill] sm:$0xff] %v4737_v36 }
 0x14b   : > { %5829 = vst [vmem:[#allocation84_spill] sm:$0xff] %v4755_v44 }
 0x14c   : > { %v4727_v20 = vpop.f32.mrf.mxu2  ;;  %v4731_v24 = vpop.f32.mrf.mxu0 }
 0x14d   : > { %5820 = vst [vmem:[#allocation75_spill] sm:$0xff] %v4727_v20  ;;  %v4729_v7 = vpop.f32.mrf.mxu3  ;;  %v4733_v28 = vpop.f32.mrf.mxu1 }
 0x14e   : > { %5821 = vst [vmem:[#allocation76_spill] sm:$0xff] %v4729_v7 }
 0x14f   : > { %5822 = vst [vmem:[#allocation77_spill] sm:$0xff] %v4731_v24  ;;  %v4747_v24 = vperm.slane %v420_v21, 2 }
 0x150   : > { %5823 = vst [vmem:[#allocation78_spill] sm:$0xff] %v4733_v28 }
 0x151   : > { %5828 = vst [vmem:[#allocation83_spill] sm:$0xff] %v4747_v24  ;;  %v746_v11 = vadd.f32 %v4575_v39, %v4747_v24  ;;  %v748_v46 = vadd.f32 %v4592_v51, %v4747_v24 }
 0x154   : > { %v4741_v38 = vpop.f32.mrf.mxu2  ;;  %v1115_v20 = vpop.f32.mrf.mxu0 }
 0x155   : > { %5826 = vst [vmem:[#allocation81_spill] sm:$0xff] %v4741_v38  ;;  %v4745_v32 = vpop.f32.mrf.mxu3  ;;  %v1162_v7 = vadd.f32 %v1115_v20, %v648_v50  ;;  %v1129_v19 = vpop.f32.mrf.mxu1 }
 0x156   : > { %5827 = vst [vmem:[#allocation82_spill] sm:$0xff] %v4745_v32  ;;  %v1163_v28 = vadd.f32 %v1129_v19, %v697_v58 }
 0x157   : > { %v3385_v15 = vmul.f32 -1.442695, %v1162_v7 }
 0x158   : > { %v3386_v12 = vmul.f32 -1.442695, %v1163_v28 }
 0x159   : > { %3674 = vpow2.f32 %v3385_v15 }
 0x15a   : > { %3676 = vpow2.f32 %v3386_v12 }
 0x15c   : > { %v1143_v38 = vpop.f32.mrf.mxu2  ;;  %v1117_v20 = vpop.f32.mrf.mxu0 }
 0x15d   : > { %v1164_v32 = vadd.f32 %v1143_v38, %v746_v11  ;;  %v1166_v50 = vadd.f32 %v1117_v20, %v650_v33  ;;  %v1131_v1 = vpop.f32.mrf.mxu1  ;;  %v1157_v28 = vpop.f32.mrf.mxu3  ;;  %v795_v38 = vadd.f32 %v4578_v43, %v4755_v44 }
 0x15e   : > { %v1167_v19 = vadd.f32 %v1131_v1, %v699_v34 }
 0x15f   : > { %v3387_v8 = vmul.f32 -1.442695, %v1164_v32  ;;  %v3675_v58 = vpop.eup %3674  ;;  %v3388_v15 = vmul.f32 -1.442695, %v1166_v50  ;;  %v1165_v50 = vadd.f32 %v1157_v28, %v795_v38 }
 0x160   : > { %v3677_v7 = vpop.eup %3676  ;;  %v1188_v6 = vadd.f32 1.0, %v3675_v58  ;;  %v3389_v39 = vmul.f32 -1.442695, %v1167_v19 }
 0x161   : > { %3678 = vpow2.f32 %v3387_v8  ;;  %v1189_v12 = vadd.f32 1.0, %v3677_v7  ;;  %v797_v7 = vadd.f32 %v4596_v53, %v4755_v44 }
 0x162   : > { %3680 = vpow2.f32 %v3388_v15  ;;  %v1203_v43 = vand.u32 2147483647, %v1188_v6  ;;  %vm1199_vm8 = vweird.f32 %v1188_v6 }
 0x163   : > { %3682 = vrcp.f32 %v1188_v6  ;;  %vm1214_vm7 = vweird.f32 %v1189_v12 }
 0x164   : > { %3684 = vrcp.f32 %v1189_v12  ;;  %v1145_v11 = vpop.f32.mrf.mxu2  ;;  %vm4776_vm10 = vcmp.eq.f32.partialorder %v1203_v43, 8.507059e+37 }
 0x165   : > { %3686 = vpow2.f32 %v3389_v39  ;;  %v1168_v32 = vadd.f32 %v1145_v11, %v748_v46  ;;  %v1159_v58 = vpop.f32.mrf.mxu3  ;;  %v1205_v11 = vand.u32 2147483648, %v1188_v6 }
 0x166   : > { %v1169_v38 = vadd.f32 %v1159_v58, %v797_v7 }
 0x167   : > { %v3679_v1 = vpop.eup %3678  ;;  %v3390_v33 = vmul.f32 -1.442695, %v1168_v32 }
 0x168   : > { %v3681_v34 = vpop.eup %3680  ;;  %v4761_v8 = vadd.f32 1.0, %v3679_v1  ;;  %v1220_v1 = vand.u32 2147483648, %v1189_v12 }
 0x169   : > { %v3683_v20 = vpop.eup %3682  ;;  %v4763_v21 = vadd.f32 1.0, %v3681_v34  ;;  %3688 = vpow2.f32 %v3390_v33  ;;  %v1218_v34 = vand.u32 2147483647, %v1189_v12 }
 0x16a   : > { %v3685_v19 = vpop.eup %3684  ;;  %v1195_v51 = vmul.f32 %v3683_v20, %v1188_v6  ;;  %3690 = vrcp.f32 %v4761_v8  ;;  %vm1200_vm6 = vweird.f32 %v3683_v20  ;;  %v1221_v7 = vor.u32 1.1754944e-38, %v1220_v1 }
 0x16b   : > { %v3687_v15 = vpop.eup %3686  ;;  %v1210_v39 = vmul.f32 %v3685_v19, %v1189_v12  ;;  %3692 = vrcp.f32 %v4763_v21  ;;  %vm1215_vm9 = vweird.f32 %v3685_v19  ;;  %vm1201_vm12 = vmor %vm1199_vm8, %vm1200_vm6  ;;  %vm1219_vm14 = vcmp.eq.f32.partialorder %v1218_v34, 8.507059e+37 }
 0x16c   : > { %v1196_v46 = vsub.f32 1.0, %v1195_v51  ;;  %v4769_v32 = vadd.f32 1.0, %v3687_v15  ;;  %3694 = vtanh.f32 %v1165_v50  ;;  %v4774_v51 = vpop.permute.xlu0 %1302  ;;  %v1206_v50 = vor.u32 1.1754944e-38, %v1205_v11  ;;  %vm1216_vm13 = vmor %vm1214_vm7, %vm1215_vm9 }
 0x16d   : > { %v1211_v28 = vsub.f32 1.0, %v1210_v39  ;;  %vm1307_vm11 = vcmp.eq.s32.totalorder %v4774_v51, 1  ;;  %vm1229_vm15 = vweird.f32 %v4761_v8  ;;  %vm1244_vm6 = vweird.f32 %v4763_v21 }
 0x16e   : > { %v1197_v33 = vmul.f32 %v3683_v20, %v1196_v46  ;;  %3696 = vrcp.f32 %v4769_v32  ;;  %v1265_v39 = vand.u32 2147483648, %v4769_v32  ;;  %vm1259_vm5 = vweird.f32 %v4769_v32 }
 0x16f   : > { %v3689_v5 = vpop.eup %3688  ;;  %v1212_v63 = vmul.f32 %v3685_v19, %v1211_v28  ;;  %3698 = vtanh.f32 %v1169_v38  ;;  %v1233_v38 = vand.u32 2147483647, %v4761_v8 }
 0x170   : > { %v4772_v53 = vpop.eup %3690  ;;  %v1198_v15 = vadd.f32 %v3683_v20, %v1197_v33  ;;  %v4780_v58 = vadd.f32 1.0, %v3689_v5  ;;  %v1235_v33 = vand.u32 2147483648, %v4761_v8 }
 0x171   : > { %v1225_v46 = vmul.f32 %v4772_v53, %v4761_v8  ;;  %v1213_v6 = vadd.f32 %v3685_v19, %v1212_v63  ;;  %v3693_v28 = vpop.eup %3692  ;;  %vm1230_vm0 = vweird.f32 %v4772_v53 }
 0x172   : > { %v1202_v43 = vsel %vm1201_vm12, %v3683_v20, %v1198_v15  ;;  %3700 = vrcp.f32 %v4780_v58  ;;  %v3695_v5 = vpop.eup %3694  ;;  %v1240_v24 = vmul.f32 %v3693_v28, %v4763_v21  ;;  %vm1245_vm1 = vweird.f32 %v3693_v28  ;;  %vm4807_vm4 = vmor %vm1229_vm15, %vm1230_vm0 }
 0x173   : > { %v1226_v11 = vsub.f32 1.0, %v1225_v46  ;;  %v1207_v1 = vsel %vm4776_vm10, %v1206_v50, %v1202_v43  ;;  %v1217_v44 = vsel %vm1216_vm13, %v3685_v19, %v1213_v6  ;;  %v1236_v46 = vor.u32 1.1754944e-38, %v1235_v33  ;;  %vm1246_vm7 = vmor %vm1244_vm6, %vm1245_vm1 }
 0x174   : > { %v3697_v63 = vpop.eup %3696  ;;  %v1222_v20 = vsel %vm1219_vm14, %v1221_v7, %v1217_v44  ;;  %v1288_v15 = vmul.f32 %v3695_v5, %v1207_v1  ;;  %v1241_v57 = vsub.f32 1.0, %v1240_v24  ;;  %v1248_v19 = vand.u32 2147483647, %v4763_v21 }
 0x175   : > { %v1227_v12 = vmul.f32 %v4772_v53, %v1226_v11  ;;  %v1286_v34 = vmul.f32 0.0, %v1222_v20  ;;  %v1255_v36 = vmul.f32 %v3697_v63, %v4769_v32  ;;  %v1250_v50 = vand.u32 2147483648, %v4763_v21  ;;  %v3699_v6 = vpop.eup %3698 }
 0x176   : > { %v1242_v44 = vmul.f32 %v3693_v28, %v1241_v57  ;;  %v1263_v24 = vand.u32 2147483647, %v4769_v32  ;;  %vm1260_vm3 = vweird.f32 %v3697_v63  ;;  %vm1249_vm8 = vcmp.eq.f32.partialorder %v1248_v19, 8.507059e+37 }
 0x177   : > { %v1290_v43 = vadd.f32 %v1288_v15, %v1286_v34  ;;  %v1256_v56 = vsub.f32 1.0, %v1255_v36  ;;  %v1228_v5 = vadd.f32 %v4772_v53, %v1227_v12  ;;  %v5834_v36 = vmov 0   ;;  %vm1261_vm9 = vmor %vm1259_vm5, %vm1260_vm3 }
 0x178   : > { %v3701_v7 = vpop.eup %3700  ;;  %v1243_v57 = vadd.f32 %v3693_v28, %v1242_v44  ;;  %v1526_v20 = vsel %vm3399_vm2, 1, %v5834_v36  ;;  %v1266_v34 = vor.u32 1.1754944e-38, %v1265_v39  ;;  %vm1264_vm10 = vcmp.eq.f32.partialorder %v1263_v24, 8.507059e+37 }
 0x179   : > { %3702 = vtanh.f32 %v1290_v43  ;;  %v1257_v33 = vmul.f32 %v3697_v63, %v1256_v56  ;;  %v1270_v11 = vmul.f32 %v3701_v7, %v4780_v58  ;;  %v1251_v56 = vor.u32 1.1754944e-38, %v1250_v50  ;;  %1529 = vperm.xlu1 %3672, %v1526_v20  }
 0x17a   : > { %v1247_v29 = vsel %vm1246_vm7, %v3693_v28, %v1243_v57  ;;  %v1232_v8 = vsel %vm4807_vm4, %v4772_v53, %v1228_v5  ;;  %v4819_v32 = vsel %vm1307_vm11, %v1290_v43, 0.0  ;;  %vm3400_vm12 = vcmp.gt.s32.totalorder %v4554_v31, 1  ;;  %v1306_v28 = vpop.permute.xlu0 %1305 }
 0x17b   : > { %v1271_v15 = vsub.f32 1.0, %v1270_v11  ;;  %v1258_v12 = vadd.f32 %v3697_v63, %v1257_v33  ;;  %v1252_v21 = vsel %vm1249_vm8, %v1251_v56, %v1247_v29  ;;  %vm1234_vm13 = vcmp.eq.f32.partialorder %v1233_v38, 8.507059e+37 }
 0x17c   : > { %v1289_v33 = vmul.f32 %v3699_v6, %v1252_v21  ;;  %v1237_v57 = vsel %vm1234_vm13, %v1236_v46, %v1232_v8  ;;  %vm1308_vm14 = vcmp.eq.s32.totalorder %v1306_v28, 1  ;;  %v1527_v53 = vsel %vm3400_vm12, 1, %v5834_v36 }
 0x17d   : > { %v1262_v44 = vsel %vm1261_vm9, %v3697_v63, %v1258_v12  ;;  %v1272_v19 = vmul.f32 %v3701_v7, %v1271_v15  ;;  %vm1275_vm15 = vweird.f32 %v3701_v7  ;;  %v1280_v29 = vand.u32 2147483648, %v4780_v58 }
 0x17e   : > { %v1267_v50 = vsel %vm1264_vm10, %v1266_v34, %v1262_v44  ;;  %vm1274_vm0 = vweird.f32 %v4780_v58  ;;  %v1278_v38 = vand.u32 2147483647, %v4780_v58  ;;  %vm3420_vm2 = vcmp.gt.s32.totalorder %v4554_v31, 3 }
 0x17f   : > { %v3703_v39 = vpop.eup %3702  ;;  %v1287_v11 = vmul.f32 0.0, %v1267_v50  ;;  %v1273_v43 = vadd.f32 %v3701_v7, %v1272_v19  ;;  %vm1276_vm1 = vmor %vm1274_vm0, %vm1275_vm15  ;;  %v1281_v6 = vor.u32 1.1754944e-38, %v1280_v29  ;;  %v1983_v20 = vsel %vm3420_vm2, 1, %v5834_v36 }
 0x180   : > { %v1294_v1 = vmul.f32 %v3703_v39, %v1237_v57  ;;  %vm1279_vm3 = vcmp.eq.f32.partialorder %v1278_v38, 8.507059e+37  ;;  %vm3450_vm4 = vcmp.gt.s32.totalorder %v4554_v31, 6  ;;  %v5836_v39 = vld [vmem:[#allocation25_spill] sm:$0xff]  ;;  %v5838_v57 = vld [vmem:[#allocation26_spill] sm:$0xff] }
 0x181   : > { %v1291_v5 = vadd.f32 %v1289_v33, %v1287_v11  ;;  %1532 = vperm.xlu1 %3672, %v1527_v53   ;;  %v1277_v46 = vsel %vm1276_vm1, %v3701_v7, %v1273_v43  ;;  %v2667_v50 = vsel %vm3450_vm4, 1, %v5834_v36  ;;  %v5835_v33 = vld [vmem:[#allocation79_spill] sm:$0xff]  ;;  %v5837_v11 = vld [vmem:[#allocation80_spill] sm:$0xff] }
 0x182   : > { %v4832_v24 = vsel %vm1307_vm11, %v1294_v1, 0.0  ;;  %v1282_v56 = vsel %vm1279_vm3, %v1281_v6, %v1277_v46  ;;  %vm3439_vm11 = vcmp.gt.s32.totalorder %v4539_v25, 5  ;;  %v653_v28 = vadd.f32 %v5836_v39, %v5835_v33  ;;  %v5839_v6 = vld [vmem:[#allocation83_spill] sm:$0xff] }
 0x183   : > { %3704 = vtanh.f32 %v1291_v5  ;;  %v4825_v63 = vsel %vm1308_vm14, %v1291_v5, 0.0  ;;  %v1313_v34 = vpack.c.bf16 %v4832_v24, %v4832_v24  ;;  %v2438_v19 = vsel %vm3439_vm11, 1, %v5834_v36 }
 0x184   : > { %v702_v1 = vadd.f32 %v5838_v57, %v5837_v11  ;;  %vm3409_vm3 = vcmp.gt.s32.totalorder %v4539_v25, 2 }
 0x185   : > { %v1328_v8 = vunpack.c.l.b16 %v1313_v34  ;;  %v5842_v34 = vld [vmem:[#allocation30_spill] sm:$0xff] }
 0x189   : > { %v3705_v15 = vpop.eup %3704  ;;  %1988 = vperm.xlu1 %3672, %v1983_v20   ;;  %v5840_v20 = vld [vmem:[#allocation27_spill] sm:$0xff] }
 0x18a   : > { %v1295_v12 = vmul.f32 %v3705_v15, %v1282_v56  ;;  %v751_v15 = vadd.f32 %v5840_v20, %v5839_v6  ;;  %v5841_v56 = vld [vmem:[#allocation29_spill] sm:$0xff] }
 0x18c   : > { %v4838_v58 = vsel %vm1308_vm14, %v1295_v12, 0.0  ;;  %v655_v12 = vadd.f32 %v5841_v56, %v5835_v33 }
 0x18d   : > { %v1314_v7 = vpack.c.bf16 %v4838_v58, %v4838_v58  ;;  %v3547_v51 = vpack.c.bf16 %v4838_v58, %v4832_v24 }
 0x18f   : > { %3548 = vst [vmem:[%s4846_s13] sm:$0xff] %v3547_v51   ;;  %v1329_v21 = vunpack.c.l.b16 %v1314_v7  ;;  %v704_v7 = vadd.f32 %v5842_v34, %v5837_v11  ;;  %v5845_v34 = vld [vmem:[#allocation28_spill] sm:$0xff] }
 0x191   : > { %v1330_v44 = vpack.c.b16 %v1329_v21, %v1328_v8  ;;  %2441 = vperm.xlu1 %3672, %v2438_v19  }
 0x193   : > { %1340 = vmatmul.bf16.vlgmr.msra.gmra.mxu0 %v1330_v44  ;;  %1354 = vmatmul.bf16.vlgmr.msra.gmra.mxu1 %v1330_v44 }
 0x194   : > { %1368 = vmatmul.bf16.vlgmr.msra.gmra.mxu2 %v1330_v44  ;;  %1382 = vmatmul.bf16.vlgmr.msra.gmra.mxu3 %v1330_v44 }
 0x195   : > { %1788 = vmatpush.bf16.msra.mxu0 %v4354_v37  ;;  %1802 = vmatpush.bf16.msra.mxu1 %v4359_v41 }
 0x196   : > { %1816 = vmatpush.bf16.msra.mxu2 %v4366_v47  ;;  %1830 = vmatpush.bf16.msra.mxu3 %v4369_v48 }
 0x199   : > { %1789 = vmatpush.bf16.msra.mxu0 %v4371_v49  ;;  %1803 = vmatpush.bf16.msra.mxu1 %v4376_v52 }
 0x19a   : > { %1817 = vmatpush.bf16.msra.mxu2 %v4381_v55  ;;  %1831 = vmatpush.bf16.msra.mxu3 %v4388_v59 }
 0x19b   : > { %2672 = vperm.xlu1 %3672, %v2667_v50  }
 0x19d   : > { %1790 = vmatpush.bf16.msra.mxu0 %v4390_v60  ;;  %1804 = vmatpush.bf16.msra.mxu1 %v4396_v0 }
 0x19e   : > { %1818 = vmatpush.bf16.msra.mxu2 %v4401_v3  ;;  %1832 = vmatpush.bf16.msra.mxu3 %v4405_v4 }
 0x1a1   : > { %1791 = vmatpush.bf16.msra.mxu0 %v4414_v9  ;;  %1805 = vmatpush.bf16.msra.mxu1 %v4419_v13 }
 0x1a2   : > { %1819 = vmatpush.bf16.msra.mxu2 %v4421_v14  ;;  %1833 = vmatpush.bf16.msra.mxu3 %v4426_v17 }
 0x1a5   : > { %1792 = vmatpush.bf16.msra.mxu0 %v4435_v22  ;;  %1806 = vmatpush.bf16.msra.mxu1 %v4440_v26 }
 0x1a6   : > { %1820 = vmatpush.bf16.msra.mxu2 %v4442_v27  ;;  %1834 = vmatpush.bf16.msra.mxu3 %v4447_v30 }
 0x1a9   : > { %1793 = vmatpush.bf16.msra.mxu0 %v4456_v35  ;;  %1807 = vmatpush.bf16.msra.mxu1 %v4461_v40 }
 0x1aa   : > { %1821 = vmatpush.bf16.msra.mxu2 %v4463_v42  ;;  %1835 = vmatpush.bf16.msra.mxu3 %v4468_v45 }
 0x1ad   : > { %1794 = vmatpush.bf16.msra.mxu0 %v4477_v54  ;;  %1808 = vmatpush.bf16.msra.mxu1 %v4482_v61 }
 0x1ae   : > { %1822 = vmatpush.bf16.msra.mxu2 %v4484_v62  ;;  %1836 = vmatpush.bf16.msra.mxu3 %v4489_v2 }
 0x1b1   : > { %1795 = vmatpush.bf16.msra.mxu0 %v4498_v10  ;;  %1809 = vmatpush.bf16.msra.mxu1 %v4503_v16 }
 0x1b2   : > { %1823 = vmatpush.bf16.msra.mxu2 %v4505_v18  ;;  %1837 = vmatpush.bf16.msra.mxu3 %v4519_v23 }
 0x210   : > { %v1341_v53 = vpop.f32.mrf.mxu0  ;;  %v1355_v5 = vpop.f32.mrf.mxu1 }
 0x211   : > { %v1388_v43 = vadd.f32 %v1341_v53, %v653_v28  ;;  %v1389_v29 = vadd.f32 %v1355_v5, %v702_v1 }
 0x213   : > { %v3393_v38 = vmul.f32 -1.442695, %v1388_v43  ;;  %v3394_v46 = vmul.f32 -1.442695, %v1389_v29 }
 0x215   : > { %3706 = vpow2.f32 %v3393_v38  ;;  %v5843_v38 = vld [vmem:[#allocation31_spill] sm:$0xff] }
 0x216   : > { %3708 = vpow2.f32 %v3394_v46  ;;  %v753_v46 = vadd.f32 %v5843_v38, %v5839_v6 }
 0x217   : > { %v1369_v51 = vpop.f32.mrf.mxu2  ;;  %v1383_v57 = vpop.f32.mrf.mxu3 }
 0x218   : > { %v1390_v8 = vadd.f32 %v1369_v51, %v751_v15  ;;  %v1343_v21 = vpop.f32.mrf.mxu0  ;;  %v1357_v44 = vpop.f32.mrf.mxu1 }
 0x219   : > { %v1392_v19 = vadd.f32 %v1343_v21, %v655_v12  ;;  %v1393_v50 = vadd.f32 %v1357_v44, %v704_v7  ;;  %v5844_v12 = vld [vmem:[#allocation84_spill] sm:$0xff] }
 0x21a   : > { %v3395_v39 = vmul.f32 -1.442695, %v1390_v8  ;;  %v800_v7 = vadd.f32 %v5845_v34, %v5844_v12 }
 0x21b   : > { %v3707_v28 = vpop.eup %3706  ;;  %v3396_v1 = vmul.f32 -1.442695, %v1392_v19  ;;  %v3397_v43 = vmul.f32 -1.442695, %v1393_v50 }
 0x21c   : > { %v3709_v53 = vpop.eup %3708  ;;  %v1414_v5 = vadd.f32 1.0, %v3707_v28  ;;  %3710 = vpow2.f32 %v3395_v39  ;;  %v1391_v19 = vadd.f32 %v1383_v57, %v800_v7  ;;  %v5846_v28 = vld [vmem:[#allocation32_spill] sm:$0xff] }
 0x21d   : > { %v1415_v29 = vadd.f32 1.0, %v3709_v53  ;;  %3712 = vpow2.f32 %v3396_v1  ;;  %v802_v1 = vadd.f32 %v5846_v28, %v5844_v12 }
 0x21e   : > { %3714 = vrcp.f32 %v1414_v5  ;;  %vm1425_vm5 = vweird.f32 %v1414_v5 }
 0x21f   : > { %3716 = vrcp.f32 %v1415_v29  ;;  %v1371_v20 = vpop.f32.mrf.mxu2  ;;  %v1444_v57 = vand.u32 2147483647, %v1415_v29  ;;  %v1446_v7 = vand.u32 2147483648, %v1415_v29  ;;  %vm1440_vm7 = vweird.f32 %v1415_v29 }
 0x220   : > { %3718 = vpow2.f32 %v3397_v43  ;;  %v1394_v15 = vadd.f32 %v1371_v20, %v753_v46  ;;  %v1385_v43 = vpop.f32.mrf.mxu3  ;;  %v1429_v20 = vand.u32 2147483647, %v1414_v5 }
 0x221   : > { %v1395_v28 = vadd.f32 %v1385_v43, %v802_v1  ;;  %vm4919_vm12 = vcmp.eq.f32.partialorder %v1444_v57, 8.507059e+37  ;;  %v1447_v43 = vor.u32 1.1754944e-38, %v1446_v7 }
 0x222   : > { %v3711_v56 = vpop.eup %3710  ;;  %v3398_v51 = vmul.f32 -1.442695, %v1394_v15  ;;  %v1431_v15 = vand.u32 2147483648, %v1414_v5  ;;  %vm4913_vm9 = vcmp.eq.f32.partialorder %v1429_v20, 8.507059e+37 }
 0x223   : > { %v3713_v8 = vpop.eup %3712  ;;  %v4899_v21 = vadd.f32 1.0, %v3711_v56 }
 0x224   : > { %v3715_v44 = vpop.eup %3714  ;;  %v4901_v50 = vadd.f32 1.0, %v3713_v8  ;;  %3720 = vpow2.f32 %v3398_v51  ;;  %v4909_v8 = vpop.permute.xlu1 %1529 }
 0x225   : > { %v3717_v39 = vpop.eup %3716  ;;  %v1421_v53 = vmul.f32 %v3715_v44, %v1414_v5  ;;  %3722 = vrcp.f32 %v4899_v21  ;;  %vm1426_vm6 = vweird.f32 %v3715_v44  ;;  %vm1534_vm8 = vcmp.eq.s32.totalorder %v4909_v8, 1 }
 0x226   : > { %v3719_v38 = vpop.eup %3718  ;;  %v1436_v46 = vmul.f32 %v3717_v39, %v1415_v29  ;;  %3724 = vrcp.f32 %v4901_v50  ;;  %vm1441_vm10 = vweird.f32 %v3717_v39  ;;  %vm1427_vm13 = vmor %vm1425_vm5, %vm1426_vm6  ;;  %vm1455_vm15 = vweird.f32 %v4899_v21 }
 0x227   : > { %v1422_v56 = vsub.f32 1.0, %v1421_v53  ;;  %v4907_v34 = vadd.f32 1.0, %v3719_v38  ;;  %3726 = vtanh.f32 %v1391_v19  ;;  %v1432_v38 = vor.u32 1.1754944e-38, %v1431_v15  ;;  %vm1442_vm14 = vmor %vm1440_vm7, %vm1441_vm10 }
 0x228   : > { %v1437_v51 = vsub.f32 1.0, %v1436_v46  ;;  %v1476_v18 = vand.u32 2147483648, %v4901_v50  ;;  %v1461_v16 = vand.u32 2147483648, %v4899_v21  ;;  %vm1470_vm0 = vweird.f32 %v4901_v50 }
 0x229   : > { %v1423_v12 = vmul.f32 %v3715_v44, %v1422_v56  ;;  %3728 = vrcp.f32 %v4907_v34  ;;  %vm3410_vm6 = vcmp.gt.s32.totalorder %v4554_v31, 2 }
 0x22a   : > { %v3721_v6 = vpop.eup %3720  ;;  %v1438_v11 = vmul.f32 %v3717_v39, %v1437_v51  ;;  %v1459_v51 = vand.u32 2147483647, %v4899_v21  ;;  %3730 = vtanh.f32 %v1395_v28 }
 0x22b   : > { %v4917_v46 = vpop.eup %3722  ;;  %v1424_v19 = vadd.f32 %v3715_v44, %v1423_v12  ;;  %v4923_v56 = vadd.f32 1.0, %v3721_v6  ;;  %v1474_v6 = vand.u32 2147483647, %v4901_v50 }
 0x22c   : > { %v3725_v33 = vpop.eup %3724  ;;  %v1451_v20 = vmul.f32 %v4917_v46, %v4899_v21  ;;  %v1439_v15 = vadd.f32 %v3717_v39, %v1438_v11  ;;  %vm1456_vm11 = vweird.f32 %v4917_v46  ;;  %v1755_v21 = vsel %vm3410_vm6, 1, %v5834_v36 }
 0x22d   : > { %v1428_v23 = vsel %vm1427_vm13, %v3715_v44, %v1424_v19  ;;  %v1466_v12 = vmul.f32 %v3725_v33, %v4901_v50  ;;  %3732 = vrcp.f32 %v4923_v56  ;;  %v3727_v57 = vpop.eup %3726  ;;  %vm1471_vm1 = vweird.f32 %v3725_v33  ;;  %vm4967_vm7 = vmor %vm1455_vm15, %vm1456_vm11 }
 0x22e   : > { %v1452_v7 = vsub.f32 1.0, %v1451_v20  ;;  %v1433_v5 = vsel %vm4913_vm9, %v1432_v38, %v1428_v23  ;;  %v1443_v11 = vsel %vm1442_vm14, %v3717_v39, %v1439_v15  ;;  %vm4945_vm2 = vcmp.eq.f32.partialorder %v1474_v6, 8.507059e+37  ;;  %vm1472_vm4 = vmor %vm1470_vm0, %vm1471_vm1 }
 0x22f   : > { %v3729_v28 = vpop.eup %3728  ;;  %v1514_v44 = vmul.f32 %v3727_v57, %v1433_v5  ;;  %v1467_v19 = vsub.f32 1.0, %v1466_v12  ;;  %v1448_v29 = vsel %vm4919_vm12, %v1447_v43, %v1443_v11  ;;  %v1477_v43 = vor.u32 1.1754944e-38, %v1476_v18 }
 0x230   : > { %v1481_v10 = vmul.f32 %v3729_v28, %v4907_v34  ;;  %v1453_v2 = vmul.f32 %v4917_v46, %v1452_v7  ;;  %v1512_v20 = vmul.f32 %v1448_v29, %v4819_v32  ;;  %v3731_v53 = vpop.eup %3730  ;;  %v1754_v15 = vsel %vm3409_vm3, 1, %v5834_v36 }
 0x231   : > { %v1468_v23 = vmul.f32 %v3725_v33, %v1467_v19  ;;  %v1489_v5 = vand.u32 2147483647, %v4907_v34  ;;  %1757 = vperm.xlu2 %3673, %v1754_v15   ;;  %vm1486_vm5 = vweird.f32 %v3729_v28  ;;  %vm1485_vm9 = vweird.f32 %v4907_v34  ;;  %v1533_v15 = vpop.permute.xlu1 %1532 }
 0x232   : > { %v1482_v38 = vsub.f32 1.0, %v1481_v10  ;;  %v1516_v1 = vadd.f32 %v1514_v44, %v1512_v20  ;;  %v1454_v57 = vadd.f32 %v4917_v46, %v1453_v2  ;;  %v1491_v2 = vand.u32 2147483648, %v4907_v34  ;;  %vm1487_vm10 = vmor %vm1485_vm9, %vm1486_vm5 }
 0x233   : > { %v3733_v12 = vpop.eup %3732  ;;  %v1469_v7 = vadd.f32 %v3725_v33, %v1468_v23  ;;  %vm1460_vm12 = vcmp.eq.f32.partialorder %v1459_v51, 8.507059e+37  ;;  %vm1490_vm13 = vcmp.eq.f32.partialorder %v1489_v5, 8.507059e+37  ;;  %vm1535_vm14 = vcmp.eq.s32.totalorder %v1533_v15, 1 }
 0x234   : > { %3734 = vtanh.f32 %v1516_v1  ;;  %v4957_v25 = vsel %vm1534_vm8, %v1516_v1, %v4819_v32  ;;  %v1496_v10 = vmul.f32 %v3733_v12, %v4923_v56  ;;  %v1483_v6 = vmul.f32 %v3729_v28, %v1482_v38 }
 0x235   : > { %v1473_v18 = vsel %vm1472_vm4, %v3725_v33, %v1469_v7  ;;  %v1458_v50 = vsel %vm4967_vm7, %v4917_v46, %v1454_v57  ;;  %v1462_v33 = vor.u32 1.1754944e-38, %v1461_v16  ;;  %v1492_v31 = vor.u32 1.1754944e-38, %v1491_v2  ;;  %v3930_v16 = vld [vmem:[%s5699_s1] sm:$0xff] }
 0x236   : > { %v1497_v32 = vsub.f32 1.0, %v1496_v10  ;;  %v1478_v44 = vsel %vm4945_vm2, %v1477_v43, %v1473_v18  ;;  %v1484_v19 = vadd.f32 %v3729_v28, %v1483_v6  ;;  %vm3429_vm15 = vcmp.gt.s32.totalorder %v3930_v16, 4  ;;  %v3931_v6 = vld [vmem:[%s5699_s1 + $0x8] sm:$0xff] }
 0x237   : > { %v1515_v29 = vmul.f32 %v3731_v53, %v1478_v44  ;;  %v1463_v38 = vsel %vm1460_vm12, %v1462_v33, %v1458_v50  ;;  %vm1501_vm0 = vweird.f32 %v3733_v12  ;;  %vm1500_vm1 = vweird.f32 %v4923_v56  ;;  %v5856_v33 = vld [vmem:[#allocation21_spill] sm:$0xff] }
 0x238   : > { %v1488_v20 = vsel %vm1487_vm10, %v3729_v28, %v1484_v19  ;;  %v1498_v1 = vmul.f32 %v3733_v12, %v1497_v32  ;;  %v1506_v28 = vand.u32 2147483648, %v4923_v56  ;;  %v1504_v57 = vand.u32 2147483647, %v4923_v56  ;;  %vm1502_vm2 = vmor %vm1500_vm1, %vm1501_vm0 }
 0x239   : > { %v1493_v39 = vsel %vm1490_vm13, %v1492_v31, %v1488_v20  ;;  %1760 = vperm.xlu2 %3673, %v1755_v21   ;;  %v2210_v7 = vsel %vm3429_vm15, 1, %v5834_v36  ;;  %vm3440_vm11 = vcmp.gt.s32.totalorder %v3931_v6, 5  ;;  %v5857_v31 = vld [vmem:[#allocation22_spill] sm:$0xff]  ;;  %v5858_v21 = vld [vmem:[#allocation23_spill] sm:$0xff] }
 0x23a   : > { %v3735_v23 = vpop.eup %3734  ;;  %v1513_v46 = vmul.f32 %v1493_v39, %v4825_v63  ;;  %v1499_v51 = vadd.f32 %v3733_v12, %v1498_v1  ;;  %v1507_v10 = vor.u32 1.1754944e-38, %v1506_v28  ;;  %vm1505_vm3 = vcmp.eq.f32.partialorder %v1504_v57, 8.507059e+37  ;;  %v5860_v20 = vld [vmem:[#allocation79_spill] sm:$0xff]  ;;  %v5862_v39 = vld [vmem:[#allocation80_spill] sm:$0xff]  ;;  %v5863_v1 = vld [vmem:[#allocation34_spill] sm:$0xff] }
 0x23b   : > { %v1520_v43 = vmul.f32 %v3735_v23, %v1463_v38  ;;  %v2439_v8 = vsel %vm3440_vm11, 1, %v5834_v36  ;;  %v5861_v23 = vld [vmem:[#allocation33_spill] sm:$0xff]  ;;  %v5864_v57 = vld [vmem:[#allocation83_spill] sm:$0xff] }
 0x23c   : > { %v1517_v34 = vadd.f32 %v1515_v29, %v1513_v46  ;;  %v1503_v5 = vsel %vm1502_vm2, %v3733_v12, %v1499_v51  ;;  %v5859_v29 = vld [vmem:[#allocation24_spill] sm:$0xff]  ;;  %v658_v38 = vadd.f32 %v5861_v23, %v5860_v20 }
 0x23d   : > { %v4993_v2 = vsel %vm1534_vm8, %v1520_v43, %v4832_v24  ;;  %vm3459_vm8 = vcmp.gt.s32.totalorder %v3930_v16, 7  ;;  %v707_v43 = vadd.f32 %v5863_v1, %v5862_v39 }
 0x23e   : > { %3736 = vtanh.f32 %v1517_v34  ;;  %v4985_v53 = vsel %vm1535_vm14, %v1517_v34, %v4825_v63  ;;  %v1508_v63 = vsel %vm1505_vm3, %v1507_v10, %v1503_v5  ;;  %v1540_v12 = vpack.c.bf16 %v4993_v2, %v4993_v2  ;;  %v5866_v10 = vld [vmem:[#allocation37_spill] sm:$0xff] }
 0x240   : > { %v1556_v44 = vunpack.c.l.b16 %v1540_v12 }
 0x241   : > { %2213 = vperm.xlu2 %3673, %v2210_v7   ;;  %v5865_v7 = vld [vmem:[#allocation35_spill] sm:$0xff] }
 0x242   : > { %v756_v5 = vadd.f32 %v5865_v7, %v5864_v57  ;;  %v5869_v7 = vld [vmem:[#allocation84_spill] sm:$0xff] }
 0x244   : > { %v3737_v18 = vpop.eup %3736 }
 0x245   : > { %v1521_v56 = vmul.f32 %v3737_v18, %v1508_v63  ;;  %v660_v18 = vadd.f32 %v5866_v10, %v5860_v20  ;;  %v5867_v63 = vld [vmem:[#allocation38_spill] sm:$0xff] }
 0x246   : > { %v709_v6 = vadd.f32 %v5867_v63, %v5862_v39 }
 0x247   : > { %v5002_v11 = vsel %vm1535_vm14, %v1521_v56, %v4838_v58  ;;  %v2894_v58 = vsel %vm3459_vm8, 1, %v5834_v36  ;;  %v5855_v36 = vld [vmem:[#allocation20_spill] sm:$0xff] }
 0x248   : > { %v1541_v24 = vpack.c.bf16 %v5002_v11, %v5002_v11  ;;  %v3552_v32 = vpack.c.bf16 %v5002_v11, %v4993_v2 }
 0x249   : > { %2444 = vperm.xlu2 %3673, %v2439_v8  }
 0x24a   : > { %3584 = vst [vmem:[%s4846_s13 + $0x8] sm:$0xff] %v3552_v32   ;;  %v1557_v50 = vunpack.c.l.b16 %v1541_v24 }
 0x24c   : > { %v1558_v19 = vpack.c.b16 %v1557_v50, %v1556_v44 }
 0x24e   : > { %1568 = vmatmul.bf16.vlgmr.msrb.gmra.mxu0 %v1558_v19  ;;  %1582 = vmatmul.bf16.vlgmr.msrb.gmra.mxu1 %v1558_v19 }
 0x24f   : > { %1596 = vmatmul.bf16.vlgmr.msrb.gmra.mxu2 %v1558_v19  ;;  %1610 = vmatmul.bf16.vlgmr.msrb.gmra.mxu3 %v1558_v19 }
 0x250   : > { %2016 = vmatpush.bf16.msrb.mxu0 %v4354_v37  ;;  %2030 = vmatpush.bf16.msrb.mxu1 %v4359_v41 }
 0x251   : > { %2044 = vmatpush.bf16.msrb.mxu2 %v4366_v47  ;;  %2058 = vmatpush.bf16.msrb.mxu3 %v4369_v48 }
 0x252   : > { %2897 = vperm.xlu2 %3673, %v2894_v58  }
 0x254   : > { %2017 = vmatpush.bf16.msrb.mxu0 %v4371_v49  ;;  %2031 = vmatpush.bf16.msrb.mxu1 %v4376_v52 }
 0x255   : > { %2045 = vmatpush.bf16.msrb.mxu2 %v4381_v55  ;;  %2059 = vmatpush.bf16.msrb.mxu3 %v4388_v59 }
 0x258   : > { %2018 = vmatpush.bf16.msrb.mxu0 %v4390_v60  ;;  %2032 = vmatpush.bf16.msrb.mxu1 %v4396_v0 }
 0x259   : > { %2046 = vmatpush.bf16.msrb.mxu2 %v4401_v3  ;;  %2060 = vmatpush.bf16.msrb.mxu3 %v4405_v4 }
 0x25c   : > { %2019 = vmatpush.bf16.msrb.mxu0 %v4414_v9  ;;  %2033 = vmatpush.bf16.msrb.mxu1 %v4419_v13 }
 0x25d   : > { %2047 = vmatpush.bf16.msrb.mxu2 %v4421_v14  ;;  %2061 = vmatpush.bf16.msrb.mxu3 %v4426_v17 }
 0x260   : > { %2020 = vmatpush.bf16.msrb.mxu0 %v4435_v22  ;;  %2034 = vmatpush.bf16.msrb.mxu1 %v4440_v26 }
 0x261   : > { %2048 = vmatpush.bf16.msrb.mxu2 %v4442_v27  ;;  %2062 = vmatpush.bf16.msrb.mxu3 %v4447_v30 }
 0x264   : > { %2021 = vmatpush.bf16.msrb.mxu0 %v4456_v35  ;;  %2035 = vmatpush.bf16.msrb.mxu1 %v4461_v40 }
 0x265   : > { %2049 = vmatpush.bf16.msrb.mxu2 %v4463_v42  ;;  %2063 = vmatpush.bf16.msrb.mxu3 %v4468_v45 }
 0x268   : > { %2022 = vmatpush.bf16.msrb.mxu0 %v4477_v54  ;;  %2036 = vmatpush.bf16.msrb.mxu1 %v4482_v61 }
 0x269   : > { %2050 = vmatpush.bf16.msrb.mxu2 %v4484_v62  ;;  %2064 = vmatpush.bf16.msrb.mxu3 %v5855_v36 }
 0x26c   : > { %2023 = vmatpush.bf16.msrb.mxu0 %v5856_v33  ;;  %2037 = vmatpush.bf16.msrb.mxu1 %v5857_v31 }
 0x26d   : > { %2051 = vmatpush.bf16.msrb.mxu2 %v5858_v21  ;;  %2065 = vmatpush.bf16.msrb.mxu3 %v5859_v29 }
 0x2cb   : > { %v1569_v15 = vpop.f32.mrf.mxu0  ;;  %v1583_v46 = vpop.f32.mrf.mxu1 }
 0x2cc   : > { %v1616_v34 = vadd.f32 %v1569_v15, %v658_v38  ;;  %v1617_v16 = vadd.f32 %v1583_v46, %v707_v43  ;;  %v5868_v46 = vld [vmem:[#allocation39_spill] sm:$0xff] }
 0x2ce   : > { %v3403_v51 = vmul.f32 -1.442695, %v1616_v34  ;;  %v3404_v28 = vmul.f32 -1.442695, %v1617_v16  ;;  %v758_v34 = vadd.f32 %v5868_v46, %v5864_v57 }
 0x2d0   : > { %3738 = vpow2.f32 %v3403_v51 }
 0x2d1   : > { %3740 = vpow2.f32 %v3404_v28 }
 0x2d2   : > { %v1597_v56 = vpop.f32.mrf.mxu2  ;;  %v1611_v58 = vpop.f32.mrf.mxu3 }
 0x2d3   : > { %v1618_v12 = vadd.f32 %v1597_v56, %v756_v5  ;;  %v1571_v8 = vpop.f32.mrf.mxu0  ;;  %v1585_v24 = vpop.f32.mrf.mxu1  ;;  %v5870_v5 = vld [vmem:[#allocation36_spill] sm:$0xff] }
 0x2d4   : > { %v1620_v32 = vadd.f32 %v1571_v8, %v660_v18  ;;  %v1621_v44 = vadd.f32 %v1585_v24, %v709_v6  ;;  %v805_v10 = vadd.f32 %v5870_v5, %v5869_v7 }
 0x2d5   : > { %v3405_v50 = vmul.f32 -1.442695, %v1618_v12 }
 0x2d6   : > { %v3739_v19 = vpop.eup %3738  ;;  %v3406_v23 = vmul.f32 -1.442695, %v1620_v32  ;;  %v3407_v43 = vmul.f32 -1.442695, %v1621_v44  ;;  %v1619_v12 = vadd.f32 %v1611_v58, %v805_v10 }
 0x2d7   : > { %v3741_v38 = vpop.eup %3740  ;;  %v1642_v1 = vadd.f32 1.0, %v3739_v19  ;;  %3742 = vpow2.f32 %v3405_v50  ;;  %v5871_v19 = vld [vmem:[#allocation40_spill] sm:$0xff] }
 0x2d8   : > { %v1643_v15 = vadd.f32 1.0, %v3741_v38  ;;  %3744 = vpow2.f32 %v3406_v23  ;;  %v807_v23 = vadd.f32 %v5871_v19, %v5869_v7 }
 0x2d9   : > { %3746 = vrcp.f32 %v1642_v1  ;;  %v1657_v46 = vand.u32 2147483647, %v1642_v1  ;;  %vm1653_vm6 = vweird.f32 %v1642_v1 }
 0x2da   : > { %3748 = vrcp.f32 %v1643_v15  ;;  %v1599_v16 = vpop.f32.mrf.mxu2  ;;  %v1613_v44 = vpop.f32.mrf.mxu3  ;;  %vm1668_vm7 = vweird.f32 %v1643_v15 }
 0x2db   : > { %3750 = vpow2.f32 %v3407_v43  ;;  %v1622_v51 = vadd.f32 %v1599_v16, %v758_v34  ;;  %v1659_v34 = vand.u32 2147483648, %v1642_v1  ;;  %v1623_v5 = vadd.f32 %v1613_v44, %v807_v23 }
 0x2dc   : > { %vm5073_vm10 = vcmp.eq.f32.partialorder %v1657_v46, 8.507059e+37 }
 0x2dd   : > { %v3743_v28 = vpop.eup %3742  ;;  %v3408_v18 = vmul.f32 -1.442695, %v1622_v51  ;;  %v5067_v51 = vpop.permute.xlu2 %1757  ;;  %v1660_v44 = vor.u32 1.1754944e-38, %v1659_v34 }
 0x2de   : > { %v3745_v63 = vpop.eup %3744  ;;  %v5057_v6 = vadd.f32 1.0, %v3743_v28  ;;  %v1672_v28 = vand.u32 2147483647, %v1643_v15  ;;  %vm1762_vm5 = vcmp.eq.s32.totalorder %v5067_v51, 1 }
 0x2df   : > { %v3747_v56 = vpop.eup %3746  ;;  %v5059_v8 = vadd.f32 1.0, %v3745_v63  ;;  %3752 = vpow2.f32 %v3408_v18  ;;  %v1674_v18 = vand.u32 2147483648, %v1643_v15 }
 0x2e0   : > { %v3749_v24 = vpop.eup %3748  ;;  %v1649_v32 = vmul.f32 %v3747_v56, %v1642_v1  ;;  %3754 = vrcp.f32 %v5057_v6  ;;  %vm1654_vm4 = vweird.f32 %v3747_v56  ;;  %vm1673_vm13 = vcmp.eq.f32.partialorder %v1672_v28, 8.507059e+37 }
 0x2e1   : > { %v3751_v50 = vpop.eup %3750  ;;  %v1664_v38 = vmul.f32 %v3749_v24, %v1643_v15  ;;  %3756 = vrcp.f32 %v5059_v8  ;;  %vm1669_vm9 = vweird.f32 %v3749_v24  ;;  %vm1655_vm12 = vmor %vm1653_vm6, %vm1654_vm4  ;;  %v1675_v46 = vor.u32 1.1754944e-38, %v1674_v18 }
 0x2e2   : > { %v1650_v43 = vsub.f32 1.0, %v1649_v32  ;;  %v5065_v16 = vadd.f32 1.0, %v3751_v50  ;;  %3758 = vtanh.f32 %v1619_v12  ;;  %vm1670_vm14 = vmor %vm1668_vm7, %vm1669_vm9  ;;  %v1704_v39 = vand.u32 2147483648, %v5059_v8 }
 0x2e3   : > { %v1665_v58 = vsub.f32 1.0, %v1664_v38  ;;  %vm1683_vm15 = vweird.f32 %v5057_v6  ;;  %v1689_v18 = vand.u32 2147483648, %v5057_v6  ;;  %vm1698_vm0 = vweird.f32 %v5059_v8 }
 0x2e4   : > { %v1651_v10 = vmul.f32 %v3747_v56, %v1650_v43  ;;  %3760 = vrcp.f32 %v5065_v16  ;;  %vm1713_vm6 = vweird.f32 %v5065_v16 }
 0x2e5   : > { %v3753_v63 = vpop.eup %3752  ;;  %v1666_v19 = vmul.f32 %v3749_v24, %v1665_v58  ;;  %3762 = vtanh.f32 %v1623_v5 }
 0x2e6   : > { %v5071_v32 = vpop.eup %3754  ;;  %v1652_v50 = vadd.f32 %v3747_v56, %v1651_v10  ;;  %v5077_v23 = vadd.f32 1.0, %v3753_v63 }
 0x2e7   : > { %v3757_v38 = vpop.eup %3756  ;;  %v1679_v43 = vmul.f32 %v5071_v32, %v5057_v6  ;;  %v1667_v58 = vadd.f32 %v3749_v24, %v1666_v19  ;;  %vm1684_vm2 = vweird.f32 %v5071_v32 }
 0x2e8   : > { %v1656_v1 = vsel %vm1655_vm12, %v3747_v56, %v1652_v50  ;;  %v1694_v7 = vmul.f32 %v3757_v38, %v5059_v8  ;;  %3764 = vrcp.f32 %v5077_v23  ;;  %v3759_v34 = vpop.eup %3758  ;;  %vm1699_vm1 = vweird.f32 %v3757_v38  ;;  %vm5111_vm4 = vmor %vm1683_vm15, %vm1684_vm2 }
 0x2e9   : > { %v1680_v10 = vsub.f32 1.0, %v1679_v43  ;;  %v1661_v63 = vsel %vm5073_vm10, %v1660_v44, %v1656_v1  ;;  %v1671_v57 = vsel %vm1670_vm14, %v3749_v24, %v1667_v58  ;;  %v1702_v24 = vand.u32 2147483647, %v5059_v8  ;;  %vm1700_vm3 = vmor %vm1698_vm0, %vm1699_vm1 }
 0x2ea   : > { %v3761_v20 = vpop.eup %3760  ;;  %v1742_v19 = vmul.f32 %v3759_v34, %v1661_v63  ;;  %v1695_v28 = vsub.f32 1.0, %v1694_v7  ;;  %v1676_v5 = vsel %vm1673_vm13, %v1675_v46, %v1671_v57  ;;  %v1705_v57 = vor.u32 1.1754944e-38, %v1704_v39 }
 0x2eb   : > { %v1709_v15 = vmul.f32 %v3761_v20, %v5065_v16  ;;  %v1681_v56 = vmul.f32 %v5071_v32, %v1680_v10  ;;  %v1740_v50 = vmul.f32 %v1676_v5, %v4957_v25  ;;  %v3763_v12 = vpop.eup %3762  ;;  %v1717_v58 = vand.u32 2147483647, %v5065_v16 }
 0x2ec   : > { %v1696_v43 = vmul.f32 %v3757_v38, %v1695_v28  ;;  %v1719_v10 = vand.u32 2147483648, %v5065_v16  ;;  %vm1714_vm11 = vweird.f32 %v3761_v20  ;;  %v1687_v39 = vand.u32 2147483647, %v5057_v6 }
 0x2ed   : > { %v1710_v44 = vsub.f32 1.0, %v1709_v15  ;;  %v1744_v7 = vadd.f32 %v1742_v19, %v1740_v50  ;;  %v1682_v46 = vadd.f32 %v5071_v32, %v1681_v56  ;;  %vm1703_vm8 = vcmp.eq.f32.partialorder %v1702_v24, 8.507059e+37  ;;  %vm1715_vm7 = vmor %vm1713_vm6, %vm1714_vm11 }
 0x2ee   : > { %v3765_v1 = vpop.eup %3764  ;;  %v1697_v34 = vadd.f32 %v3757_v38, %v1696_v43  ;;  %v1720_v43 = vor.u32 1.1754944e-38, %v1719_v10  ;;  %vm1718_vm9 = vcmp.eq.f32.partialorder %v1717_v58, 8.507059e+37  ;;  %vm1688_vm10 = vcmp.eq.f32.partialorder %v1687_v39, 8.507059e+37 }
 0x2ef   : > { %v1711_v63 = vmul.f32 %v3761_v20, %v1710_v44  ;;  %3766 = vtanh.f32 %v1744_v7  ;;  %v5102_v28 = vsel %vm1762_vm5, %v1744_v7, %v4957_v25  ;;  %v1724_v19 = vmul.f32 %v3765_v1, %v5077_v23 }
 0x2f0   : > { %5874 = vst [vmem:[#allocation25_spill] sm:$0xff] %v5102_v28  ;;  %v1701_v5 = vsel %vm1700_vm3, %v3757_v38, %v1697_v34  ;;  %v1686_v8 = vsel %vm5111_vm4, %v5071_v32, %v1682_v46  ;;  %v1690_v44 = vor.u32 1.1754944e-38, %v1689_v18  ;;  %vm1729_vm13 = vweird.f32 %v3765_v1 }
 0x2f1   : > { %v1706_v56 = vsel %vm1703_vm8, %v1705_v57, %v1701_v5  ;;  %v1712_v25 = vadd.f32 %v3761_v20, %v1711_v63  ;;  %v1725_v50 = vsub.f32 1.0, %v1724_v19  ;;  %v1761_v57 = vpop.permute.xlu2 %1760  ;;  %v1734_v32 = vand.u32 2147483648, %v5077_v23 }
 0x2f2   : > { %v1743_v38 = vmul.f32 %v3763_v12, %v1706_v56  ;;  %v1691_v28 = vsel %vm1688_vm10, %v1690_v44, %v1686_v8  ;;  %vm1763_vm12 = vcmp.eq.s32.totalorder %v1761_v57, 1  ;;  %vm1728_vm14 = vweird.f32 %v5077_v23 }
 0x2f3   : > { %v1716_v24 = vsel %vm1715_vm7, %v3761_v20, %v1712_v25  ;;  %v1726_v7 = vmul.f32 %v3765_v1, %v1725_v50  ;;  %v1732_v18 = vand.u32 2147483647, %v5077_v23  ;;  %vm1730_vm15 = vmor %vm1728_vm14, %vm1729_vm13  ;;  %v1735_v58 = vor.u32 1.1754944e-38, %v1734_v32  ;;  %v5878_v25 = vld [vmem:[#allocation41_spill] sm:$0xff]  ;;  %v5879_v50 = vld [vmem:[#allocation80_spill] sm:$0xff] }
 0x2f4   : > { %v1721_v6 = vsel %vm1718_vm9, %v1720_v43, %v1716_v24  ;;  %v5880_v43 = vld [vmem:[#allocation42_spill] sm:$0xff] }
 0x2f5   : > { %v3767_v34 = vpop.eup %3766  ;;  %v1741_v63 = vmul.f32 %v1721_v6, %v4985_v53  ;;  %v1727_v15 = vadd.f32 %v3765_v1, %v1726_v7  ;;  %vm1733_vm0 = vcmp.eq.f32.partialorder %v1732_v18, 8.507059e+37  ;;  %v712_v44 = vadd.f32 %v5880_v43, %v5879_v50  ;;  %v5884_v18 = vld [vmem:[#allocation46_spill] sm:$0xff] }
 0x2f6   : > { %v1748_v16 = vmul.f32 %v3767_v34, %v1691_v28 }
 0x2f7   : > { %v1745_v5 = vadd.f32 %v1743_v38, %v1741_v63  ;;  %v1731_v12 = vsel %vm1730_vm15, %v3765_v1, %v1727_v15  ;;  %v5881_v63 = vld [vmem:[#allocation83_spill] sm:$0xff]  ;;  %v5883_v15 = vld [vmem:[#allocation45_spill] sm:$0xff] }
 0x2f8   : > { %v5130_v46 = vsel %vm1762_vm5, %v1748_v16, %v4993_v2  ;;  %v1736_v28 = vsel %vm1733_vm0, %v1735_v58, %v1731_v12  ;;  %v5882_v16 = vld [vmem:[#allocation43_spill] sm:$0xff]  ;;  %v714_v12 = vadd.f32 %v5884_v18, %v5879_v50 }
 0x2f9   : > { %3768 = vtanh.f32 %v1745_v5  ;;  %v5123_v20 = vsel %vm1763_vm12, %v1745_v5, %v4985_v53  ;;  %v1768_v53 = vpack.c.bf16 %v5130_v46, %v5130_v46  ;;  %v761_v5 = vadd.f32 %v5882_v16, %v5881_v63 }
 0x2fb   : > { %v1784_v51 = vunpack.c.l.b16 %v1768_v53 }
 0x2ff   : > { %v3769_v10 = vpop.eup %3768 }
 0x300   : > { %v1749_v39 = vmul.f32 %v3769_v10, %v1736_v28 }
 0x302   : > { %v5136_v19 = vsel %vm1763_vm12, %v1749_v39, %v5002_v11  ;;  %v5877_v11 = vld [vmem:[#allocation79_spill] sm:$0xff] }
 0x303   : > { %v1769_v23 = vpack.c.bf16 %v5136_v19, %v5136_v19  ;;  %v3557_v1 = vpack.c.bf16 %v5136_v19, %v5130_v46  ;;  %v663_v8 = vadd.f32 %v5878_v25, %v5877_v11  ;;  %v665_v32 = vadd.f32 %v5883_v15, %v5877_v11 }
 0x305   : > { %3585 = vst [vmem:[%s4846_s13 + $0x10] sm:$0xff] %v3557_v1   ;;  %v1785_v2 = vunpack.c.l.b16 %v1769_v23 }
 0x307   : > { %v1786_v56 = vpack.c.b16 %v1785_v2, %v1784_v51 }
 0x309   : > { %1796 = vmatmul.bf16.vlgmr.msra.gmra.mxu0 %v1786_v56  ;;  %1810 = vmatmul.bf16.vlgmr.msra.gmra.mxu1 %v1786_v56 }
 0x30a   : > { %1824 = vmatmul.bf16.vlgmr.msra.gmra.mxu2 %v1786_v56  ;;  %1838 = vmatmul.bf16.vlgmr.msra.gmra.mxu3 %v1786_v56 }
 0x30b   : > { %2244 = vmatpush.bf16.msra.mxu0 %v4354_v37  ;;  %2258 = vmatpush.bf16.msra.mxu1 %v4359_v41 }
 0x30c   : > { %2272 = vmatpush.bf16.msra.mxu2 %v4366_v47  ;;  %2286 = vmatpush.bf16.msra.mxu3 %v4369_v48 }
 0x30f   : > { %2245 = vmatpush.bf16.msra.mxu0 %v4371_v49  ;;  %2259 = vmatpush.bf16.msra.mxu1 %v4376_v52 }
 0x310   : > { %2273 = vmatpush.bf16.msra.mxu2 %v4381_v55  ;;  %2287 = vmatpush.bf16.msra.mxu3 %v4388_v59 }
 0x313   : > { %2246 = vmatpush.bf16.msra.mxu0 %v4390_v60  ;;  %2260 = vmatpush.bf16.msra.mxu1 %v4396_v0 }
 0x314   : > { %2274 = vmatpush.bf16.msra.mxu2 %v4401_v3  ;;  %2288 = vmatpush.bf16.msra.mxu3 %v4405_v4 }
 0x317   : > { %2247 = vmatpush.bf16.msra.mxu0 %v4414_v9  ;;  %2261 = vmatpush.bf16.msra.mxu1 %v4419_v13 }
 0x318   : > { %2275 = vmatpush.bf16.msra.mxu2 %v4421_v14  ;;  %2289 = vmatpush.bf16.msra.mxu3 %v4426_v17 }
 0x31b   : > { %2248 = vmatpush.bf16.msra.mxu0 %v4435_v22  ;;  %2262 = vmatpush.bf16.msra.mxu1 %v4440_v26 }
 0x31c   : > { %2276 = vmatpush.bf16.msra.mxu2 %v4442_v27  ;;  %2290 = vmatpush.bf16.msra.mxu3 %v4447_v30 }
 0x31f   : > { %2249 = vmatpush.bf16.msra.mxu0 %v4456_v35  ;;  %2263 = vmatpush.bf16.msra.mxu1 %v4461_v40 }
 0x320   : > { %2277 = vmatpush.bf16.msra.mxu2 %v4463_v42  ;;  %2291 = vmatpush.bf16.msra.mxu3 %v4468_v45 }
 0x323   : > { %2250 = vmatpush.bf16.msra.mxu0 %v4477_v54  ;;  %2264 = vmatpush.bf16.msra.mxu1 %v4482_v61 }
 0x324   : > { %2278 = vmatpush.bf16.msra.mxu2 %v4484_v62  ;;  %2292 = vmatpush.bf16.msra.mxu3 %v5855_v36 }
 0x327   : > { %2251 = vmatpush.bf16.msra.mxu0 %v5856_v33  ;;  %2265 = vmatpush.bf16.msra.mxu1 %v5857_v31  ;;  %v1989_v31 = vpop.permute.xlu1 %1988 }
 0x328   : > { %2279 = vmatpush.bf16.msra.mxu2 %v5858_v21  ;;  %2293 = vmatpush.bf16.msra.mxu3 %v5859_v29 }
 0x386   : > { %v1797_v38 = vpop.f32.mrf.mxu0  ;;  %v1811_v24 = vpop.f32.mrf.mxu1 }
 0x387   : > { %v1844_v6 = vadd.f32 %v1797_v38, %v663_v8  ;;  %v1845_v7 = vadd.f32 %v1811_v24, %v712_v44  ;;  %v5885_v44 = vld [vmem:[#allocation47_spill] sm:$0xff] }
 0x388   : > { %v763_v38 = vadd.f32 %v5885_v44, %v5881_v63 }
 0x389   : > { %v3413_v34 = vmul.f32 -1.442695, %v1844_v6  ;;  %v3414_v57 = vmul.f32 -1.442695, %v1845_v7  ;;  %v5886_v7 = vld [vmem:[#allocation84_spill] sm:$0xff] }
 0x38b   : > { %3770 = vpow2.f32 %v3413_v34  ;;  %v5887_v34 = vld [vmem:[#allocation44_spill] sm:$0xff] }
 0x38c   : > { %3772 = vpow2.f32 %v3414_v57  ;;  %v810_v57 = vadd.f32 %v5887_v34, %v5886_v7 }
 0x38d   : > { %v1825_v58 = vpop.f32.mrf.mxu2  ;;  %v1839_v24 = vpop.f32.mrf.mxu3 }
 0x38e   : > { %v1846_v10 = vadd.f32 %v1825_v58, %v761_v5  ;;  %v1799_v28 = vpop.f32.mrf.mxu0  ;;  %v1813_v39 = vpop.f32.mrf.mxu1  ;;  %v1847_v15 = vadd.f32 %v1839_v24, %v810_v57 }
 0x38f   : > { %v1848_v53 = vadd.f32 %v1799_v28, %v665_v32  ;;  %v1849_v23 = vadd.f32 %v1813_v39, %v714_v12 }
 0x390   : > { %v3415_v1 = vmul.f32 -1.442695, %v1846_v10 }
 0x391   : > { %v3771_v51 = vpop.eup %3770  ;;  %v3416_v2 = vmul.f32 -1.442695, %v1848_v53  ;;  %v3417_v8 = vmul.f32 -1.442695, %v1849_v23 }
 0x392   : > { %v3773_v56 = vpop.eup %3772  ;;  %v1870_v25 = vadd.f32 1.0, %v3771_v51  ;;  %3774 = vpow2.f32 %v3415_v1  ;;  %v5888_v1 = vld [vmem:[#allocation48_spill] sm:$0xff] }
 0x393   : > { %v1871_v43 = vadd.f32 1.0, %v3773_v56  ;;  %3776 = vpow2.f32 %v3416_v2  ;;  %v812_v51 = vadd.f32 %v5888_v1, %v5886_v7 }
 0x394   : > { %3778 = vrcp.f32 %v1870_v25  ;;  %v1887_v24 = vand.u32 2147483648, %v1870_v25  ;;  %vm1881_vm2 = vweird.f32 %v1870_v25 }
 0x395   : > { %3780 = vrcp.f32 %v1871_v43  ;;  %v1827_v6 = vpop.f32.mrf.mxu2  ;;  %v1902_v44 = vand.u32 2147483648, %v1871_v43  ;;  %v1900_v57 = vand.u32 2147483647, %v1871_v43  ;;  %vm1896_vm3 = vweird.f32 %v1871_v43 }
 0x396   : > { %3782 = vpow2.f32 %v3417_v8  ;;  %v1850_v16 = vadd.f32 %v1827_v6, %v763_v38  ;;  %v1885_v38 = vand.u32 2147483647, %v1870_v25  ;;  %v1841_v6 = vpop.f32.mrf.mxu3  ;;  %v1888_v1 = vor.u32 1.1754944e-38, %v1887_v24 }
 0x397   : > { %vm1901_vm6 = vcmp.eq.f32.partialorder %v1900_v57, 8.507059e+37 }
 0x398   : > { %v3775_v5 = vpop.eup %3774  ;;  %v3418_v32 = vmul.f32 -1.442695, %v1850_v16  ;;  %vm1886_vm8 = vcmp.eq.f32.partialorder %v1885_v38, 8.507059e+37 }
 0x399   : > { %v3777_v18 = vpop.eup %3776  ;;  %v5189_v12 = vadd.f32 1.0, %v3775_v5 }
 0x39a   : > { %v3779_v58 = vpop.eup %3778  ;;  %v5191_v10 = vadd.f32 1.0, %v3777_v18  ;;  %3784 = vpow2.f32 %v3418_v32 }
 0x39b   : > { %v3781_v28 = vpop.eup %3780  ;;  %v1877_v39 = vmul.f32 %v3779_v58, %v1870_v25  ;;  %3786 = vrcp.f32 %v5189_v12  ;;  %vm1882_vm5 = vweird.f32 %v3779_v58  ;;  %v5207_v25 = vpop.permute.xlu0 %1985  ;;  %vm1911_vm9 = vweird.f32 %v5189_v12 }
 0x39c   : > { %v3783_v53 = vpop.eup %3782  ;;  %v1892_v23 = vmul.f32 %v3781_v28, %v1871_v43  ;;  %3788 = vtanh.f32 %v1847_v15  ;;  %vm1897_vm1 = vweird.f32 %v3781_v28  ;;  %vm1883_vm11 = vmor %vm1881_vm2, %vm1882_vm5  ;;  %vm1990_vm7 = vcmp.eq.s32.totalorder %v5207_v25, 1 }
 0x39d   : > { %v1878_v2 = vsub.f32 1.0, %v1877_v39  ;;  %3790 = vrcp.f32 %v5191_v10  ;;  %v5197_v56 = vadd.f32 1.0, %v3783_v53  ;;  %v1851_v39 = vadd.f32 %v1841_v6, %v812_v51  ;;  %vm1898_vm4 = vmor %vm1896_vm3, %vm1897_vm1 }
 0x39e   : > { %v1893_v8 = vsub.f32 1.0, %v1892_v23  ;;  %vm1926_vm15 = vweird.f32 %v5191_v10 }
 0x39f   : > { %v1879_v34 = vmul.f32 %v3779_v58, %v1878_v2  ;;  %3792 = vrcp.f32 %v5197_v56  ;;  %vm1941_vm0 = vweird.f32 %v5197_v56 }
 0x3a0   : > { %v3785_v16 = vpop.eup %3784  ;;  %v1894_v5 = vmul.f32 %v3781_v28, %v1893_v8  ;;  %v1903_v8 = vor.u32 1.1754944e-38, %v1902_v44  ;;  %v5889_v44 = vld [vmem:[#allocation25_spill] sm:$0xff] }
 0x3a1   : > { %v5200_v15 = vpop.eup %3786  ;;  %v1880_v32 = vadd.f32 %v3779_v58, %v1879_v34  ;;  %v5202_v18 = vadd.f32 1.0, %v3785_v16 }
 0x3a2   : > { %v3789_v53 = vpop.eup %3788  ;;  %v1907_v23 = vmul.f32 %v5200_v15, %v5189_v12  ;;  %v1895_v2 = vadd.f32 %v3781_v28, %v1894_v5  ;;  %vm1912_vm10 = vweird.f32 %v5200_v15 }
 0x3a3   : > { %v3791_v7 = vpop.eup %3790  ;;  %v1884_v63 = vsel %vm1883_vm11, %v3779_v58, %v1880_v32  ;;  %3794 = vrcp.f32 %v5202_v18  ;;  %vm5225_vm14 = vmor %vm1911_vm9, %vm1912_vm10 }
 0x3a4   : > { %v1908_v43 = vsub.f32 1.0, %v1907_v23  ;;  %v1889_v34 = vsel %vm1886_vm8, %v1888_v1, %v1884_v63  ;;  %v1899_v51 = vsel %vm1898_vm4, %v3781_v28, %v1895_v2  ;;  %v1922_v6 = vmul.f32 %v3791_v7, %v5191_v10 }
 0x3a5   : > { %v3793_v16 = vpop.eup %3792  ;;  %v1904_v38 = vsel %vm1901_vm6, %v1903_v8, %v1899_v51  ;;  %v1970_v24 = vmul.f32 %v3789_v53, %v1889_v34  ;;  %3796 = vtanh.f32 %v1851_v39  ;;  %v1917_v63 = vand.u32 2147483648, %v5189_v12 }
 0x3a6   : > { %v1909_v5 = vmul.f32 %v5200_v15, %v1908_v43  ;;  %v1968_v58 = vmul.f32 %v1904_v38, %v5889_v44  ;;  %v1923_v57 = vsub.f32 1.0, %v1922_v6  ;;  %v1937_v32 = vmul.f32 %v3793_v16, %v5197_v56 }
 0x3a7   : > { %v1930_v28 = vand.u32 2147483647, %v5191_v10  ;;  %v1932_v23 = vand.u32 2147483648, %v5191_v10  ;;  %v1947_v43 = vand.u32 2147483648, %v5197_v56  ;;  %vm1927_vm12 = vweird.f32 %v3791_v7 }
 0x3a8   : > { %v1972_v1 = vadd.f32 %v1970_v24, %v1968_v58  ;;  %v1938_v53 = vsub.f32 1.0, %v1937_v32  ;;  %v1924_v39 = vmul.f32 %v3791_v7, %v1923_v57  ;;  %v1910_v8 = vadd.f32 %v5200_v15, %v1909_v5  ;;  %vm1928_vm5 = vmor %vm1926_vm15, %vm1927_vm12 }
 0x3a9   : > { %v3795_v2 = vpop.eup %3794  ;;  %v1945_v34 = vand.u32 2147483647, %v5197_v56  ;;  %vm1942_vm13 = vweird.f32 %v3793_v16  ;;  %v1915_v58 = vand.u32 2147483647, %v5189_v12  ;;  %v1948_v12 = vor.u32 1.1754944e-38, %v1947_v43 }
 0x3aa   : > { %3798 = vtanh.f32 %v1972_v1  ;;  %v1939_v51 = vmul.f32 %v3793_v16, %v1938_v53  ;;  %v1952_v6 = vmul.f32 %v3795_v2, %v5202_v18  ;;  %v1925_v5 = vadd.f32 %v3791_v7, %v1924_v39  ;;  %vm1943_vm1 = vmor %vm1941_vm0, %vm1942_vm13 }
 0x3ab   : > { %v3797_v38 = vpop.eup %3796  ;;  %v5234_v57 = vsel %vm1990_vm7, %v1972_v1, %v5889_v44  ;;  %v1933_v53 = vor.u32 1.1754944e-38, %v1932_v23  ;;  %v1914_v11 = vsel %vm5225_vm14, %v5200_v15, %v1910_v8  ;;  %vm1931_vm2 = vcmp.eq.f32.partialorder %v1930_v28, 8.507059e+37 }
 0x3ac   : > { %5892 = vst [vmem:[#allocation26_spill] sm:$0xff] %v5234_v57  ;;  %v1953_v32 = vsub.f32 1.0, %v1952_v6  ;;  %v1940_v50 = vadd.f32 %v3793_v16, %v1939_v51  ;;  %v1929_v39 = vsel %vm1928_vm5, %v3791_v7, %v1925_v5  ;;  %v1918_v10 = vor.u32 1.1754944e-38, %v1917_v63  ;;  %v5897_v5 = vld [vmem:[#allocation49_spill] sm:$0xff] }
 0x3ad   : > { %v1934_v29 = vsel %vm1931_vm2, %v1933_v53, %v1929_v39  ;;  %vm1946_vm3 = vcmp.eq.f32.partialorder %v1945_v34, 8.507059e+37  ;;  %vm1916_vm11 = vcmp.eq.f32.partialorder %v1915_v58, 8.507059e+37  ;;  %vm1991_vm8 = vcmp.eq.s32.totalorder %v1989_v31, 1  ;;  %v5893_v31 = vld [vmem:[#allocation22_spill] sm:$0xff]  ;;  %v5896_v58 = vld [vmem:[#allocation79_spill] sm:$0xff] }
 0x3ae   : > { %v1944_v21 = vsel %vm1943_vm1, %v3793_v16, %v1940_v50  ;;  %v1954_v44 = vmul.f32 %v3795_v2, %v1953_v32  ;;  %v1971_v56 = vmul.f32 %v3797_v38, %v1934_v29  ;;  %v1919_v57 = vsel %vm1916_vm11, %v1918_v10, %v1914_v11  ;;  %v5895_v38 = vld [vmem:[#allocation24_spill] sm:$0xff]  ;;  %v5899_v53 = vld [vmem:[#allocation50_spill] sm:$0xff] }
 0x3af   : > { %v1949_v1 = vsel %vm1946_vm3, %v1948_v12, %v1944_v21  ;;  %vm1957_vm4 = vweird.f32 %v3795_v2  ;;  %v1962_v7 = vand.u32 2147483648, %v5202_v18  ;;  %vm1956_vm6 = vweird.f32 %v5202_v18  ;;  %v5898_v32 = vld [vmem:[#allocation80_spill] sm:$0xff] }
 0x3b0   : > { %v3799_v6 = vpop.eup %3798  ;;  %v1969_v23 = vmul.f32 %v1949_v1, %v5123_v20  ;;  %v1955_v15 = vadd.f32 %v3795_v2, %v1954_v44  ;;  %v1960_v21 = vand.u32 2147483647, %v5202_v18  ;;  %vm1958_vm9 = vmor %vm1956_vm6, %vm1957_vm4  ;;  %v717_v12 = vadd.f32 %v5899_v53, %v5898_v32 }
 0x3b1   : > { %v1976_v51 = vmul.f32 %v3799_v6, %v1919_v57  ;;  %v1963_v11 = vor.u32 1.1754944e-38, %v1962_v7  ;;  %v668_v57 = vadd.f32 %v5897_v5, %v5896_v58 }
 0x3b2   : > { %v1973_v24 = vadd.f32 %v1971_v56, %v1969_v23  ;;  %v1959_v29 = vsel %vm1958_vm9, %v3795_v2, %v1955_v15  ;;  %vm1961_vm10 = vcmp.eq.f32.partialorder %v1960_v21, 8.507059e+37  ;;  %v5900_v23 = vld [vmem:[#allocation83_spill] sm:$0xff]  ;;  %v5902_v15 = vld [vmem:[#allocation53_spill] sm:$0xff]  ;;  %v5903_v21 = vld [vmem:[#allocation54_spill] sm:$0xff] }
 0x3b3   : > { %v5251_v16 = vsel %vm1990_vm7, %v1976_v51, %v5130_v46  ;;  %v1964_v28 = vsel %vm1961_vm10, %v1963_v11, %v1959_v29  ;;  %v5901_v51 = vld [vmem:[#allocation51_spill] sm:$0xff]  ;;  %v670_v7 = vadd.f32 %v5902_v15, %v5896_v58  ;;  %v719_v29 = vadd.f32 %v5903_v21, %v5898_v32 }
 0x3b4   : > { %3800 = vtanh.f32 %v1973_v24  ;;  %v5244_v50 = vsel %vm1991_vm8, %v1973_v24, %v5123_v20  ;;  %v1996_v20 = vpack.c.bf16 %v5251_v16, %v5251_v16  ;;  %v766_v24 = vadd.f32 %v5901_v51, %v5900_v23 }
 0x3b6   : > { %v2012_v25 = vunpack.c.l.b16 %v1996_v20 }
 0x3ba   : > { %v3801_v63 = vpop.eup %3800 }
 0x3bb   : > { %v1977_v8 = vmul.f32 %v3801_v63, %v1964_v28 }
 0x3bd   : > { %v5257_v43 = vsel %vm1991_vm8, %v1977_v8, %v5136_v19  ;;  %v5894_v19 = vld [vmem:[#allocation23_spill] sm:$0xff] }
 0x3be   : > { %v1997_v18 = vpack.c.bf16 %v5257_v43, %v5257_v43  ;;  %v3562_v2 = vpack.c.bf16 %v5257_v43, %v5251_v16 }
 0x3c0   : > { %3586 = vst [vmem:[%s4846_s13 + $0x18] sm:$0xff] %v3562_v2   ;;  %v2013_v46 = vunpack.c.l.b16 %v1997_v18 }
 0x3c2   : > { %v2014_v34 = vpack.c.b16 %v2013_v46, %v2012_v25 }
 0x3c4   : > { %2024 = vmatmul.bf16.vlgmr.msrb.gmra.mxu0 %v2014_v34  ;;  %2038 = vmatmul.bf16.vlgmr.msrb.gmra.mxu1 %v2014_v34 }
 0x3c5   : > { %2052 = vmatmul.bf16.vlgmr.msrb.gmra.mxu2 %v2014_v34  ;;  %2066 = vmatmul.bf16.vlgmr.msrb.gmra.mxu3 %v2014_v34 }
 0x3c6   : > { %2472 = vmatpush.bf16.msrb.mxu0 %v4354_v37  ;;  %2486 = vmatpush.bf16.msrb.mxu1 %v4359_v41 }
 0x3c7   : > { %2500 = vmatpush.bf16.msrb.mxu2 %v4366_v47  ;;  %2514 = vmatpush.bf16.msrb.mxu3 %v4369_v48 }
 0x3ca   : > { %2473 = vmatpush.bf16.msrb.mxu0 %v4371_v49  ;;  %2487 = vmatpush.bf16.msrb.mxu1 %v4376_v52 }
 0x3cb   : > { %2501 = vmatpush.bf16.msrb.mxu2 %v4381_v55  ;;  %2515 = vmatpush.bf16.msrb.mxu3 %v4388_v59 }
 0x3ce   : > { %2474 = vmatpush.bf16.msrb.mxu0 %v4390_v60  ;;  %2488 = vmatpush.bf16.msrb.mxu1 %v4396_v0 }
 0x3cf   : > { %2502 = vmatpush.bf16.msrb.mxu2 %v4401_v3  ;;  %2516 = vmatpush.bf16.msrb.mxu3 %v4405_v4 }
 0x3d2   : > { %2475 = vmatpush.bf16.msrb.mxu0 %v4414_v9  ;;  %2489 = vmatpush.bf16.msrb.mxu1 %v4419_v13 }
 0x3d3   : > { %2503 = vmatpush.bf16.msrb.mxu2 %v4421_v14  ;;  %2517 = vmatpush.bf16.msrb.mxu3 %v4426_v17 }
 0x3d6   : > { %2476 = vmatpush.bf16.msrb.mxu0 %v4435_v22  ;;  %2490 = vmatpush.bf16.msrb.mxu1 %v4440_v26 }
 0x3d7   : > { %2504 = vmatpush.bf16.msrb.mxu2 %v4442_v27  ;;  %2518 = vmatpush.bf16.msrb.mxu3 %v4447_v30 }
 0x3da   : > { %2477 = vmatpush.bf16.msrb.mxu0 %v4456_v35  ;;  %2491 = vmatpush.bf16.msrb.mxu1 %v4461_v40 }
 0x3db   : > { %2505 = vmatpush.bf16.msrb.mxu2 %v4463_v42  ;;  %2519 = vmatpush.bf16.msrb.mxu3 %v4468_v45 }
 0x3de   : > { %2478 = vmatpush.bf16.msrb.mxu0 %v4477_v54  ;;  %2492 = vmatpush.bf16.msrb.mxu1 %v4482_v61 }
 0x3df   : > { %2506 = vmatpush.bf16.msrb.mxu2 %v4484_v62  ;;  %2520 = vmatpush.bf16.msrb.mxu3 %v5855_v36 }
 0x3e2   : > { %2479 = vmatpush.bf16.msrb.mxu0 %v5856_v33  ;;  %2493 = vmatpush.bf16.msrb.mxu1 %v5893_v31  ;;  %v2217_v31 = vpop.permute.xlu0 %2216 }
 0x3e3   : > { %2507 = vmatpush.bf16.msrb.mxu2 %v5894_v19  ;;  %2521 = vmatpush.bf16.msrb.mxu3 %v5895_v38 }
 0x441   : > { %v2025_v39 = vpop.f32.mrf.mxu0  ;;  %v2039_v10 = vpop.f32.mrf.mxu1 }
 0x442   : > { %v2072_v44 = vadd.f32 %v2025_v39, %v668_v57  ;;  %v2073_v1 = vadd.f32 %v2039_v10, %v717_v12  ;;  %v5904_v12 = vld [vmem:[#allocation55_spill] sm:$0xff] }
 0x443   : > { %v768_v39 = vadd.f32 %v5904_v12, %v5900_v23 }
 0x444   : > { %v3423_v56 = vmul.f32 -1.442695, %v2072_v44  ;;  %v3424_v6 = vmul.f32 -1.442695, %v2073_v1  ;;  %v5905_v1 = vld [vmem:[#allocation84_spill] sm:$0xff] }
 0x446   : > { %3802 = vpow2.f32 %v3423_v56  ;;  %v5906_v56 = vld [vmem:[#allocation52_spill] sm:$0xff] }
 0x447   : > { %3804 = vpow2.f32 %v3424_v6  ;;  %v815_v6 = vadd.f32 %v5906_v56, %v5905_v1 }
 0x448   : > { %v2053_v11 = vpop.f32.mrf.mxu2  ;;  %v2067_v10 = vpop.f32.mrf.mxu3 }
 0x449   : > { %v2074_v63 = vadd.f32 %v2053_v11, %v766_v24  ;;  %v2027_v28 = vpop.f32.mrf.mxu0  ;;  %v2041_v8 = vpop.f32.mrf.mxu1  ;;  %v2075_v15 = vadd.f32 %v2067_v10, %v815_v6 }
 0x44a   : > { %v2076_v20 = vadd.f32 %v2027_v28, %v670_v7  ;;  %v2077_v18 = vadd.f32 %v2041_v8, %v719_v29 }
 0x44b   : > { %v3425_v2 = vmul.f32 -1.442695, %v2074_v63 }
 0x44c   : > { %v3803_v25 = vpop.eup %3802  ;;  %v3426_v46 = vmul.f32 -1.442695, %v2076_v20  ;;  %v3427_v57 = vmul.f32 -1.442695, %v2077_v18 }
 0x44d   : > { %v3805_v34 = vpop.eup %3804  ;;  %v2098_v5 = vadd.f32 1.0, %v3803_v25  ;;  %3806 = vpow2.f32 %v3425_v2  ;;  %v5907_v2 = vld [vmem:[#allocation56_spill] sm:$0xff] }
 0x44e   : > { %v2099_v53 = vadd.f32 1.0, %v3805_v34  ;;  %3808 = vpow2.f32 %v3426_v46  ;;  %v817_v25 = vadd.f32 %v5907_v2, %v5905_v1 }
 0x44f   : > { %3810 = vrcp.f32 %v2098_v5  ;;  %v2115_v10 = vand.u32 2147483648, %v2098_v5  ;;  %vm2109_vm13 = vweird.f32 %v2098_v5 }
 0x450   : > { %3812 = vrcp.f32 %v2099_v53  ;;  %v2055_v44 = vpop.f32.mrf.mxu2  ;;  %v2130_v12 = vand.u32 2147483648, %v2099_v53  ;;  %v2128_v6 = vand.u32 2147483647, %v2099_v53  ;;  %vm2124_vm14 = vweird.f32 %v2099_v53 }
 0x451   : > { %3814 = vpow2.f32 %v3427_v57  ;;  %v2078_v51 = vadd.f32 %v2055_v44, %v768_v39  ;;  %v2113_v39 = vand.u32 2147483647, %v2098_v5  ;;  %v2069_v44 = vpop.f32.mrf.mxu3  ;;  %v2116_v2 = vor.u32 1.1754944e-38, %v2115_v10 }
 0x452   : > { %vm2129_vm1 = vcmp.eq.f32.partialorder %v2128_v6, 8.507059e+37 }
 0x453   : > { %v3807_v24 = vpop.eup %3806  ;;  %v3428_v7 = vmul.f32 -1.442695, %v2078_v51  ;;  %vm2114_vm0 = vcmp.eq.f32.partialorder %v2113_v39, 8.507059e+37 }
 0x454   : > { %v3809_v21 = vpop.eup %3808  ;;  %v5310_v29 = vadd.f32 1.0, %v3807_v24 }
 0x455   : > { %v3811_v11 = vpop.eup %3810  ;;  %v5312_v63 = vadd.f32 1.0, %v3809_v21  ;;  %3816 = vpow2.f32 %v3428_v7 }
 0x456   : > { %v3813_v28 = vpop.eup %3812  ;;  %v2105_v8 = vmul.f32 %v3811_v11, %v2098_v5  ;;  %3818 = vrcp.f32 %v5310_v29  ;;  %vm2110_vm7 = vweird.f32 %v3811_v11  ;;  %v5328_v5 = vpop.permute.xlu2 %2213  ;;  %vm2139_vm3 = vweird.f32 %v5310_v29 }
 0x457   : > { %v3815_v20 = vpop.eup %3814  ;;  %v2120_v18 = vmul.f32 %v3813_v28, %v2099_v53  ;;  %3820 = vtanh.f32 %v2075_v15  ;;  %vm2125_vm12 = vweird.f32 %v3813_v28  ;;  %vm2111_vm15 = vmor %vm2109_vm13, %vm2110_vm7  ;;  %vm2218_vm2 = vcmp.eq.s32.totalorder %v5328_v5, 1 }
 0x458   : > { %v2106_v46 = vsub.f32 1.0, %v2105_v8  ;;  %3822 = vrcp.f32 %v5312_v63  ;;  %v5318_v34 = vadd.f32 1.0, %v3815_v20  ;;  %v2079_v8 = vadd.f32 %v2069_v44, %v817_v25  ;;  %vm2126_vm5 = vmor %vm2124_vm14, %vm2125_vm12 }
 0x459   : > { %v2121_v57 = vsub.f32 1.0, %v2120_v18  ;;  %vm2154_vm9 = vweird.f32 %v5312_v63 }
 0x45a   : > { %v2107_v56 = vmul.f32 %v3811_v11, %v2106_v46  ;;  %3824 = vrcp.f32 %v5318_v34  ;;  %vm2169_vm10 = vweird.f32 %v5318_v34 }
 0x45b   : > { %v3817_v51 = vpop.eup %3816  ;;  %v2122_v24 = vmul.f32 %v3813_v28, %v2121_v57  ;;  %v2131_v57 = vor.u32 1.1754944e-38, %v2130_v12  ;;  %v5908_v12 = vld [vmem:[#allocation26_spill] sm:$0xff] }
 0x45c   : > { %v5321_v15 = vpop.eup %3818  ;;  %v2108_v7 = vadd.f32 %v3811_v11, %v2107_v56  ;;  %v5323_v21 = vadd.f32 1.0, %v3817_v51 }
 0x45d   : > { %v3821_v20 = vpop.eup %3820  ;;  %v2135_v18 = vmul.f32 %v5321_v15, %v5310_v29  ;;  %v2123_v46 = vadd.f32 %v3813_v28, %v2122_v24  ;;  %vm2140_vm11 = vweird.f32 %v5321_v15 }
 0x45e   : > { %v3823_v1 = vpop.eup %3822  ;;  %v2112_v23 = vsel %vm2111_vm15, %v3811_v11, %v2108_v7  ;;  %3826 = vrcp.f32 %v5323_v21  ;;  %vm5346_vm6 = vmor %vm2139_vm3, %vm2140_vm11 }
 0x45f   : > { %v2136_v53 = vsub.f32 1.0, %v2135_v18  ;;  %v2117_v56 = vsel %vm2114_vm0, %v2116_v2, %v2112_v23  ;;  %v2127_v25 = vsel %vm2126_vm5, %v3813_v28, %v2123_v46  ;;  %v2150_v44 = vmul.f32 %v3823_v1, %v5312_v63 }
 0x460   : > { %v3825_v51 = vpop.eup %3824  ;;  %v2132_v39 = vsel %vm2129_vm1, %v2131_v57, %v2127_v25  ;;  %v2198_v10 = vmul.f32 %v3821_v20, %v2117_v56  ;;  %3828 = vtanh.f32 %v2079_v8  ;;  %v2145_v23 = vand.u32 2147483648, %v5310_v29 }
 0x461   : > { %v2137_v24 = vmul.f32 %v5321_v15, %v2136_v53  ;;  %v2196_v11 = vmul.f32 %v2132_v39, %v5908_v12  ;;  %v2151_v6 = vsub.f32 1.0, %v2150_v44  ;;  %v2165_v7 = vmul.f32 %v3825_v51, %v5318_v34 }
 0x462   : > { %v2158_v28 = vand.u32 2147483647, %v5312_v63  ;;  %v2160_v18 = vand.u32 2147483648, %v5312_v63  ;;  %v2175_v53 = vand.u32 2147483648, %v5318_v34  ;;  %vm2155_vm8 = vweird.f32 %v3823_v1 }
 0x463   : > { %v2200_v2 = vadd.f32 %v2198_v10, %v2196_v11  ;;  %v2166_v20 = vsub.f32 1.0, %v2165_v7  ;;  %v2152_v8 = vmul.f32 %v3823_v1, %v2151_v6  ;;  %v2138_v57 = vadd.f32 %v5321_v15, %v2137_v24  ;;  %vm2156_vm7 = vmor %vm2154_vm9, %vm2155_vm8 }
 0x464   : > { %v3827_v46 = vpop.eup %3826  ;;  %v2173_v56 = vand.u32 2147483647, %v5318_v34  ;;  %vm2170_vm4 = vweird.f32 %v3825_v51  ;;  %v2143_v11 = vand.u32 2147483647, %v5310_v29  ;;  %v2176_v29 = vor.u32 1.1754944e-38, %v2175_v53 }
 0x465   : > { %3830 = vtanh.f32 %v2200_v2  ;;  %v2167_v25 = vmul.f32 %v3825_v51, %v2166_v20  ;;  %v2180_v44 = vmul.f32 %v3827_v46, %v5323_v21  ;;  %v2153_v24 = vadd.f32 %v3823_v1, %v2152_v8  ;;  %vm2171_vm12 = vmor %vm2169_vm10, %vm2170_vm4 }
 0x466   : > { %v3829_v39 = vpop.eup %3828  ;;  %v5355_v6 = vsel %vm2218_vm2, %v2200_v2, %v5908_v12  ;;  %v2161_v20 = vor.u32 1.1754944e-38, %v2160_v18  ;;  %v2142_v58 = vsel %vm5346_vm6, %v5321_v15, %v2138_v57  ;;  %vm2159_vm13 = vcmp.eq.f32.partialorder %v2158_v28, 8.507059e+37 }
 0x467   : > { %5911 = vst [vmem:[#allocation27_spill] sm:$0xff] %v5355_v6  ;;  %v2181_v7 = vsub.f32 1.0, %v2180_v44  ;;  %v2168_v32 = vadd.f32 %v3825_v51, %v2167_v25  ;;  %v2157_v8 = vsel %vm2156_vm7, %v3823_v1, %v2153_v24  ;;  %v2146_v63 = vor.u32 1.1754944e-38, %v2145_v23 }
 0x468   : > { %v2162_v38 = vsel %vm2159_vm13, %v2161_v20, %v2157_v8  ;;  %vm2174_vm14 = vcmp.eq.f32.partialorder %v2173_v56, 8.507059e+37  ;;  %vm2144_vm15 = vcmp.eq.f32.partialorder %v2143_v11, 8.507059e+37  ;;  %vm2219_vm0 = vcmp.eq.s32.totalorder %v2217_v31, 1 }
 0x469   : > { %v2172_v19 = vsel %vm2171_vm12, %v3825_v51, %v2168_v32  ;;  %v2182_v12 = vmul.f32 %v3827_v46, %v2181_v7  ;;  %v2199_v34 = vmul.f32 %v3829_v39, %v2162_v38  ;;  %v2147_v6 = vsel %vm2144_vm15, %v2146_v63, %v2142_v58  ;;  %v5923_v7 = vld [vmem:[#allocation63_spill] sm:$0xff]  ;;  %v5924_v63 = vld [vmem:[#allocation84_spill] sm:$0xff] }
 0x46a   : > { %v2177_v2 = vsel %vm2174_vm14, %v2176_v29, %v2172_v19  ;;  %vm2185_vm5 = vweird.f32 %v3827_v46  ;;  %v2190_v1 = vand.u32 2147483648, %v5323_v21  ;;  %vm2184_vm1 = vweird.f32 %v5323_v21 }
 0x46b   : > { %v3831_v44 = vpop.eup %3830  ;;  %v2197_v18 = vmul.f32 %v2177_v2, %v5244_v50  ;;  %v2183_v15 = vadd.f32 %v3827_v46, %v2182_v12  ;;  %v2188_v19 = vand.u32 2147483647, %v5323_v21  ;;  %vm2186_vm3 = vmor %vm2184_vm1, %vm2185_vm5  ;;  %v5925_v12 = vld [vmem:[#allocation60_spill] sm:$0xff] }
 0x46c   : > { %v2204_v25 = vmul.f32 %v3831_v44, %v2147_v6  ;;  %v2191_v58 = vor.u32 1.1754944e-38, %v2190_v1  ;;  %v820_v2 = vadd.f32 %v5925_v12, %v5924_v63 }
 0x46d   : > { %v2201_v10 = vadd.f32 %v2199_v34, %v2197_v18  ;;  %v2187_v38 = vsel %vm2186_vm3, %v3827_v46, %v2183_v15  ;;  %vm2189_vm11 = vcmp.eq.f32.partialorder %v2188_v19, 8.507059e+37 }
 0x46e   : > { %v5372_v51 = vsel %vm2218_vm2, %v2204_v25, %v5251_v16  ;;  %v2192_v28 = vsel %vm2189_vm11, %v2191_v58, %v2187_v38 }
 0x46f   : > { %3832 = vtanh.f32 %v2201_v10  ;;  %v5365_v32 = vsel %vm2219_vm0, %v2201_v10, %v5244_v50  ;;  %v2224_v50 = vpack.c.bf16 %v5372_v51, %v5372_v51 }
 0x471   : > { %v2240_v5 = vunpack.c.l.b16 %v2224_v50 }
 0x475   : > { %v3833_v23 = vpop.eup %3832 }
 0x476   : > { %v2205_v57 = vmul.f32 %v3833_v23, %v2192_v28 }
 0x478   : > { %v5378_v53 = vsel %vm2219_vm0, %v2205_v57, %v5257_v43  ;;  %v5926_v57 = vld [vmem:[#allocation64_spill] sm:$0xff] }
 0x479   : > { %v2225_v21 = vpack.c.bf16 %v5378_v53, %v5378_v53  ;;  %v3567_v46 = vpack.c.bf16 %v5378_v53, %v5372_v51  ;;  %v822_v50 = vadd.f32 %v5926_v57, %v5924_v63 }
 0x47b   : > { %3587 = vst [vmem:[%s4846_s13 + $0x20] sm:$0xff] %v3567_v46   ;;  %v2241_v16 = vunpack.c.l.b16 %v2225_v21 }
 0x47d   : > { %v2242_v56 = vpack.c.b16 %v2241_v16, %v2240_v5 }
 0x47f   : > { %2252 = vmatmul.bf16.vlgmr.msra.gmra.mxu0 %v2242_v56  ;;  %2266 = vmatmul.bf16.vlgmr.msra.gmra.mxu1 %v2242_v56 }
 0x480   : > { %2280 = vmatmul.bf16.vlgmr.msra.gmra.mxu2 %v2242_v56  ;;  %2294 = vmatmul.bf16.vlgmr.msra.gmra.mxu3 %v2242_v56 }
 0x481   : > { %2700 = vmatpush.bf16.msra.mxu0 %v4354_v37  ;;  %2714 = vmatpush.bf16.msra.mxu1 %v4359_v41  ;;  %v5912_v37 = vld [vmem:[#allocation22_spill] sm:$0xff]  ;;  %v5913_v41 = vld [vmem:[#allocation23_spill] sm:$0xff] }
 0x482   : > { %2728 = vmatpush.bf16.msra.mxu2 %v4366_v47  ;;  %2742 = vmatpush.bf16.msra.mxu3 %v4369_v48  ;;  %v5914_v47 = vld [vmem:[#allocation24_spill] sm:$0xff]  ;;  %v5915_v48 = vld [vmem:[#allocation79_spill] sm:$0xff] }
 0x485   : > { %2701 = vmatpush.bf16.msra.mxu0 %v4371_v49  ;;  %2715 = vmatpush.bf16.msra.mxu1 %v4376_v52  ;;  %v5916_v49 = vld [vmem:[#allocation57_spill] sm:$0xff] }
 0x486   : > { %2729 = vmatpush.bf16.msra.mxu2 %v4381_v55  ;;  %2743 = vmatpush.bf16.msra.mxu3 %v4388_v59  ;;  %v673_v52 = vadd.f32 %v5916_v49, %v5915_v48  ;;  %v5917_v55 = vld [vmem:[#allocation80_spill] sm:$0xff]  ;;  %v5918_v59 = vld [vmem:[#allocation58_spill] sm:$0xff] }
 0x489   : > { %2702 = vmatpush.bf16.msra.mxu0 %v4390_v60  ;;  %2716 = vmatpush.bf16.msra.mxu1 %v4396_v0  ;;  %v722_v60 = vadd.f32 %v5918_v59, %v5917_v55 }
 0x48a   : > { %2730 = vmatpush.bf16.msra.mxu2 %v4401_v3  ;;  %2744 = vmatpush.bf16.msra.mxu3 %v4405_v4 }
 0x48d   : > { %2703 = vmatpush.bf16.msra.mxu0 %v4414_v9  ;;  %2717 = vmatpush.bf16.msra.mxu1 %v4419_v13 }
 0x48e   : > { %2731 = vmatpush.bf16.msra.mxu2 %v4421_v14  ;;  %2745 = vmatpush.bf16.msra.mxu3 %v4426_v17  ;;  %v5919_v17 = vld [vmem:[#allocation83_spill] sm:$0xff] }
 0x48f   : > { %v773_v20 = vadd.f32 %v5923_v7, %v5919_v17 }
 0x491   : > { %2704 = vmatpush.bf16.msra.mxu0 %v4435_v22  ;;  %2718 = vmatpush.bf16.msra.mxu1 %v4440_v26  ;;  %v5920_v22 = vld [vmem:[#allocation59_spill] sm:$0xff] }
 0x492   : > { %2732 = vmatpush.bf16.msra.mxu2 %v4442_v27  ;;  %2746 = vmatpush.bf16.msra.mxu3 %v4447_v30  ;;  %v771_v26 = vadd.f32 %v5920_v22, %v5919_v17  ;;  %v5921_v27 = vld [vmem:[#allocation61_spill] sm:$0xff] }
 0x493   : > { %v675_v30 = vadd.f32 %v5921_v27, %v5915_v48 }
 0x495   : > { %2705 = vmatpush.bf16.msra.mxu0 %v4456_v35  ;;  %2719 = vmatpush.bf16.msra.mxu1 %v4461_v40  ;;  %v5922_v35 = vld [vmem:[#allocation62_spill] sm:$0xff] }
 0x496   : > { %2733 = vmatpush.bf16.msra.mxu2 %v4463_v42  ;;  %2747 = vmatpush.bf16.msra.mxu3 %v4468_v45  ;;  %v724_v40 = vadd.f32 %v5922_v35, %v5917_v55  ;;  %v5449_v35 = vpop.permute.xlu1 %2441 }
 0x497   : > { %vm2446_vm13 = vcmp.eq.s32.totalorder %v5449_v35, 1 }
 0x499   : > { %2706 = vmatpush.bf16.msra.mxu0 %v4477_v54  ;;  %2720 = vmatpush.bf16.msra.mxu1 %v4482_v61 }
 0x49a   : > { %2734 = vmatpush.bf16.msra.mxu2 %v4484_v62  ;;  %2748 = vmatpush.bf16.msra.mxu3 %v5855_v36 }
 0x49d   : > { %2707 = vmatpush.bf16.msra.mxu0 %v5856_v33  ;;  %2721 = vmatpush.bf16.msra.mxu1 %v5912_v37 }
 0x49e   : > { %2735 = vmatpush.bf16.msra.mxu2 %v5913_v41  ;;  %2749 = vmatpush.bf16.msra.mxu3 %v5914_v47 }
 0x4fc   : > { %v2253_v0 = vpop.f32.mrf.mxu0  ;;  %v2267_v3 = vpop.f32.mrf.mxu1 }
 0x4fd   : > { %v2300_v4 = vadd.f32 %v2253_v0, %v673_v52  ;;  %v2301_v9 = vadd.f32 %v2267_v3, %v722_v60 }
 0x4ff   : > { %v3433_v13 = vmul.f32 -1.442695, %v2300_v4  ;;  %v3434_v14 = vmul.f32 -1.442695, %v2301_v9 }
 0x501   : > { %3834 = vpow2.f32 %v3433_v13 }
 0x502   : > { %3836 = vpow2.f32 %v3434_v14 }
 0x503   : > { %v2281_v42 = vpop.f32.mrf.mxu2  ;;  %v2295_v29 = vpop.f32.mrf.mxu3 }
 0x504   : > { %v2302_v45 = vadd.f32 %v2281_v42, %v771_v26  ;;  %v2255_v54 = vpop.f32.mrf.mxu0  ;;  %v2269_v61 = vpop.f32.mrf.mxu1  ;;  %v2303_v18 = vadd.f32 %v2295_v29, %v820_v2 }
 0x505   : > { %v2304_v62 = vadd.f32 %v2255_v54, %v675_v30  ;;  %v2305_v36 = vadd.f32 %v2269_v61, %v724_v40 }
 0x506   : > { %v3435_v33 = vmul.f32 -1.442695, %v2302_v45 }
 0x507   : > { %v3835_v43 = vpop.eup %3834  ;;  %v3436_v31 = vmul.f32 -1.442695, %v2304_v62  ;;  %v3437_v24 = vmul.f32 -1.442695, %v2305_v36 }
 0x508   : > { %v3837_v39 = vpop.eup %3836  ;;  %v2326_v11 = vadd.f32 1.0, %v3835_v43  ;;  %3838 = vpow2.f32 %v3435_v33  ;;  %v5927_v43 = vld [vmem:[#allocation27_spill] sm:$0xff] }
 0x509   : > { %v2327_v6 = vadd.f32 1.0, %v3837_v39  ;;  %3840 = vpow2.f32 %v3436_v31 }
 0x50a   : > { %3842 = vrcp.f32 %v2326_v11  ;;  %v2341_v56 = vand.u32 2147483647, %v2326_v11  ;;  %v2343_v37 = vand.u32 2147483648, %v2326_v11  ;;  %vm2337_vm4 = vweird.f32 %v2326_v11 }
 0x50b   : > { %3844 = vrcp.f32 %v2327_v6  ;;  %v2283_v8 = vpop.f32.mrf.mxu2  ;;  %v2358_v16 = vand.u32 2147483648, %v2327_v6  ;;  %v2297_v41 = vpop.f32.mrf.mxu3  ;;  %v2356_v49 = vand.u32 2147483647, %v2327_v6  ;;  %vm2352_vm6 = vweird.f32 %v2327_v6 }
 0x50c   : > { %3846 = vpow2.f32 %v3437_v24  ;;  %v2306_v34 = vadd.f32 %v2283_v8, %v773_v20  ;;  %v2307_v4 = vadd.f32 %v2297_v41, %v822_v50  ;;  %vm2342_vm10 = vcmp.eq.f32.partialorder %v2341_v56, 8.507059e+37 }
 0x50d   : > { %v2344_v14 = vor.u32 1.1754944e-38, %v2343_v37  ;;  %v2359_v27 = vor.u32 1.1754944e-38, %v2358_v16  ;;  %vm2357_vm12 = vcmp.eq.f32.partialorder %v2356_v49, 8.507059e+37 }
 0x50e   : > { %v3839_v44 = vpop.eup %3838  ;;  %v3438_v25 = vmul.f32 -1.442695, %v2306_v34 }
 0x50f   : > { %v3841_v10 = vpop.eup %3840  ;;  %v5431_v15 = vadd.f32 1.0, %v3839_v44 }
 0x510   : > { %v3843_v1 = vpop.eup %3842  ;;  %v5433_v19 = vadd.f32 1.0, %v3841_v10  ;;  %3848 = vpow2.f32 %v3438_v25 }
 0x511   : > { %v3845_v38 = vpop.eup %3844  ;;  %v2333_v58 = vmul.f32 %v3843_v1, %v2326_v11  ;;  %3850 = vrcp.f32 %v5431_v15  ;;  %vm2338_vm2 = vweird.f32 %v3843_v1  ;;  %vm2367_vm14 = vweird.f32 %v5431_v15 }
 0x512   : > { %v3847_v23 = vpop.eup %3846  ;;  %v2348_v28 = vmul.f32 %v3845_v38, %v2327_v6  ;;  %3852 = vtanh.f32 %v2303_v18  ;;  %vm2353_vm8 = vweird.f32 %v3845_v38  ;;  %vm2339_vm9 = vmor %vm2337_vm4, %vm2338_vm2  ;;  %v2373_v24 = vand.u32 2147483648, %v5431_v15 }
 0x513   : > { %v2334_v21 = vsub.f32 1.0, %v2333_v58  ;;  %3854 = vrcp.f32 %v5433_v19  ;;  %v5439_v46 = vadd.f32 1.0, %v3847_v23  ;;  %vm2354_vm7 = vmor %vm2352_vm6, %vm2353_vm8  ;;  %v2386_v6 = vand.u32 2147483647, %v5433_v19 }
 0x514   : > { %v2349_v5 = vsub.f32 1.0, %v2348_v28  ;;  %v2388_v7 = vand.u32 2147483648, %v5433_v19  ;;  %vm2382_vm3 = vweird.f32 %v5433_v19 }
 0x515   : > { %v2335_v47 = vmul.f32 %v3843_v1, %v2334_v21  ;;  %3856 = vrcp.f32 %v5439_v46  ;;  %v2403_v34 = vand.u32 2147483648, %v5439_v46  ;;  %v2401_v44 = vand.u32 2147483647, %v5439_v46 }
 0x516   : > { %v3849_v52 = vpop.eup %3848  ;;  %v2350_v59 = vmul.f32 %v3845_v38, %v2349_v5  ;;  %vm2397_vm11 = vweird.f32 %v5439_v46  ;;  %v2389_v57 = vor.u32 1.1754944e-38, %v2388_v7  ;;  %vm2387_vm4 = vcmp.eq.f32.partialorder %v2386_v6, 8.507059e+37  ;;  %v5932_v7 = vld [vmem:[#allocation67_spill] sm:$0xff] }
 0x517   : > { %v5442_v60 = vpop.eup %3850  ;;  %v2336_v0 = vadd.f32 %v3843_v1, %v2335_v47  ;;  %v5444_v3 = vadd.f32 1.0, %v3849_v52  ;;  %vm2402_vm6 = vcmp.eq.f32.partialorder %v2401_v44, 8.507059e+37 }
 0x518   : > { %v3853_v9 = vpop.eup %3852  ;;  %v2363_v13 = vmul.f32 %v5442_v60, %v5431_v15  ;;  %v2351_v22 = vadd.f32 %v3845_v38, %v2350_v59  ;;  %vm2368_vm15 = vweird.f32 %v5442_v60 }
 0x519   : > { %v3855_v26 = vpop.eup %3854  ;;  %v2340_v30 = vsel %vm2339_vm9, %v3843_v1, %v2336_v0  ;;  %3858 = vrcp.f32 %v5444_v3  ;;  %vm5467_vm1 = vmor %vm2367_vm14, %vm2368_vm15  ;;  %v2445_v0 = vpop.permute.xlu2 %2444 }
 0x51a   : > { %v2364_v40 = vsub.f32 1.0, %v2363_v13  ;;  %v2345_v42 = vsel %vm2342_vm10, %v2344_v14, %v2340_v30  ;;  %v2355_v45 = vsel %vm2354_vm7, %v3845_v38, %v2351_v22  ;;  %v2378_v54 = vmul.f32 %v3855_v26, %v5433_v19 }
 0x51b   : > { %v3857_v61 = vpop.eup %3856  ;;  %v2360_v62 = vsel %vm2357_vm12, %v2359_v27, %v2355_v45  ;;  %v2426_v36 = vmul.f32 %v3853_v9, %v2345_v42  ;;  %3860 = vtanh.f32 %v2307_v4  ;;  %vm2383_vm0 = vweird.f32 %v3855_v26 }
 0x51c   : > { %v2365_v33 = vmul.f32 %v5442_v60, %v2364_v40  ;;  %v2424_v31 = vmul.f32 %v2360_v62, %v5927_v43  ;;  %v2379_v39 = vsub.f32 1.0, %v2378_v54  ;;  %v2393_v11 = vmul.f32 %v3857_v61, %v5439_v46  ;;  %vm2384_vm2 = vmor %vm2382_vm3, %vm2383_vm0  ;;  %v5930_v62 = vld [vmem:[#allocation65_spill] sm:$0xff] }
 0x51d   : > { %vm2398_vm5 = vweird.f32 %v3857_v61  ;;  %v2371_v38 = vand.u32 2147483647, %v5431_v15  ;;  %v2404_v15 = vor.u32 1.1754944e-38, %v2403_v34  ;;  %v2374_v19 = vor.u32 1.1754944e-38, %v2373_v24 }
 0x51e   : > { %v2428_v20 = vadd.f32 %v2426_v36, %v2424_v31  ;;  %v2394_v29 = vsub.f32 1.0, %v2393_v11  ;;  %v2380_v8 = vmul.f32 %v3855_v26, %v2379_v39  ;;  %v2366_v2 = vadd.f32 %v5442_v60, %v2365_v33  ;;  %vm2399_vm8 = vmor %vm2397_vm11, %vm2398_vm5 }
 0x51f   : > { %v3859_v12 = vpop.eup %3858  ;;  %vm2372_vm9 = vcmp.eq.f32.partialorder %v2371_v38, 8.507059e+37  ;;  %vm2447_vm10 = vcmp.eq.s32.totalorder %v2445_v0, 1  ;;  %v2418_v9 = vand.u32 2147483648, %v5444_v3  ;;  %vm2412_vm12 = vweird.f32 %v5444_v3 }
 0x520   : > { %3862 = vtanh.f32 %v2428_v20  ;;  %v2395_v18 = vmul.f32 %v3857_v61, %v2394_v29  ;;  %v2408_v25 = vmul.f32 %v3859_v12, %v5444_v3  ;;  %v2381_v58 = vadd.f32 %v3855_v26, %v2380_v8  ;;  %v5933_v29 = vld [vmem:[#allocation69_spill] sm:$0xff] }
 0x521   : > { %v3861_v10 = vpop.eup %3860  ;;  %v5476_v23 = vsel %vm2446_vm13, %v2428_v20, %v5927_v43  ;;  %v2370_v21 = vsel %vm5467_vm1, %v5442_v60, %v2366_v2  ;;  %vm2413_vm7 = vweird.f32 %v3859_v12  ;;  %v2416_v14 = vand.u32 2147483647, %v5444_v3 }
 0x522   : > { %v2409_v28 = vsub.f32 1.0, %v2408_v25  ;;  %v2396_v50 = vadd.f32 %v3857_v61, %v2395_v18  ;;  %v2385_v5 = vsel %vm2384_vm2, %v3855_v26, %v2381_v58  ;;  %v2375_v49 = vsel %vm2372_vm9, %v2374_v19, %v2370_v21  ;;  %vm2414_vm14 = vmor %vm2412_vm12, %vm2413_vm7 }
 0x523   : > { %v2390_v16 = vsel %vm2387_vm4, %v2389_v57, %v2385_v5  ;;  %v2419_v26 = vor.u32 1.1754944e-38, %v2418_v9  ;;  %vm2417_vm15 = vcmp.eq.f32.partialorder %v2416_v14, 8.507059e+37  ;;  %v678_v36 = vadd.f32 %v5930_v62, %v5915_v48  ;;  %v5935_v5 = vld [vmem:[#allocation71_spill] sm:$0xff] }
 0x524   : > { %v2400_v56 = vsel %vm2399_vm8, %v3857_v61, %v2396_v50  ;;  %v2410_v37 = vmul.f32 %v3859_v12, %v2409_v28  ;;  %v2427_v46 = vmul.f32 %v3861_v10, %v2390_v16  ;;  %v776_v20 = vadd.f32 %v5932_v7, %v5919_v17 }
 0x525   : > { %v2405_v41 = vsel %vm2402_vm6, %v2404_v15, %v2400_v56  ;;  %v680_v8 = vadd.f32 %v5933_v29, %v5915_v48  ;;  %v778_v19 = vadd.f32 %v5935_v5, %v5919_v17 }
 0x526   : > { %v3863_v47 = vpop.eup %3862  ;;  %v2425_v52 = vmul.f32 %v2405_v41, %v5365_v32  ;;  %v2411_v60 = vadd.f32 %v3859_v12, %v2410_v37  ;;  %v5936_v37 = vld [vmem:[#allocation68_spill] sm:$0xff] }
 0x527   : > { %v2432_v59 = vmul.f32 %v3863_v47, %v2375_v49  ;;  %v825_v41 = vadd.f32 %v5936_v37, %v5924_v63 }
 0x528   : > { %v2429_v4 = vadd.f32 %v2427_v46, %v2425_v52  ;;  %v2415_v22 = vsel %vm2414_vm14, %v3859_v12, %v2411_v60  ;;  %v5934_v12 = vld [vmem:[#allocation70_spill] sm:$0xff] }
 0x529   : > { %v5493_v27 = vsel %vm2446_vm13, %v2432_v59, %v5372_v51  ;;  %v2420_v40 = vsel %vm2417_vm15, %v2419_v26, %v2415_v22  ;;  %v729_v2 = vadd.f32 %v5934_v12, %v5917_v55 }
 0x52a   : > { %3864 = vtanh.f32 %v2429_v4  ;;  %v5486_v13 = vsel %vm2447_vm10, %v2429_v4, %v5365_v32  ;;  %v2452_v32 = vpack.c.bf16 %v5493_v27, %v5493_v27 }
 0x52c   : > { %v2468_v35 = vunpack.c.l.b16 %v2452_v32 }
 0x530   : > { %v3865_v30 = vpop.eup %3864 }
 0x531   : > { %v2433_v42 = vmul.f32 %v3865_v30, %v2420_v40  ;;  %v5937_v30 = vld [vmem:[#allocation72_spill] sm:$0xff] }
 0x532   : > { %v827_v40 = vadd.f32 %v5937_v30, %v5924_v63 }
 0x533   : > { %v5499_v45 = vsel %vm2447_vm10, %v2433_v42, %v5378_v53  ;;  %v5931_v53 = vld [vmem:[#allocation66_spill] sm:$0xff] }
 0x534   : > { %v2453_v3 = vpack.c.bf16 %v5499_v45, %v5499_v45  ;;  %v3572_v54 = vpack.c.bf16 %v5499_v45, %v5493_v27  ;;  %v727_v33 = vadd.f32 %v5931_v53, %v5917_v55 }
 0x536   : > { %3588 = vst [vmem:[%s4846_s13 + $0x28] sm:$0xff] %v3572_v54   ;;  %v2469_v51 = vunpack.c.l.b16 %v2453_v3 }
 0x538   : > { %v2470_v61 = vpack.c.b16 %v2469_v51, %v2468_v35 }
 0x53a   : > { %2480 = vmatmul.bf16.vlgmr.msrb.gmra.mxu0 %v2470_v61  ;;  %2494 = vmatmul.bf16.vlgmr.msrb.gmra.mxu1 %v2470_v61 }
 0x53b   : > { %2508 = vmatmul.bf16.vlgmr.msrb.gmra.mxu2 %v2470_v61  ;;  %2522 = vmatmul.bf16.vlgmr.msrb.gmra.mxu3 %v2470_v61 }
 0x5b7   : > { %v2481_v43 = vpop.f32.mrf.mxu0  ;;  %v2495_v31 = vpop.f32.mrf.mxu1 }
 0x5b8   : > { %v2528_v39 = vadd.f32 %v2481_v43, %v678_v36  ;;  %v2529_v11 = vadd.f32 %v2495_v31, %v727_v33 }
 0x5ba   : > { %v3443_v24 = vmul.f32 -1.442695, %v2528_v39  ;;  %v3444_v6 = vmul.f32 -1.442695, %v2529_v11 }
 0x5bc   : > { %3866 = vpow2.f32 %v3443_v24 }
 0x5bd   : > { %3868 = vpow2.f32 %v3444_v6 }
 0x5be   : > { %v2509_v34 = vpop.f32.mrf.mxu2  ;;  %v2523_v16 = vpop.f32.mrf.mxu3 }
 0x5bf   : > { %v2530_v44 = vadd.f32 %v2509_v34, %v776_v20  ;;  %v2483_v18 = vpop.f32.mrf.mxu0  ;;  %v2497_v25 = vpop.f32.mrf.mxu1  ;;  %v2531_v49 = vadd.f32 %v2523_v16, %v825_v41 }
 0x5c0   : > { %v2532_v10 = vadd.f32 %v2483_v18, %v680_v8  ;;  %v2533_v1 = vadd.f32 %v2497_v25, %v729_v2  ;;  %v5538_v2 = vpop.permute.xlu0 %2669 }
 0x5c1   : > { %v3445_v38 = vmul.f32 -1.442695, %v2530_v44  ;;  %vm2674_vm4 = vcmp.eq.s32.totalorder %v5538_v2, 1 }
 0x5c2   : > { %v3867_v58 = vpop.eup %3866  ;;  %v3446_v28 = vmul.f32 -1.442695, %v2532_v10  ;;  %v3447_v21 = vmul.f32 -1.442695, %v2533_v1 }
 0x5c3   : > { %v3869_v57 = vpop.eup %3868  ;;  %v2554_v50 = vadd.f32 1.0, %v3867_v58  ;;  %3870 = vpow2.f32 %v3445_v38 }
 0x5c4   : > { %v2555_v15 = vadd.f32 1.0, %v3869_v57  ;;  %3872 = vpow2.f32 %v3446_v28 }
 0x5c5   : > { %3874 = vrcp.f32 %v2554_v50  ;;  %v2569_v35 = vand.u32 2147483647, %v2554_v50  ;;  %v2571_v51 = vand.u32 2147483648, %v2554_v50  ;;  %vm2565_vm5 = vweird.f32 %v2554_v50 }
 0x5c6   : > { %3876 = vrcp.f32 %v2555_v15  ;;  %v2511_v56 = vpop.f32.mrf.mxu2  ;;  %v2586_v54 = vand.u32 2147483648, %v2555_v15  ;;  %v2525_v61 = vpop.f32.mrf.mxu3  ;;  %v2584_v36 = vand.u32 2147483647, %v2555_v15  ;;  %vm2580_vm1 = vweird.f32 %v2555_v15 }
 0x5c7   : > { %3878 = vpow2.f32 %v3447_v21  ;;  %v2534_v46 = vadd.f32 %v2511_v56, %v778_v19  ;;  %v2535_v11 = vadd.f32 %v2525_v61, %v827_v40  ;;  %vm2570_vm11 = vcmp.eq.f32.partialorder %v2569_v35, 8.507059e+37 }
 0x5c8   : > { %v2572_v7 = vor.u32 1.1754944e-38, %v2571_v51  ;;  %v2587_v8 = vor.u32 1.1754944e-38, %v2586_v54  ;;  %vm2585_vm8 = vcmp.eq.f32.partialorder %v2584_v36, 8.507059e+37 }
 0x5c9   : > { %v3871_v47 = vpop.eup %3870  ;;  %v3448_v52 = vmul.f32 -1.442695, %v2534_v46 }
 0x5ca   : > { %v3873_v59 = vpop.eup %3872  ;;  %v5520_v0 = vadd.f32 1.0, %v3871_v47 }
 0x5cb   : > { %v3875_v4 = vpop.eup %3874  ;;  %v5522_v60 = vadd.f32 1.0, %v3873_v59  ;;  %3880 = vpow2.f32 %v3448_v52 }
 0x5cc   : > { %v3877_v9 = vpop.eup %3876  ;;  %v2561_v14 = vmul.f32 %v3875_v4, %v2554_v50  ;;  %3882 = vrcp.f32 %v5520_v0  ;;  %vm2566_vm13 = vweird.f32 %v3875_v4  ;;  %vm2595_vm6 = vweird.f32 %v5520_v0 }
 0x5cd   : > { %v3879_v22 = vpop.eup %3878  ;;  %v2576_v26 = vmul.f32 %v3877_v9, %v2555_v15  ;;  %3884 = vtanh.f32 %v2531_v49  ;;  %vm2581_vm0 = vweird.f32 %v3877_v9  ;;  %vm2567_vm3 = vmor %vm2565_vm5, %vm2566_vm13  ;;  %v2601_v21 = vand.u32 2147483648, %v5520_v0 }
 0x5ce   : > { %v2562_v42 = vsub.f32 1.0, %v2561_v14  ;;  %3886 = vrcp.f32 %v5522_v60  ;;  %v5528_v32 = vadd.f32 1.0, %v3879_v22  ;;  %vm2582_vm2 = vmor %vm2580_vm1, %vm2581_vm0  ;;  %v2614_v15 = vand.u32 2147483647, %v5522_v60 }
 0x5cf   : > { %v2577_v3 = vsub.f32 1.0, %v2576_v26  ;;  %v2616_v5 = vand.u32 2147483648, %v5522_v60  ;;  %vm2610_vm14 = vweird.f32 %v5522_v60 }
 0x5d0   : > { %v2563_v62 = vmul.f32 %v3875_v4, %v2562_v42  ;;  %3888 = vrcp.f32 %v5528_v32  ;;  %v2631_v46 = vand.u32 2147483648, %v5528_v32  ;;  %v2629_v47 = vand.u32 2147483647, %v5528_v32 }
 0x5d1   : > { %v3881_v53 = vpop.eup %3880  ;;  %v2578_v33 = vmul.f32 %v3877_v9, %v2577_v3  ;;  %vm2625_vm15 = vweird.f32 %v5528_v32  ;;  %v2617_v30 = vor.u32 1.1754944e-38, %v2616_v5  ;;  %vm2615_vm5 = vcmp.eq.f32.partialorder %v2614_v15, 8.507059e+37  ;;  %v5942_v5 = vld [vmem:[#allocation75_spill] sm:$0xff] }
 0x5d2   : > { %v5531_v43 = vpop.eup %3882  ;;  %v2564_v31 = vadd.f32 %v3875_v4, %v2563_v62  ;;  %v5533_v39 = vadd.f32 1.0, %v3881_v53  ;;  %vm2630_vm1 = vcmp.eq.f32.partialorder %v2629_v47, 8.507059e+37  ;;  %v2673_v62 = vpop.permute.xlu1 %2672 }
 0x5d3   : > { %v3885_v24 = vpop.eup %3884  ;;  %v2591_v6 = vmul.f32 %v5531_v43, %v5520_v0  ;;  %v2579_v20 = vadd.f32 %v3877_v9, %v2578_v33  ;;  %vm2596_vm9 = vweird.f32 %v5531_v43 }
 0x5d4   : > { %v3887_v29 = vpop.eup %3886  ;;  %v2568_v12 = vsel %vm2567_vm3, %v3875_v4, %v2564_v31  ;;  %3890 = vrcp.f32 %v5533_v39  ;;  %vm5556_vm12 = vmor %vm2595_vm6, %vm2596_vm9 }
 0x5d5   : > { %v2592_v34 = vsub.f32 1.0, %v2591_v6  ;;  %v2573_v44 = vsel %vm2570_vm11, %v2572_v7, %v2568_v12  ;;  %v2583_v18 = vsel %vm2582_vm2, %v3877_v9, %v2579_v20  ;;  %v2606_v25 = vmul.f32 %v3887_v29, %v5522_v60 }
 0x5d6   : > { %v3889_v10 = vpop.eup %3888  ;;  %v2588_v1 = vsel %vm2585_vm8, %v2587_v8, %v2583_v18  ;;  %v2654_v38 = vmul.f32 %v3885_v24, %v2573_v44  ;;  %3892 = vtanh.f32 %v2535_v11  ;;  %vm2611_vm10 = vweird.f32 %v3887_v29 }
 0x5d7   : > { %v2593_v58 = vmul.f32 %v5531_v43, %v2592_v34  ;;  %v2652_v28 = vmul.f32 %v2588_v1, %v5476_v23  ;;  %v2607_v57 = vsub.f32 1.0, %v2606_v25  ;;  %v2621_v50 = vmul.f32 %v3889_v10, %v5528_v32  ;;  %vm2612_vm13 = vmor %vm2610_vm14, %vm2611_vm10 }
 0x5d8   : > { %vm2626_vm7 = vweird.f32 %v3889_v10  ;;  %v2599_v9 = vand.u32 2147483647, %v5520_v0  ;;  %v2632_v0 = vor.u32 1.1754944e-38, %v2631_v46  ;;  %v2602_v60 = vor.u32 1.1754944e-38, %v2601_v21 }
 0x5d9   : > { %v2656_v19 = vadd.f32 %v2654_v38, %v2652_v28  ;;  %v2622_v16 = vsub.f32 1.0, %v2621_v50  ;;  %v2608_v56 = vmul.f32 %v3887_v29, %v2607_v57  ;;  %v2594_v41 = vadd.f32 %v5531_v43, %v2593_v58  ;;  %vm2627_vm0 = vmor %vm2625_vm15, %vm2626_vm7 }
 0x5da   : > { %v3891_v37 = vpop.eup %3890  ;;  %vm2600_vm3 = vcmp.eq.f32.partialorder %v2599_v9, 8.507059e+37  ;;  %vm2675_vm11 = vcmp.eq.s32.totalorder %v2673_v62, 1  ;;  %v2646_v11 = vand.u32 2147483648, %v5533_v39  ;;  %vm2640_vm8 = vweird.f32 %v5533_v39 }
 0x5db   : > { %3894 = vtanh.f32 %v2656_v19  ;;  %v2623_v49 = vmul.f32 %v3889_v10, %v2622_v16  ;;  %v2636_v52 = vmul.f32 %v3891_v37, %v5533_v39  ;;  %v2609_v14 = vadd.f32 %v3887_v29, %v2608_v56  ;;  %v5943_v16 = vld [vmem:[#allocation77_spill] sm:$0xff] }
 0x5dc   : > { %v3893_v59 = vpop.eup %3892  ;;  %v5565_v22 = vsel %vm2674_vm4, %v2656_v19, %v5476_v23  ;;  %v2598_v42 = vsel %vm5556_vm12, %v5531_v43, %v2594_v41  ;;  %vm2641_vm2 = vweird.f32 %v3891_v37  ;;  %v2644_v6 = vand.u32 2147483647, %v5533_v39 }
 0x5dd   : > { %v2637_v26 = vsub.f32 1.0, %v2636_v52  ;;  %v2624_v40 = vadd.f32 %v3889_v10, %v2623_v49  ;;  %v2613_v3 = vsel %vm2612_vm13, %v3887_v29, %v2609_v14  ;;  %v2603_v36 = vsel %vm2600_vm3, %v2602_v60, %v2598_v42  ;;  %vm2642_vm6 = vmor %vm2640_vm8, %vm2641_vm2 }
 0x5de   : > { %v2618_v54 = vsel %vm2615_vm5, %v2617_v30, %v2613_v3  ;;  %v2647_v20 = vor.u32 1.1754944e-38, %v2646_v11  ;;  %vm2645_vm9 = vcmp.eq.f32.partialorder %v2644_v6, 8.507059e+37  ;;  %v781_v19 = vadd.f32 %v5942_v5, %v5919_v17  ;;  %v5947_v6 = vld [vmem:[#allocation82_spill] sm:$0xff] }
 0x5df   : > { %v2628_v35 = vsel %vm2627_vm0, %v3889_v10, %v2624_v40  ;;  %v2638_v23 = vmul.f32 %v3891_v37, %v2637_v26  ;;  %v2655_v32 = vmul.f32 %v3893_v59, %v2618_v54  ;;  %v5940_v10 = vld [vmem:[#allocation73_spill] sm:$0xff]  ;;  %v685_v56 = vadd.f32 %v5943_v16, %v5915_v48  ;;  %v5946_v54 = vld [vmem:[#allocation76_spill] sm:$0xff] }
 0x5e0   : > { %v2633_v51 = vsel %vm2630_vm1, %v2632_v0, %v2628_v35  ;;  %v683_v1 = vadd.f32 %v5940_v10, %v5915_v48  ;;  %v5945_v48 = vld [vmem:[#allocation81_spill] sm:$0xff]  ;;  %v830_v35 = vadd.f32 %v5946_v54, %v5924_v63 }
 0x5e1   : > { %v3895_v61 = vpop.eup %3894  ;;  %v2653_v53 = vmul.f32 %v2633_v51, %v5486_v13  ;;  %v2639_v43 = vadd.f32 %v3891_v37, %v2638_v23  ;;  %v783_v3 = vadd.f32 %v5945_v48, %v5919_v17 }
 0x5e2   : > { %v2660_v33 = vmul.f32 %v3895_v61, %v2603_v36 }
 0x5e3   : > { %v2657_v31 = vadd.f32 %v2655_v32, %v2653_v53  ;;  %v2643_v7 = vsel %vm2642_vm6, %v3891_v37, %v2639_v43  ;;  %v5944_v37 = vld [vmem:[#allocation78_spill] sm:$0xff] }
 0x5e4   : > { %v5582_v29 = vsel %vm2674_vm4, %v2660_v33, %v5493_v27  ;;  %v2648_v12 = vsel %vm2645_vm9, %v2647_v20, %v2643_v7  ;;  %v734_v41 = vadd.f32 %v5944_v37, %v5917_v55  ;;  %v832_v7 = vadd.f32 %v5947_v6, %v5924_v63 }
 0x5e5   : > { %3896 = vtanh.f32 %v2657_v31  ;;  %v5575_v24 = vsel %vm2675_vm11, %v2657_v31, %v5486_v13  ;;  %v2680_v13 = vpack.c.bf16 %v5582_v29, %v5582_v29 }
 0x5e7   : > { %v2696_v2 = vunpack.c.l.b16 %v2680_v13 }
 0x5eb   : > { %v3897_v8 = vpop.eup %3896 }
 0x5ec   : > { %v2661_v34 = vmul.f32 %v3897_v8, %v2648_v12 }
 0x5ee   : > { %v5588_v44 = vsel %vm2675_vm11, %v2661_v34, %v5499_v45  ;;  %v5941_v45 = vld [vmem:[#allocation74_spill] sm:$0xff] }
 0x5ef   : > { %v2681_v39 = vpack.c.bf16 %v5588_v44, %v5588_v44  ;;  %v3577_v18 = vpack.c.bf16 %v5588_v44, %v5582_v29  ;;  %v732_v38 = vadd.f32 %v5941_v45, %v5917_v55 }
 0x5f1   : > { %3589 = vst [vmem:[%s4846_s13 + $0x30] sm:$0xff] %v3577_v18   ;;  %v2697_v27 = vunpack.c.l.b16 %v2681_v39 }
 0x5f3   : > { %v2698_v25 = vpack.c.b16 %v2697_v27, %v2696_v2 }
 0x5f5   : > { %2708 = vmatmul.bf16.vlgmr.msra.gmra.mxu0 %v2698_v25  ;;  %2722 = vmatmul.bf16.vlgmr.msra.gmra.mxu1 %v2698_v25 }
 0x5f6   : > { %2736 = vmatmul.bf16.vlgmr.msra.gmra.mxu2 %v2698_v25  ;;  %2750 = vmatmul.bf16.vlgmr.msra.gmra.mxu3 %v2698_v25 }
 0x672   : > { %v2709_v58 = vpop.f32.mrf.mxu0  ;;  %v2723_v28 = vpop.f32.mrf.mxu1 }
 0x673   : > { %v2756_v57 = vadd.f32 %v2709_v58, %v683_v1  ;;  %v2757_v50 = vadd.f32 %v2723_v28, %v732_v38 }
 0x675   : > { %v3453_v21 = vmul.f32 -1.442695, %v2756_v57  ;;  %v3454_v15 = vmul.f32 -1.442695, %v2757_v50 }
 0x677   : > { %3898 = vpow2.f32 %v3453_v21 }
 0x678   : > { %3900 = vpow2.f32 %v3454_v15 }
 0x679   : > { %v2737_v46 = vpop.f32.mrf.mxu2  ;;  %v2751_v55 = vpop.f32.mrf.mxu3 }
 0x67a   : > { %v2758_v47 = vadd.f32 %v2737_v46, %v781_v19  ;;  %v2711_v49 = vpop.f32.mrf.mxu0  ;;  %v2725_v52 = vpop.f32.mrf.mxu1  ;;  %v2759_v32 = vadd.f32 %v2751_v55, %v830_v35 }
 0x67b   : > { %v2760_v59 = vadd.f32 %v2711_v49, %v685_v56  ;;  %v2761_v4 = vadd.f32 %v2725_v52, %v734_v41 }
 0x67c   : > { %v3455_v9 = vmul.f32 -1.442695, %v2758_v47 }
 0x67d   : > { %v3899_v14 = vpop.eup %3898  ;;  %v3456_v26 = vmul.f32 -1.442695, %v2760_v59  ;;  %v3457_v42 = vmul.f32 -1.442695, %v2761_v4 }
 0x67e   : > { %v3901_v30 = vpop.eup %3900  ;;  %v2782_v40 = vadd.f32 1.0, %v3899_v14  ;;  %3902 = vpow2.f32 %v3455_v9 }
 0x67f   : > { %v2783_v0 = vadd.f32 1.0, %v3901_v30  ;;  %3904 = vpow2.f32 %v3456_v26 }
 0x680   : > { %3906 = vrcp.f32 %v2782_v40  ;;  %v2797_v13 = vand.u32 2147483647, %v2782_v40  ;;  %v2799_v39 = vand.u32 2147483648, %v2782_v40  ;;  %vm2793_vm7 = vweird.f32 %v2782_v40 }
 0x681   : > { %3908 = vrcp.f32 %v2783_v0  ;;  %v2739_v60 = vpop.f32.mrf.mxu2  ;;  %v2814_v34 = vand.u32 2147483648, %v2783_v0  ;;  %v2753_v18 = vpop.f32.mrf.mxu3  ;;  %v2812_v27 = vand.u32 2147483647, %v2783_v0  ;;  %vm2808_vm12 = vweird.f32 %v2783_v0 }
 0x682   : > { %3910 = vpow2.f32 %v3457_v42  ;;  %v2762_v23 = vadd.f32 %v2739_v60, %v783_v3  ;;  %v2763_v38 = vadd.f32 %v2753_v18, %v832_v7  ;;  %vm2798_vm15 = vcmp.eq.f32.partialorder %v2797_v13, 8.507059e+37 }
 0x683   : > { %v2800_v57 = vor.u32 1.1754944e-38, %v2799_v39  ;;  %v2815_v15 = vor.u32 1.1754944e-38, %v2814_v34  ;;  %vm2813_vm0 = vcmp.eq.f32.partialorder %v2812_v27, 8.507059e+37 }
 0x684   : > { %v3903_v51 = vpop.eup %3902  ;;  %v3458_v61 = vmul.f32 -1.442695, %v2762_v23 }
 0x685   : > { %v3905_v62 = vpop.eup %3904  ;;  %v5609_v36 = vadd.f32 1.0, %v3903_v51 }
 0x686   : > { %v3907_v53 = vpop.eup %3906  ;;  %v5611_v33 = vadd.f32 1.0, %v3905_v62  ;;  %3912 = vpow2.f32 %v3458_v61 }
 0x687   : > { %v3909_v17 = vpop.eup %3908  ;;  %v2789_v31 = vmul.f32 %v3907_v53, %v2782_v40  ;;  %3914 = vrcp.f32 %v5609_v36  ;;  %vm2794_vm4 = vweird.f32 %v3907_v53  ;;  %vm2823_vm5 = vweird.f32 %v5609_v36 }
 0x688   : > { %v3911_v43 = vpop.eup %3910  ;;  %v2804_v11 = vmul.f32 %v3909_v17, %v2783_v0  ;;  %3916 = vtanh.f32 %v2759_v32  ;;  %vm2809_vm10 = vweird.f32 %v3909_v17  ;;  %vm2795_vm14 = vmor %vm2793_vm7, %vm2794_vm4  ;;  %v2829_v9 = vand.u32 2147483648, %v5609_v36 }
 0x689   : > { %v2790_v20 = vsub.f32 1.0, %v2789_v31  ;;  %3918 = vrcp.f32 %v5611_v33  ;;  %v5617_v8 = vadd.f32 1.0, %v3911_v43  ;;  %vm2810_vm13 = vmor %vm2808_vm12, %vm2809_vm10  ;;  %v2842_v14 = vand.u32 2147483647, %v5611_v33 }
 0x68a   : > { %v2805_v12 = vsub.f32 1.0, %v2804_v11  ;;  %v2844_v26 = vand.u32 2147483648, %v5611_v33  ;;  %v2827_v23 = vand.u32 2147483647, %v5609_v36  ;;  %vm2838_vm8 = vweird.f32 %v5611_v33 }
 0x68b   : > { %v2791_v2 = vmul.f32 %v3907_v53, %v2790_v20  ;;  %3920 = vrcp.f32 %v5617_v8  ;;  %v2857_v3 = vand.u32 2147483647, %v5617_v8  ;;  %vm2853_vm6 = vweird.f32 %v5617_v8 }
 0x68c   : > { %v3913_v25 = vpop.eup %3912  ;;  %v2806_v10 = vmul.f32 %v3909_v17, %v2805_v12  ;;  %v2845_v61 = vor.u32 1.1754944e-38, %v2844_v26  ;;  %vm2843_vm10 = vcmp.eq.f32.partialorder %v2842_v14, 8.507059e+37  ;;  %v2830_v43 = vor.u32 1.1754944e-38, %v2829_v9 }
 0x68d   : > { %v5620_v63 = vpop.eup %3914  ;;  %v2792_v1 = vadd.f32 %v3907_v53, %v2791_v2  ;;  %v5622_v45 = vadd.f32 1.0, %v3913_v25  ;;  %vm2858_vm7 = vcmp.eq.f32.partialorder %v2857_v3, 8.507059e+37  ;;  %vm2828_vm12 = vcmp.eq.f32.partialorder %v2827_v23, 8.507059e+37  ;;  %v2901_v25 = vpop.permute.xlu0 %2900 }
 0x68e   : > { %v3917_v58 = vpop.eup %3916  ;;  %v2819_v28 = vmul.f32 %v5620_v63, %v5609_v36  ;;  %v2807_v50 = vadd.f32 %v3909_v17, %v2806_v10  ;;  %vm2824_vm1 = vweird.f32 %v5620_v63  ;;  %v2898_v10 = vpop.permute.xlu2 %2897 }
 0x68f   : > { %v3919_v21 = vpop.eup %3918  ;;  %v2796_v5 = vsel %vm2795_vm14, %v3907_v53, %v2792_v1  ;;  %3922 = vrcp.f32 %v5622_v45  ;;  %vm5642_vm2 = vmor %vm2823_vm5, %vm2824_vm1  ;;  %v2874_v18 = vand.u32 2147483648, %v5622_v45  ;;  %v2872_v2 = vand.u32 2147483647, %v5622_v45 }
 0x690   : > { %v2820_v19 = vsub.f32 1.0, %v2819_v28  ;;  %v2801_v16 = vsel %vm2798_vm15, %v2800_v57, %v2796_v5  ;;  %v2811_v56 = vsel %vm2810_vm13, %v3909_v17, %v2807_v50  ;;  %v2834_v37 = vmul.f32 %v3919_v21, %v5611_v33 }
 0x691   : > { %v3921_v41 = vpop.eup %3920  ;;  %v2816_v46 = vsel %vm2813_vm0, %v2815_v15, %v2811_v56  ;;  %v2882_v47 = vmul.f32 %v3917_v58, %v2801_v16  ;;  %3924 = vtanh.f32 %v2763_v38  ;;  %vm2839_vm3 = vweird.f32 %v3919_v21 }
 0x692   : > { %v2821_v49 = vmul.f32 %v5620_v63, %v2820_v19  ;;  %v2880_v52 = vmul.f32 %v2816_v46, %v5565_v22  ;;  %v2835_v59 = vsub.f32 1.0, %v2834_v37  ;;  %v2849_v4 = vmul.f32 %v3921_v41, %v5617_v8  ;;  %vm2840_vm9 = vmor %vm2838_vm8, %vm2839_vm3 }
 0x693   : > { %v2859_v22 = vand.u32 2147483648, %v5617_v8  ;;  %vm2854_vm11 = vweird.f32 %v3921_v41  ;;  %vm2868_vm15 = vweird.f32 %v5622_v45  ;;  %vm2873_vm0 = vcmp.eq.f32.partialorder %v2872_v2, 8.507059e+37 }
 0x694   : > { %v2884_v30 = vadd.f32 %v2882_v47, %v2880_v52  ;;  %v2850_v40 = vsub.f32 1.0, %v2849_v4  ;;  %v2836_v42 = vmul.f32 %v3919_v21, %v2835_v59  ;;  %v2822_v48 = vadd.f32 %v5620_v63, %v2821_v49  ;;  %vm2855_vm4 = vmor %vm2853_vm6, %vm2854_vm11 }
 0x695   : > { %v3923_v0 = vpop.eup %3922  ;;  %v2860_v17 = vor.u32 1.1754944e-38, %v2859_v22  ;;  %vm2903_vm5 = vcmp.eq.s32.totalorder %v2901_v25, 1  ;;  %vm2902_vm1 = vcmp.eq.s32.totalorder %v2898_v10, 1 }
 0x696   : > { %3926 = vtanh.f32 %v2884_v30  ;;  %v2851_v55 = vmul.f32 %v3921_v41, %v2850_v40  ;;  %v2864_v60 = vmul.f32 %v3923_v0, %v5622_v45  ;;  %v2837_v51 = vadd.f32 %v3919_v21, %v2836_v42 }
 0x697   : > { %v3925_v54 = vpop.eup %3924  ;;  %v2826_v53 = vsel %vm5642_vm2, %v5620_v63, %v2822_v48  ;;  %vm2869_vm14 = vweird.f32 %v3923_v0 }
 0x698   : > { %v2865_v32 = vsub.f32 1.0, %v2864_v60  ;;  %v2852_v62 = vadd.f32 %v3921_v41, %v2851_v55  ;;  %v2841_v31 = vsel %vm2840_vm9, %v3919_v21, %v2837_v51  ;;  %v2831_v8 = vsel %vm2828_vm12, %v2830_v43, %v2826_v53  ;;  %vm2870_vm13 = vmor %vm2868_vm15, %vm2869_vm14 }
 0x699   : > { %v2846_v11 = vsel %vm2843_vm10, %v2845_v61, %v2841_v31 }
 0x69a   : > { %v2856_v36 = vsel %vm2855_vm4, %v3921_v41, %v2852_v62  ;;  %v2866_v33 = vmul.f32 %v3923_v0, %v2865_v32  ;;  %v2883_v7 = vmul.f32 %v3925_v54, %v2846_v11 }
 0x69b   : > { %v2861_v6 = vsel %vm2858_vm7, %v2860_v17, %v2856_v36 }
 0x69c   : > { %v3927_v20 = vpop.eup %3926  ;;  %v2881_v12 = vmul.f32 %v2861_v6, %v5575_v24  ;;  %v2867_v39 = vadd.f32 %v3923_v0, %v2866_v33  ;;  %v2875_v24 = vor.u32 1.1754944e-38, %v2874_v18 }
 0x69d   : > { %v2888_v34 = vmul.f32 %v3927_v20, %v2831_v8 }
 0x69e   : > { %v2885_v13 = vadd.f32 %v2883_v7, %v2881_v12  ;;  %v2871_v27 = vsel %vm2870_vm13, %v3923_v0, %v2867_v39 }
 0x69f   : > { %v2876_v1 = vsel %vm2873_vm0, %v2875_v24, %v2871_v27  ;;  %v2904_v45 = vsel %vm2902_vm1, %v2888_v34, %v5582_v29 }
 0x6a0   : > { %3928 = vtanh.f32 %v2885_v13 }
 0x6a6   : > { %v3929_v63 = vpop.eup %3928 }
 0x6a7   : > { %v2889_v38 = vmul.f32 %v3929_v63, %v2876_v1 }
 0x6a9   : > { %v2905_v58 = vsel %vm2903_vm5, %v2889_v38, %v5588_v44 }
 0x6aa   : > { %v3582_v28 = vpack.c.bf16 %v2905_v58, %v2904_v45 }
 0x6ac   : > { %3590 = vst [vmem:[%s4846_s13 + $0x38] sm:$0xff] %v3582_v28  }
 0x6ad   : > { %4049 = shalt.err (!%p4046_p0)
}
 0x6ae   : > { %s4116_s22 = smov 64   ;;  %s4117_s27 = smov 4  }
 0x6af   : > { %3597 = dma.vmem_to_hbm [thread:$0]  (%p4203_p9), %s2934_s26, 1024, %s2936_s21, %s2918_s8, %s4116_s22, %s4116_s22, %s4117_s27  }
 0x6b0 PF: > { %s2950_s7 = sand.u32 1, %s4088_s18   ;;  %p3610_p1 = pnand %p3081_p12, %p4210_p11 }
 0x6b1   : > { %s2951_s13 = scalar_lea.sflag [#allocation7], %s2950_s7 }
 0x6b2   : > { %p3611_p2 = pneg %p3610_p1 }
 0x6b4   : > { %4083 = dma.done.wait (%p3611_p2), %s2951_s13, 1024  }
 0x6b5   : > { %4085 = vsyncadd (%p3611_p2), %s2951_s13, 4294966272  ;;  %s24_s23 = sadd.s32 1, %s4108_s23   ;;  %s5951_s11 = sld [smem:[#allocation15_spill]] }
 0x6b6   : > { %p21_p3 = scmp.ge.s32.totalorder %s24_s23, 4   ;;  %s5952_s20 = sld [smem:[#allocation18_spill]] }
 0x6b7   : > { %s5953_s21 = sld [smem:[#allocation16_spill]]  ;;  %s5955_s18 = smov %s4092_s19 }
 0x6b8   : > { %s5954_s22 = sld [smem:[#allocation17_spill]]  ;;  %23 = sbr.rel (!%p21_p3) target bundleno = 11 (0xb), region = 130 }
 0x6bb   : > { %s5956_s19 = smov %s5951_s11 }
 0x6bd   :  { %2957 = vsyncpa [#allocation6], 1 }
 0x6be   :  { %2959 = vsyncpa [#allocation6 + $0x1], 1 }
 0x6bf   :  { %2960 = vsyncpa [#allocation9], 1 }
 0x6c0   :  { %2962 = vsyncpa [#allocation9 + $0x1], 1 }
 0x6c1   :  { %2963 = vsyncpa [#allocation7], 1 }
 0x6c2   :  { %2965 = vsyncpa [#allocation7 + $0x1], 1 }

</bundles_post_ra>
